<compile_context>
chip_gen: v5e
topology: v5e:2x2
jax: 0.10.0
libtpu: 0.0.40
codegen_flags: <defaults>
</compile_context>

<pallas_src>
import jax
import jax.numpy as jnp
import numpy as np
from jax.experimental import pallas as pl
from jax.experimental.pallas import tpu as pltpu


def _make_kernel(num_layers: int, hidden: int, t_blk: int, batch: int):
    L, H, B = num_layers, hidden, batch

    def kernel(*refs):
        # ---- inputs ----
        xp_ref, h0_ref, c0_ref, wh0_ref = refs[0:4]
        idx = 4
        wcomb_refs = refs[idx:idx + (L - 1)]; idx += L - 1   # [Wx;Wh] fused (bf16)
        bcomb_refs = refs[idx:idx + (L - 1)]; idx += L - 1   # bx+bh (f32)
        # ---- outputs ----
        out_ref, hN_ref, cN_ref, g_ref = refs[idx:idx + 4]; idx += 4
        # ---- scratch (persists across grid steps) ----
        hx_s, cx_s = refs[idx:idx + 2]

        t_grid = pl.program_id(0)
        is_last = t_grid == pl.num_programs(0) - 1

        @pl.when(t_grid == 0)
        def _():
            hx_s[...] = h0_ref[...]
            cx_s[...] = c0_ref[...]

        # -- load recurrent state into registers ONCE per block (no per-step
        #    scratch round-trips -> no Ref ordering hazard on the serial chain).
        h_reg = [hx_s[i] for i in range(L)]
        c_reg = [cx_s[i] for i in range(L)]

        # -- resident weights: single VMEM load per grid step (already bf16).
        wh0 = wh0_ref[...]                               # (H, 4H)
        wcombs = [r[...] for r in wcomb_refs]            # (2H, 4H) each
        # -- hoist the (1,4H)->(B,4H) bias broadcast out of the time loop.
        bcombs = [jnp.broadcast_to(r[...], (B, 4 * H)) for r in bcomb_refs]

        def sigmoid_slab(x):
            # sigmoid(x) == 0.5*(tanh(x/2)+1): one EUP tanh push per element.
            return 0.5 * jnp.tanh(0.5 * x) + 0.5

        def apply_gates(pre, c_prev):
            # columns are [i | f | o | c]: one wide sigmoid slab, one tanh slab
            sig = sigmoid_slab(pre[:, : 3 * H])
            ig = sig[:, 0 * H:1 * H]
            fg = sig[:, 1 * H:2 * H]
            og = sig[:, 2 * H:3 * H]
            cg = jnp.tanh(pre[:, 3 * H:4 * H])
            cy = fg * c_prev + ig * cg
            hy = og * jnp.tanh(cy)
            return hy, cy, (ig, fg, cg, og)

        gates_last = [None] * L

        for t_local in range(t_blk):
            # ---- layer 0: x-projection precomputed (f32) in the wrapper ----
            pre = xp_ref[t_local] + jnp.dot(
                h_reg[0].astype(jnp.bfloat16), wh0,
                preferred_element_type=jnp.float32)
            hy, cy, gv = apply_gates(pre, c_reg[0])
            h_reg[0], c_reg[0] = hy, cy
            gates_last[0] = gv
            inp = hy

            # ---- layers 1..L-1: single fused dot  [inp | h] @ [Wx ; Wh] ----
            for i in range(1, L):
                cat = jnp.concatenate(
                    [inp.astype(jnp.bfloat16), h_reg[i].astype(jnp.bfloat16)],
                    axis=-1)                                       # (B, 2H) bf16
                pre = (jnp.dot(cat, wcombs[i - 1],
                               preferred_element_type=jnp.float32)
                       + bcombs[i - 1])
                hy, cy, gv = apply_gates(pre, c_reg[i])
                h_reg[i], c_reg[i] = hy, cy
                gates_last[i] = gv
                inp = hy

            out_ref[t_local] = inp          # top-layer hy for this timestep

        # -- write recurrent state back to scratch ONCE per block.
        for i in range(L):
            hx_s[i] = h_reg[i]
            cx_s[i] = c_reg[i]

        @pl.when(is_last)
        def _():
            for i in range(L):
                hN_ref[i] = h_reg[i]
                cN_ref[i] = c_reg[i]
                ig, fg, cg, og = gates_last[i]
                g_ref[0, i] = ig
                g_ref[1, i] = fg
                g_ref[2, i] = cg
                g_ref[3, i] = og

    return kernel


def _reorder_ifco(w):
    """Reorder last-axis gate blocks from [i|f|c|o] to [i|f|o|c]."""
    i, f, c, o = jnp.split(w, 4, axis=-1)
    return jnp.concatenate([i, f, o, c], axis=-1)


def lstm_forward(x_bsi, h0, c0, params, t_blk=None):
    """x_bsi: (B, S, I) batch_first.  params: list of (Wx, Wh, bx, bh) per layer,
    with gate column order [i|f|c|o] and weights stored as (in_dim, 4H)."""
    B, S, I = x_bsi.shape
    L, _, H = h0.shape
    if t_blk is None:
        t_blk = S
        if S > 32:
            for cand in (32, 16, 8, 4, 2, 1):
                if S % cand == 0:
                    t_blk = cand
                    break
    assert S % t_blk == 0, "t_blk must divide S"

    x = jnp.transpose(x_bsi, (1, 0, 2))          # (S, B, I) time-major
    hp = jax.lax.Precision.HIGHEST

    # Layer 0: hoist the (non-recurrent) input projection out of the kernel
    # (kept in f32 / HIGHEST — it is the dominant-magnitude term).
    Wx0, Wh0, bx0, bh0 = params[0]
    Wh0r = _reorder_ifco(Wh0).astype(jnp.bfloat16)                    # (H, 4H) bf16
    b0r = _reorder_ifco(bx0 + bh0)                                    # (1, 4H)
    x_proj = (jnp.dot(x.reshape(S * B, I), _reorder_ifco(Wx0), precision=hp)
              + b0r).reshape(S, B, 4 * H)                             # (S, B, 4H)

    # Layers >= 1: fuse [Wx; Wh] into one (2H, 4H) bf16 matrix; pre-add biases.
    wcomb, bcomb = [], []
    for i in range(1, L):
        Wx, Wh, bx, bh = params[i]
        wcomb.append(_reorder_ifco(
            jnp.concatenate([Wx, Wh], axis=0)).astype(jnp.bfloat16))  # (2H, 4H)
        bcomb.append(_reorder_ifco(bx + bh))                          # (1, 4H) f32

    def full_spec(shape):
        nd = len(shape)
        return pl.BlockSpec(shape, lambda t, _nd=nd: (0,) * _nd)

    in_specs = (
        [pl.BlockSpec((t_blk, B, 4 * H), lambda t: (t, 0, 0)),  # x_proj block
         full_spec((L, B, H)),                                   # h0
         full_spec((L, B, H)),                                   # c0
         full_spec((H, 4 * H))]                                  # Wh layer 0 (bf16)
        + [full_spec(w.shape) for w in wcomb]
        + [full_spec(b.shape) for b in bcomb]
    )

    out_shape = (
        jax.ShapeDtypeStruct((S, B, H), jnp.float32),      # output (time-major)
        jax.ShapeDtypeStruct((L, B, H), jnp.float32),      # h_final
        jax.ShapeDtypeStruct((L, B, H), jnp.float32),      # c_final
        jax.ShapeDtypeStruct((4, L, B, H), jnp.float32),   # last-step gates
    )
    out_specs = (
        pl.BlockSpec((t_blk, B, H), lambda t: (t, 0, 0)),
        full_spec((L, B, H)),
        full_spec((L, B, H)),
        full_spec((4, L, B, H)),
    )

    # Explicit VMEM budget: double-buffered tiles + resident weights + scratch.
    def _nbytes(shape, dtype):
        return int(np.prod(shape)) * jnp.dtype(dtype).itemsize

    raw = (
        2 * _nbytes((t_blk, B, 4 * H), jnp.float32)                 # x_proj tile
        + 2 * _nbytes((t_blk, B, H), jnp.float32)                   # output tile
        + 2 * _nbytes((H, 4 * H), jnp.bfloat16)                     # Wh0
        + 2 * (L - 1) * _nbytes((2 * H, 4 * H), jnp.bfloat16)       # fused weights
        + 2 * (L - 1) * _nbytes((1, 4 * H), jnp.float32)            # fused biases
        + 2 * 4 * _nbytes((L, B, H), jnp.float32)                   # h0,c0,hN,cN
        + 2 * _nbytes((4, L, B, H), jnp.float32)                    # gates out
        + 2 * 2 * _nbytes((L, B, H), jnp.float32)                   # h/c scratch
    )
    vmem_limit = int(min(max(3 * raw, 16 * 1024 * 1024), 48 * 1024 * 1024))

    out, hN, cN, gates = pl.pallas_call(
        _make_kernel(L, H, t_blk, B),
        out_shape=out_shape,
        grid_spec=pltpu.PrefetchScalarGridSpec(
            num_scalar_prefetch=0,
            grid=(S // t_blk,),
            in_specs=in_specs,
            out_specs=out_specs,
            scratch_shapes=[pltpu.VMEM((L, B, H), jnp.float32),
                            pltpu.VMEM((L, B, H), jnp.float32)],
        ),
        compiler_params=pltpu.CompilerParams(
            dimension_semantics=("arbitrary",),
            vmem_limit_bytes=vmem_limit),
    )(x_proj, h0, c0, Wh0r, *wcomb, *bcomb)

    out_bsh = jnp.transpose(out, (1, 0, 2))      # back to batch_first
    gate_dict = {
        "input_gate":  [gates[0, i] for i in range(L)],
        "forget_gate": [gates[1, i] for i in range(L)],
        "cell_gate":   [gates[2, i] for i in range(L)],
        "output_gate": [gates[3, i] for i in range(L)],
    }
    return out_bsh, (hN, cN), gate_dict


def reference_lstm(x_bsi, h0, c0, params):
    """Pure-JAX reference matching the PyTorch module semantics (num_layers <= 2)."""
    L, _, H = h0.shape
    x = jnp.transpose(x_bsi, (1, 0, 2))
    S = x.shape[0]
    hx, cx = h0, c0
    outs, gates_last = [], None
    hp = jax.lax.Precision.HIGHEST
    for t in range(S):
        inp = x[t]
        new_h, new_c, gates_last = [], [], []
        for i in range(L):
            Wx, Wh, bx, bh = params[i]
            g = (jnp.dot(inp, Wx, precision=hp) + jnp.dot(hx[i], Wh, precision=hp)
                 + bx[0] + bh[0])
            ig = jax.nn.sigmoid(g[:, 0:H]); fg = jax.nn.sigmoid(g[:, H:2 * H])
            cg = jnp.tanh(g[:, 2 * H:3 * H]); og = jax.nn.sigmoid(g[:, 3 * H:4 * H])
            cy = fg * cx[i] + ig * cg
            hy = og * jnp.tanh(cy)
            new_h.append(hy); new_c.append(cy)
            gates_last.append((ig, fg, cg, og))
            inp = hy
        hx = jnp.stack(new_h); cx = jnp.stack(new_c)
        outs.append(hx[L - 1])
    out = jnp.transpose(jnp.stack(outs), (1, 0, 2))
    return out, hx, cx, gates_last


if __name__ == "__main__":
    B, S, I, H, L = 8, 8, 32, 128, 2  # batch, seq, input_size, hidden_size, num_layers

    key = jax.random.PRNGKey(0)
    k_x, k_h, k_c, k_w = jax.random.split(key, 4)

    x = jax.random.normal(k_x, (B, S, I), dtype=jnp.float32)
    h0 = jax.random.normal(k_h, (L, B, H), dtype=jnp.float32) * 0.1
    c0 = jax.random.normal(k_c, (L, B, H), dtype=jnp.float32) * 0.1

    # Deterministic parameter init (columns of Wx/Wh are [Wii|Wif|Wic|Wio] etc.,
    # stored pre-transposed as (in_dim, 4H) so the math is x @ W).
    params = []
    for layer in range(L):
        in_dim = I if layer == 0 else H
        bound = 1.0 / np.sqrt(in_dim)
        k_w, k1, k2, k3, k4 = jax.random.split(k_w, 5)
        Wx = jax.random.uniform(k1, (in_dim, 4 * H), jnp.float32, -bound, bound)
        Wh = jax.random.uniform(k2, (H, 4 * H), jnp.float32, -bound, bound)
        bx = jax.random.uniform(k3, (1, 4 * H), jnp.float32, -bound, bound)
        bh = jax.random.uniform(k4, (1, 4 * H), jnp.float32, -bound, bound)
        params.append((Wx, Wh, bx, bh))

    out, (hN, cN), gates = lstm_forward(x, h0, c0, params)
    jax.block_until_ready((out, hN, cN))

    # correctness check against pure-JAX (f32, HIGHEST precision) reference
    r_out, r_h, r_c, r_gates = reference_lstm(x, h0, c0, params)
    np.testing.assert_allclose(np.asarray(out), np.asarray(r_out), rtol=5e-3, atol=5e-3)
    np.testing.assert_allclose(np.asarray(hN), np.asarray(r_h), rtol=5e-3, atol=5e-3)
    np.testing.assert_allclose(np.asarray(cN), np.asarray(r_c), rtol=5e-3, atol=5e-3)
    for i in range(L):
        np.testing.assert_allclose(np.asarray(gates["input_gate"][i]),
                                   np.asarray(r_gates[i][0]), rtol=5e-3, atol=5e-3)
        np.testing.assert_allclose(np.asarray(gates["forget_gate"][i]),
                                   np.asarray(r_gates[i][1]), rtol=5e-3, atol=5e-3)
        np.testing.assert_allclose(np.asarray(gates["cell_gate"][i]),
                                   np.asarray(r_gates[i][2]), rtol=5e-3, atol=5e-3)
        np.testing.assert_allclose(np.asarray(gates["output_gate"][i]),
                                   np.asarray(r_gates[i][3]), rtol=5e-3, atol=5e-3)

    print("KERNEL_OK")
</pallas_src>

<mosaic_0001>
module attributes {stable_mosaic.version = 11 : i64} {
  func.func @kernel(%arg0: i32, %arg1: memref<8x8x512xf32, #tpu.memory_space<vmem>>, %arg2: memref<2x8x128xf32, #tpu.memory_space<vmem>>, %arg3: memref<2x8x128xf32, #tpu.memory_space<vmem>>, %arg4: memref<128x512xbf16, #tpu.memory_space<vmem>>, %arg5: memref<256x512xbf16, #tpu.memory_space<vmem>>, %arg6: memref<1x512xf32, #tpu.memory_space<vmem>>, %arg7: memref<8x8x128xf32, #tpu.memory_space<vmem>>, %arg8: memref<2x8x128xf32, #tpu.memory_space<vmem>>, %arg9: memref<2x8x128xf32, #tpu.memory_space<vmem>>, %arg10: memref<4x2x8x128xf32, #tpu.memory_space<vmem>>, %arg11: memref<2x8x128xf32, #tpu.memory_space<vmem>>, %arg12: memref<2x8x128xf32, #tpu.memory_space<vmem>>) attributes {dimension_semantics = [#tpu.dimension_semantics<arbitrary>], iteration_bounds = array<i64: 1>, scalar_prefetch = 0 : i64, scratch_operands = 2 : i64, tpu.core_type = #tpu.core_type<tc>, window_params = [{transform_indices = @transform_0, window_bounds = array<i64: 8, 8, 512>}, {pipeline_mode = #tpu.pipeline_mode<synchronous>, transform_indices = @transform_1, window_bounds = array<i64: 2, 8, 128>}, {pipeline_mode = #tpu.pipeline_mode<synchronous>, transform_indices = @transform_2, window_bounds = array<i64: 2, 8, 128>}, {pipeline_mode = #tpu.pipeline_mode<synchronous>, transform_indices = @transform_3, window_bounds = array<i64: 128, 512>}, {pipeline_mode = #tpu.pipeline_mode<synchronous>, transform_indices = @transform_4, window_bounds = array<i64: 256, 512>}, {pipeline_mode = #tpu.pipeline_mode<synchronous>, transform_indices = @transform_5, window_bounds = array<i64: 1, 512>}, {transform_indices = @transform_6, window_bounds = array<i64: 8, 8, 128>}, {pipeline_mode = #tpu.pipeline_mode<synchronous>, transform_indices = @transform_7, window_bounds = array<i64: 2, 8, 128>}, {pipeline_mode = #tpu.pipeline_mode<synchronous>, transform_indices = @transform_8, window_bounds = array<i64: 2, 8, 128>}, {pipeline_mode = #tpu.pipeline_mode<synchronous>, transform_indices = @transform_9, window_bounds = array<i64: 4, 2, 8, 128>}]} {
    %c0_i32 = arith.constant 0 : i32
    %0 = arith.cmpi eq, %arg0, %c0_i32 : i32
    %c0_i32_0 = arith.constant 0 : i32
    %1 = arith.cmpi eq, %arg0, %c0_i32_0 : i32
    %2 = arith.extui %1 : i1 to i32
    %c0_i32_1 = arith.constant 0 : i32
    %3 = arith.cmpi ne, %2, %c0_i32_1 : i32
    scf.if %3 {
      %c0_136 = arith.constant 0 : index
      %c0_137 = arith.constant 0 : index
      %c0_138 = arith.constant 0 : index
      %423 = vector.load %arg2[%c0_136, %c0_137, %c0_138] : memref<2x8x128xf32, #tpu.memory_space<vmem>>, vector<2x8x128xf32>
      %c0_139 = arith.constant 0 : index
      %c0_140 = arith.constant 0 : index
      %c0_141 = arith.constant 0 : index
      %424 = vector.load %arg11[%c0_139, %c0_140, %c0_141] : memref<2x8x128xf32, #tpu.memory_space<vmem>>, vector<2x8x128xf32>
      tpu.vector_store %arg11[%c0_139, %c0_140, %c0_141], %423 {strides = array<i32>} : memref<2x8x128xf32, #tpu.memory_space<vmem>>, vector<2x8x128xf32>,
      %c0_142 = arith.constant 0 : index
      %c0_143 = arith.constant 0 : index
      %c0_144 = arith.constant 0 : index
      %425 = vector.load %arg3[%c0_142, %c0_143, %c0_144] : memref<2x8x128xf32, #tpu.memory_space<vmem>>, vector<2x8x128xf32>
      %c0_145 = arith.constant 0 : index
      %c0_146 = arith.constant 0 : index
      %c0_147 = arith.constant 0 : index
      %426 = vector.load %arg12[%c0_145, %c0_146, %c0_147] : memref<2x8x128xf32, #tpu.memory_space<vmem>>, vector<2x8x128xf32>
      tpu.vector_store %arg12[%c0_145, %c0_146, %c0_147], %425 {strides = array<i32>} : memref<2x8x128xf32, #tpu.memory_space<vmem>>, vector<2x8x128xf32>,
    } else {
    }
    %c0 = arith.constant 0 : index
    %c0_2 = arith.constant 0 : index
    %c0_3 = arith.constant 0 : index
    %4 = vector.load %arg11[%c0, %c0_2, %c0_3] : memref<2x8x128xf32, #tpu.memory_space<vmem>>, vector<1x8x128xf32>
    %5 = vector.shape_cast %4 : vector<1x8x128xf32> to vector<8x128xf32>
    %c1 = arith.constant 1 : index
    %c0_4 = arith.constant 0 : index
    %c0_5 = arith.constant 0 : index
    %6 = vector.load %arg11[%c1, %c0_4, %c0_5] : memref<2x8x128xf32, #tpu.memory_space<vmem>>, vector<1x8x128xf32>
    %7 = vector.shape_cast %6 : vector<1x8x128xf32> to vector<8x128xf32>
    %c0_6 = arith.constant 0 : index
    %c0_7 = arith.constant 0 : index
    %c0_8 = arith.constant 0 : index
    %8 = vector.load %arg12[%c0_6, %c0_7, %c0_8] : memref<2x8x128xf32, #tpu.memory_space<vmem>>, vector<1x8x128xf32>
    %9 = vector.shape_cast %8 : vector<1x8x128xf32> to vector<8x128xf32>
    %c1_9 = arith.constant 1 : index
    %c0_10 = arith.constant 0 : index
    %c0_11 = arith.constant 0 : index
    %10 = vector.load %arg12[%c1_9, %c0_10, %c0_11] : memref<2x8x128xf32, #tpu.memory_space<vmem>>, vector<1x8x128xf32>
    %11 = vector.shape_cast %10 : vector<1x8x128xf32> to vector<8x128xf32>
    %c0_12 = arith.constant 0 : index
    %c0_13 = arith.constant 0 : index
    %12 = vector.load %arg4[%c0_12, %c0_13] : memref<128x512xbf16, #tpu.memory_space<vmem>>, vector<128x512xbf16>
    %c0_14 = arith.constant 0 : index
    %c0_15 = arith.constant 0 : index
    %13 = vector.load %arg5[%c0_14, %c0_15] : memref<256x512xbf16, #tpu.memory_space<vmem>>, vector<256x512xbf16>
    %c0_16 = arith.constant 0 : index
    %c0_17 = arith.constant 0 : index
    %14 = vector.load %arg6[%c0_16, %c0_17] : memref<1x512xf32, #tpu.memory_space<vmem>>, vector<1x512xf32>
    %15 = vector.shape_cast %14 : vector<1x512xf32> to vector<1x512xf32>
    %16 = vector.broadcast %15 : vector<1x512xf32> to vector<8x512xf32>
    %c0_18 = arith.constant 0 : index
    %c0_19 = arith.constant 0 : index
    %c0_20 = arith.constant 0 : index
    %17 = vector.load %arg1[%c0_18, %c0_19, %c0_20] : memref<8x8x512xf32, #tpu.memory_space<vmem>>, vector<1x8x512xf32>
    %18 = vector.shape_cast %17 : vector<1x8x512xf32> to vector<8x512xf32>
    %19 = arith.truncf %5 : vector<8x128xf32> to vector<8x128xbf16>
    %cst = arith.constant dense<0.000000e+00> : vector<8x512xf32>
    %20 = tpu.matmul %19, %12, %cst {dimension_numbers = #tpu.dot_dimension_numbers<[1], [0], [0], [1], [0, 0, 1, 1], [], []>} : vector<8x128xbf16>, vector<128x512xbf16>, vector<8x512xf32> -> vector<8x512xf32>
    %21 = arith.addf %18, %20 : vector<8x512xf32>
    %22 = vector.extract_strided_slice %21 {offsets = [0, 0], sizes = [8, 384], strides = [1, 1]} : vector<8x512xf32> to vector<8x384xf32>
    %cst_21 = arith.constant 5.000000e-01 : f32
    %23 = vector.broadcast %cst_21 : f32 to vector<8x384xf32>
    %24 = arith.mulf %23, %22 : vector<8x384xf32>
    %25 = math.tanh %24 : vector<8x384xf32>
    %cst_22 = arith.constant 5.000000e-01 : f32
    %26 = vector.broadcast %cst_22 : f32 to vector<8x384xf32>
    %27 = arith.mulf %26, %25 : vector<8x384xf32>
    %cst_23 = arith.constant 5.000000e-01 : f32
    %28 = vector.broadcast %cst_23 : f32 to vector<8x384xf32>
    %29 = arith.addf %27, %28 : vector<8x384xf32>
    %30 = vector.extract_strided_slice %29 {offsets = [0, 0], sizes = [8, 128], strides = [1, 1]} : vector<8x384xf32> to vector<8x128xf32>
    %31 = vector.extract_strided_slice %29 {offsets = [0, 128], sizes = [8, 128], strides = [1, 1]} : vector<8x384xf32> to vector<8x128xf32>
    %32 = vector.extract_strided_slice %29 {offsets = [0, 256], sizes = [8, 128], strides = [1, 1]} : vector<8x384xf32> to vector<8x128xf32>
    %33 = vector.extract_strided_slice %21 {offsets = [0, 384], sizes = [8, 128], strides = [1, 1]} : vector<8x512xf32> to vector<8x128xf32>
    %34 = math.tanh %33 : vector<8x128xf32>
    %35 = arith.mulf %31, %9 : vector<8x128xf32>
    %36 = arith.mulf %30, %34 : vector<8x128xf32>
    %37 = arith.addf %35, %36 : vector<8x128xf32>
    %38 = math.tanh %37 : vector<8x128xf32>
    %39 = arith.mulf %32, %38 : vector<8x128xf32>
    %40 = arith.truncf %39 : vector<8x128xf32> to vector<8x128xbf16>
    %41 = arith.truncf %7 : vector<8x128xf32> to vector<8x128xbf16>
    %42 = tpu.concatenate %40, %41 in 1 : vector<8x128xbf16>, vector<8x128xbf16> -> vector<8x256xbf16>
    %cst_24 = arith.constant dense<0.000000e+00> : vector<8x512xf32>
    %43 = tpu.matmul %42, %13, %cst_24 {dimension_numbers = #tpu.dot_dimension_numbers<[1], [0], [0], [1], [0, 0, 1, 1], [], []>} : vector<8x256xbf16>, vector<256x512xbf16>, vector<8x512xf32> -> vector<8x512xf32>
    %44 = arith.addf %43, %16 : vector<8x512xf32>
    %45 = vector.extract_strided_slice %44 {offsets = [0, 0], sizes = [8, 384], strides = [1, 1]} : vector<8x512xf32> to vector<8x384xf32>
    %cst_25 = arith.constant 5.000000e-01 : f32
    %46 = vector.broadcast %cst_25 : f32 to vector<8x384xf32>
    %47 = arith.mulf %46, %45 : vector<8x384xf32>
    %48 = math.tanh %47 : vector<8x384xf32>
    %cst_26 = arith.constant 5.000000e-01 : f32
    %49 = vector.broadcast %cst_26 : f32 to vector<8x384xf32>
    %50 = arith.mulf %49, %48 : vector<8x384xf32>
    %cst_27 = arith.constant 5.000000e-01 : f32
    %51 = vector.broadcast %cst_27 : f32 to vector<8x384xf32>
    %52 = arith.addf %50, %51 : vector<8x384xf32>
    %53 = vector.extract_strided_slice %52 {offsets = [0, 0], sizes = [8, 128], strides = [1, 1]} : vector<8x384xf32> to vector<8x128xf32>
    %54 = vector.extract_strided_slice %52 {offsets = [0, 128], sizes = [8, 128], strides = [1, 1]} : vector<8x384xf32> to vector<8x128xf32>
    %55 = vector.extract_strided_slice %52 {offsets = [0, 256], sizes = [8, 128], strides = [1, 1]} : vector<8x384xf32> to vector<8x128xf32>
    %56 = vector.extract_strided_slice %44 {offsets = [0, 384], sizes = [8, 128], strides = [1, 1]} : vector<8x512xf32> to vector<8x128xf32>
    %57 = math.tanh %56 : vector<8x128xf32>
    %58 = arith.mulf %54, %11 : vector<8x128xf32>
    %59 = arith.mulf %53, %57 : vector<8x128xf32>
    %60 = arith.addf %58, %59 : vector<8x128xf32>
    %61 = math.tanh %60 : vector<8x128xf32>
    %62 = arith.mulf %55, %61 : vector<8x128xf32>
    %c0_28 = arith.constant 0 : index
    %c0_29 = arith.constant 0 : index
    %c0_30 = arith.constant 0 : index
    %63 = vector.load %arg7[%c0_28, %c0_29, %c0_30] : memref<8x8x128xf32, #tpu.memory_space<vmem>>, vector<1x8x128xf32>
    %64 = vector.shape_cast %63 : vector<1x8x128xf32> to vector<8x128xf32>
    %65 = vector.shape_cast %62 : vector<8x128xf32> to vector<1x8x128xf32>
    tpu.vector_store %arg7[%c0_28, %c0_29, %c0_30], %65 {strides = array<i32>} : memref<8x8x128xf32, #tpu.memory_space<vmem>>, vector<1x8x128xf32>,
    %c1_31 = arith.constant 1 : index
    %c0_32 = arith.constant 0 : index
    %c0_33 = arith.constant 0 : index
    %66 = vector.load %arg1[%c1_31, %c0_32, %c0_33] : memref<8x8x512xf32, #tpu.memory_space<vmem>>, vector<1x8x512xf32>
    %67 = vector.shape_cast %66 : vector<1x8x512xf32> to vector<8x512xf32>
    %68 = arith.truncf %39 : vector<8x128xf32> to vector<8x128xbf16>
    %cst_34 = arith.constant dense<0.000000e+00> : vector<8x512xf32>
    %69 = tpu.matmul %68, %12, %cst_34 {dimension_numbers = #tpu.dot_dimension_numbers<[1], [0], [0], [1], [0, 0, 1, 1], [], []>} : vector<8x128xbf16>, vector<128x512xbf16>, vector<8x512xf32> -> vector<8x512xf32>
    %70 = arith.addf %67, %69 : vector<8x512xf32>
    %71 = vector.extract_strided_slice %70 {offsets = [0, 0], sizes = [8, 384], strides = [1, 1]} : vector<8x512xf32> to vector<8x384xf32>
    %cst_35 = arith.constant 5.000000e-01 : f32
    %72 = vector.broadcast %cst_35 : f32 to vector<8x384xf32>
    %73 = arith.mulf %72, %71 : vector<8x384xf32>
    %74 = math.tanh %73 : vector<8x384xf32>
    %cst_36 = arith.constant 5.000000e-01 : f32
    %75 = vector.broadcast %cst_36 : f32 to vector<8x384xf32>
    %76 = arith.mulf %75, %74 : vector<8x384xf32>
    %cst_37 = arith.constant 5.000000e-01 : f32
    %77 = vector.broadcast %cst_37 : f32 to vector<8x384xf32>
    %78 = arith.addf %76, %77 : vector<8x384xf32>
    %79 = vector.extract_strided_slice %78 {offsets = [0, 0], sizes = [8, 128], strides = [1, 1]} : vector<8x384xf32> to vector<8x128xf32>
    %80 = vector.extract_strided_slice %78 {offsets = [0, 128], sizes = [8, 128], strides = [1, 1]} : vector<8x384xf32> to vector<8x128xf32>
    %81 = vector.extract_strided_slice %78 {offsets = [0, 256], sizes = [8, 128], strides = [1, 1]} : vector<8x384xf32> to vector<8x128xf32>
    %82 = vector.extract_strided_slice %70 {offsets = [0, 384], sizes = [8, 128], strides = [1, 1]} : vector<8x512xf32> to vector<8x128xf32>
    %83 = math.tanh %82 : vector<8x128xf32>
    %84 = arith.mulf %80, %37 : vector<8x128xf32>
    %85 = arith.mulf %79, %83 : vector<8x128xf32>
    %86 = arith.addf %84, %85 : vector<8x128xf32>
    %87 = math.tanh %86 : vector<8x128xf32>
    %88 = arith.mulf %81, %87 : vector<8x128xf32>
    %89 = arith.truncf %88 : vector<8x128xf32> to vector<8x128xbf16>
    %90 = arith.truncf %62 : vector<8x128xf32> to vector<8x128xbf16>
    %91 = tpu.concatenate %89, %90 in 1 : vector<8x128xbf16>, vector<8x128xbf16> -> vector<8x256xbf16>
    %cst_38 = arith.constant dense<0.000000e+00> : vector<8x512xf32>
    %92 = tpu.matmul %91, %13, %cst_38 {dimension_numbers = #tpu.dot_dimension_numbers<[1], [0], [0], [1], [0, 0, 1, 1], [], []>} : vector<8x256xbf16>, vector<256x512xbf16>, vector<8x512xf32> -> vector<8x512xf32>
    %93 = arith.addf %92, %16 : vector<8x512xf32>
    %94 = vector.extract_strided_slice %93 {offsets = [0, 0], sizes = [8, 384], strides = [1, 1]} : vector<8x512xf32> to vector<8x384xf32>
    %cst_39 = arith.constant 5.000000e-01 : f32
    %95 = vector.broadcast %cst_39 : f32 to vector<8x384xf32>
    %96 = arith.mulf %95, %94 : vector<8x384xf32>
    %97 = math.tanh %96 : vector<8x384xf32>
    %cst_40 = arith.constant 5.000000e-01 : f32
    %98 = vector.broadcast %cst_40 : f32 to vector<8x384xf32>
    %99 = arith.mulf %98, %97 : vector<8x384xf32>
    %cst_41 = arith.constant 5.000000e-01 : f32
    %100 = vector.broadcast %cst_41 : f32 to vector<8x384xf32>
    %101 = arith.addf %99, %100 : vector<8x384xf32>
    %102 = vector.extract_strided_slice %101 {offsets = [0, 0], sizes = [8, 128], strides = [1, 1]} : vector<8x384xf32> to vector<8x128xf32>
    %103 = vector.extract_strided_slice %101 {offsets = [0, 128], sizes = [8, 128], strides = [1, 1]} : vector<8x384xf32> to vector<8x128xf32>
    %104 = vector.extract_strided_slice %101 {offsets = [0, 256], sizes = [8, 128], strides = [1, 1]} : vector<8x384xf32> to vector<8x128xf32>
    %105 = vector.extract_strided_slice %93 {offsets = [0, 384], sizes = [8, 128], strides = [1, 1]} : vector<8x512xf32> to vector<8x128xf32>
    %106 = math.tanh %105 : vector<8x128xf32>
    %107 = arith.mulf %103, %60 : vector<8x128xf32>
    %108 = arith.mulf %102, %106 : vector<8x128xf32>
    %109 = arith.addf %107, %108 : vector<8x128xf32>
    %110 = math.tanh %109 : vector<8x128xf32>
    %111 = arith.mulf %104, %110 : vector<8x128xf32>
    %c1_42 = arith.constant 1 : index
    %c0_43 = arith.constant 0 : index
    %c0_44 = arith.constant 0 : index
    %112 = vector.load %arg7[%c1_42, %c0_43, %c0_44] : memref<8x8x128xf32, #tpu.memory_space<vmem>>, vector<1x8x128xf32>
    %113 = vector.shape_cast %112 : vector<1x8x128xf32> to vector<8x128xf32>
    %114 = vector.shape_cast %111 : vector<8x128xf32> to vector<1x8x128xf32>
    tpu.vector_store %arg7[%c1_42, %c0_43, %c0_44], %114 {strides = array<i32>} : memref<8x8x128xf32, #tpu.memory_space<vmem>>, vector<1x8x128xf32>,
    %c2 = arith.constant 2 : index
    %c0_45 = arith.constant 0 : index
    %c0_46 = arith.constant 0 : index
    %115 = vector.load %arg1[%c2, %c0_45, %c0_46] : memref<8x8x512xf32, #tpu.memory_space<vmem>>, vector<1x8x512xf32>
    %116 = vector.shape_cast %115 : vector<1x8x512xf32> to vector<8x512xf32>
    %117 = arith.truncf %88 : vector<8x128xf32> to vector<8x128xbf16>
    %cst_47 = arith.constant dense<0.000000e+00> : vector<8x512xf32>
    %118 = tpu.matmul %117, %12, %cst_47 {dimension_numbers = #tpu.dot_dimension_numbers<[1], [0], [0], [1], [0, 0, 1, 1], [], []>} : vector<8x128xbf16>, vector<128x512xbf16>, vector<8x512xf32> -> vector<8x512xf32>
    %119 = arith.addf %116, %118 : vector<8x512xf32>
    %120 = vector.extract_strided_slice %119 {offsets = [0, 0], sizes = [8, 384], strides = [1, 1]} : vector<8x512xf32> to vector<8x384xf32>
    %cst_48 = arith.constant 5.000000e-01 : f32
    %121 = vector.broadcast %cst_48 : f32 to vector<8x384xf32>
    %122 = arith.mulf %121, %120 : vector<8x384xf32>
    %123 = math.tanh %122 : vector<8x384xf32>
    %cst_49 = arith.constant 5.000000e-01 : f32
    %124 = vector.broadcast %cst_49 : f32 to vector<8x384xf32>
    %125 = arith.mulf %124, %123 : vector<8x384xf32>
    %cst_50 = arith.constant 5.000000e-01 : f32
    %126 = vector.broadcast %cst_50 : f32 to vector<8x384xf32>
    %127 = arith.addf %125, %126 : vector<8x384xf32>
    %128 = vector.extract_strided_slice %127 {offsets = [0, 0], sizes = [8, 128], strides = [1, 1]} : vector<8x384xf32> to vector<8x128xf32>
    %129 = vector.extract_strided_slice %127 {offsets = [0, 128], sizes = [8, 128], strides = [1, 1]} : vector<8x384xf32> to vector<8x128xf32>
    %130 = vector.extract_strided_slice %127 {offsets = [0, 256], sizes = [8, 128], strides = [1, 1]} : vector<8x384xf32> to vector<8x128xf32>
    %131 = vector.extract_strided_slice %119 {offsets = [0, 384], sizes = [8, 128], strides = [1, 1]} : vector<8x512xf32> to vector<8x128xf32>
    %132 = math.tanh %131 : vector<8x128xf32>
    %133 = arith.mulf %129, %86 : vector<8x128xf32>
    %134 = arith.mulf %128, %132 : vector<8x128xf32>
    %135 = arith.addf %133, %134 : vector<8x128xf32>
    %136 = math.tanh %135 : vector<8x128xf32>
    %137 = arith.mulf %130, %136 : vector<8x128xf32>
    %138 = arith.truncf %137 : vector<8x128xf32> to vector<8x128xbf16>
    %139 = arith.truncf %111 : vector<8x128xf32> to vector<8x128xbf16>
    %140 = tpu.concatenate %138, %139 in 1 : vector<8x128xbf16>, vector<8x128xbf16> -> vector<8x256xbf16>
    %cst_51 = arith.constant dense<0.000000e+00> : vector<8x512xf32>
    %141 = tpu.matmul %140, %13, %cst_51 {dimension_numbers = #tpu.dot_dimension_numbers<[1], [0], [0], [1], [0, 0, 1, 1], [], []>} : vector<8x256xbf16>, vector<256x512xbf16>, vector<8x512xf32> -> vector<8x512xf32>
    %142 = arith.addf %141, %16 : vector<8x512xf32>
    %143 = vector.extract_strided_slice %142 {offsets = [0, 0], sizes = [8, 384], strides = [1, 1]} : vector<8x512xf32> to vector<8x384xf32>
    %cst_52 = arith.constant 5.000000e-01 : f32
    %144 = vector.broadcast %cst_52 : f32 to vector<8x384xf32>
    %145 = arith.mulf %144, %143 : vector<8x384xf32>
    %146 = math.tanh %145 : vector<8x384xf32>
    %cst_53 = arith.constant 5.000000e-01 : f32
    %147 = vector.broadcast %cst_53 : f32 to vector<8x384xf32>
    %148 = arith.mulf %147, %146 : vector<8x384xf32>
    %cst_54 = arith.constant 5.000000e-01 : f32
    %149 = vector.broadcast %cst_54 : f32 to vector<8x384xf32>
    %150 = arith.addf %148, %149 : vector<8x384xf32>
    %151 = vector.extract_strided_slice %150 {offsets = [0, 0], sizes = [8, 128], strides = [1, 1]} : vector<8x384xf32> to vector<8x128xf32>
    %152 = vector.extract_strided_slice %150 {offsets = [0, 128], sizes = [8, 128], strides = [1, 1]} : vector<8x384xf32> to vector<8x128xf32>
    %153 = vector.extract_strided_slice %150 {offsets = [0, 256], sizes = [8, 128], strides = [1, 1]} : vector<8x384xf32> to vector<8x128xf32>
    %154 = vector.extract_strided_slice %142 {offsets = [0, 384], sizes = [8, 128], strides = [1, 1]} : vector<8x512xf32> to vector<8x128xf32>
    %155 = math.tanh %154 : vector<8x128xf32>
    %156 = arith.mulf %152, %109 : vector<8x128xf32>
    %157 = arith.mulf %151, %155 : vector<8x128xf32>
    %158 = arith.addf %156, %157 : vector<8x128xf32>
    %159 = math.tanh %158 : vector<8x128xf32>
    %160 = arith.mulf %153, %159 : vector<8x128xf32>
    %c2_55 = arith.constant 2 : index
    %c0_56 = arith.constant 0 : index
    %c0_57 = arith.constant 0 : index
    %161 = vector.load %arg7[%c2_55, %c0_56, %c0_57] : memref<8x8x128xf32, #tpu.memory_space<vmem>>, vector<1x8x128xf32>
    %162 = vector.shape_cast %161 : vector<1x8x128xf32> to vector<8x128xf32>
    %163 = vector.shape_cast %160 : vector<8x128xf32> to vector<1x8x128xf32>
    tpu.vector_store %arg7[%c2_55, %c0_56, %c0_57], %163 {strides = array<i32>} : memref<8x8x128xf32, #tpu.memory_space<vmem>>, vector<1x8x128xf32>,
    %c3 = arith.constant 3 : index
    %c0_58 = arith.constant 0 : index
    %c0_59 = arith.constant 0 : index
    %164 = vector.load %arg1[%c3, %c0_58, %c0_59] : memref<8x8x512xf32, #tpu.memory_space<vmem>>, vector<1x8x512xf32>
    %165 = vector.shape_cast %164 : vector<1x8x512xf32> to vector<8x512xf32>
    %166 = arith.truncf %137 : vector<8x128xf32> to vector<8x128xbf16>
    %cst_60 = arith.constant dense<0.000000e+00> : vector<8x512xf32>
    %167 = tpu.matmul %166, %12, %cst_60 {dimension_numbers = #tpu.dot_dimension_numbers<[1], [0], [0], [1], [0, 0, 1, 1], [], []>} : vector<8x128xbf16>, vector<128x512xbf16>, vector<8x512xf32> -> vector<8x512xf32>
    %168 = arith.addf %165, %167 : vector<8x512xf32>
    %169 = vector.extract_strided_slice %168 {offsets = [0, 0], sizes = [8, 384], strides = [1, 1]} : vector<8x512xf32> to vector<8x384xf32>
    %cst_61 = arith.constant 5.000000e-01 : f32
    %170 = vector.broadcast %cst_61 : f32 to vector<8x384xf32>
    %171 = arith.mulf %170, %169 : vector<8x384xf32>
    %172 = math.tanh %171 : vector<8x384xf32>
    %cst_62 = arith.constant 5.000000e-01 : f32
    %173 = vector.broadcast %cst_62 : f32 to vector<8x384xf32>
    %174 = arith.mulf %173, %172 : vector<8x384xf32>
    %cst_63 = arith.constant 5.000000e-01 : f32
    %175 = vector.broadcast %cst_63 : f32 to vector<8x384xf32>
    %176 = arith.addf %174, %175 : vector<8x384xf32>
    %177 = vector.extract_strided_slice %176 {offsets = [0, 0], sizes = [8, 128], strides = [1, 1]} : vector<8x384xf32> to vector<8x128xf32>
    %178 = vector.extract_strided_slice %176 {offsets = [0, 128], sizes = [8, 128], strides = [1, 1]} : vector<8x384xf32> to vector<8x128xf32>
    %179 = vector.extract_strided_slice %176 {offsets = [0, 256], sizes = [8, 128], strides = [1, 1]} : vector<8x384xf32> to vector<8x128xf32>
    %180 = vector.extract_strided_slice %168 {offsets = [0, 384], sizes = [8, 128], strides = [1, 1]} : vector<8x512xf32> to vector<8x128xf32>
    %181 = math.tanh %180 : vector<8x128xf32>
    %182 = arith.mulf %178, %135 : vector<8x128xf32>
    %183 = arith.mulf %177, %181 : vector<8x128xf32>
    %184 = arith.addf %182, %183 : vector<8x128xf32>
    %185 = math.tanh %184 : vector<8x128xf32>
    %186 = arith.mulf %179, %185 : vector<8x128xf32>
    %187 = arith.truncf %186 : vector<8x128xf32> to vector<8x128xbf16>
    %188 = arith.truncf %160 : vector<8x128xf32> to vector<8x128xbf16>
    %189 = tpu.concatenate %187, %188 in 1 : vector<8x128xbf16>, vector<8x128xbf16> -> vector<8x256xbf16>
    %cst_64 = arith.constant dense<0.000000e+00> : vector<8x512xf32>
    %190 = tpu.matmul %189, %13, %cst_64 {dimension_numbers = #tpu.dot_dimension_numbers<[1], [0], [0], [1], [0, 0, 1, 1], [], []>} : vector<8x256xbf16>, vector<256x512xbf16>, vector<8x512xf32> -> vector<8x512xf32>
    %191 = arith.addf %190, %16 : vector<8x512xf32>
    %192 = vector.extract_strided_slice %191 {offsets = [0, 0], sizes = [8, 384], strides = [1, 1]} : vector<8x512xf32> to vector<8x384xf32>
    %cst_65 = arith.constant 5.000000e-01 : f32
    %193 = vector.broadcast %cst_65 : f32 to vector<8x384xf32>
    %194 = arith.mulf %193, %192 : vector<8x384xf32>
    %195 = math.tanh %194 : vector<8x384xf32>
    %cst_66 = arith.constant 5.000000e-01 : f32
    %196 = vector.broadcast %cst_66 : f32 to vector<8x384xf32>
    %197 = arith.mulf %196, %195 : vector<8x384xf32>
    %cst_67 = arith.constant 5.000000e-01 : f32
    %198 = vector.broadcast %cst_67 : f32 to vector<8x384xf32>
    %199 = arith.addf %197, %198 : vector<8x384xf32>
    %200 = vector.extract_strided_slice %199 {offsets = [0, 0], sizes = [8, 128], strides = [1, 1]} : vector<8x384xf32> to vector<8x128xf32>
    %201 = vector.extract_strided_slice %199 {offsets = [0, 128], sizes = [8, 128], strides = [1, 1]} : vector<8x384xf32> to vector<8x128xf32>
    %202 = vector.extract_strided_slice %199 {offsets = [0, 256], sizes = [8, 128], strides = [1, 1]} : vector<8x384xf32> to vector<8x128xf32>
    %203 = vector.extract_strided_slice %191 {offsets = [0, 384], sizes = [8, 128], strides = [1, 1]} : vector<8x512xf32> to vector<8x128xf32>
    %204 = math.tanh %203 : vector<8x128xf32>
    %205 = arith.mulf %201, %158 : vector<8x128xf32>
    %206 = arith.mulf %200, %204 : vector<8x128xf32>
    %207 = arith.addf %205, %206 : vector<8x128xf32>
    %208 = math.tanh %207 : vector<8x128xf32>
    %209 = arith.mulf %202, %208 : vector<8x128xf32>
    %c3_68 = arith.constant 3 : index
    %c0_69 = arith.constant 0 : index
    %c0_70 = arith.constant 0 : index
    %210 = vector.load %arg7[%c3_68, %c0_69, %c0_70] : memref<8x8x128xf32, #tpu.memory_space<vmem>>, vector<1x8x128xf32>
    %211 = vector.shape_cast %210 : vector<1x8x128xf32> to vector<8x128xf32>
    %212 = vector.shape_cast %209 : vector<8x128xf32> to vector<1x8x128xf32>
    tpu.vector_store %arg7[%c3_68, %c0_69, %c0_70], %212 {strides = array<i32>} : memref<8x8x128xf32, #tpu.memory_space<vmem>>, vector<1x8x128xf32>,
    %c4 = arith.constant 4 : index
    %c0_71 = arith.constant 0 : index
    %c0_72 = arith.constant 0 : index
    %213 = vector.load %arg1[%c4, %c0_71, %c0_72] : memref<8x8x512xf32, #tpu.memory_space<vmem>>, vector<1x8x512xf32>
    %214 = vector.shape_cast %213 : vector<1x8x512xf32> to vector<8x512xf32>
    %215 = arith.truncf %186 : vector<8x128xf32> to vector<8x128xbf16>
    %cst_73 = arith.constant dense<0.000000e+00> : vector<8x512xf32>
    %216 = tpu.matmul %215, %12, %cst_73 {dimension_numbers = #tpu.dot_dimension_numbers<[1], [0], [0], [1], [0, 0, 1, 1], [], []>} : vector<8x128xbf16>, vector<128x512xbf16>, vector<8x512xf32> -> vector<8x512xf32>
    %217 = arith.addf %214, %216 : vector<8x512xf32>
    %218 = vector.extract_strided_slice %217 {offsets = [0, 0], sizes = [8, 384], strides = [1, 1]} : vector<8x512xf32> to vector<8x384xf32>
    %cst_74 = arith.constant 5.000000e-01 : f32
    %219 = vector.broadcast %cst_74 : f32 to vector<8x384xf32>
    %220 = arith.mulf %219, %218 : vector<8x384xf32>
    %221 = math.tanh %220 : vector<8x384xf32>
    %cst_75 = arith.constant 5.000000e-01 : f32
    %222 = vector.broadcast %cst_75 : f32 to vector<8x384xf32>
    %223 = arith.mulf %222, %221 : vector<8x384xf32>
    %cst_76 = arith.constant 5.000000e-01 : f32
    %224 = vector.broadcast %cst_76 : f32 to vector<8x384xf32>
    %225 = arith.addf %223, %224 : vector<8x384xf32>
    %226 = vector.extract_strided_slice %225 {offsets = [0, 0], sizes = [8, 128], strides = [1, 1]} : vector<8x384xf32> to vector<8x128xf32>
    %227 = vector.extract_strided_slice %225 {offsets = [0, 128], sizes = [8, 128], strides = [1, 1]} : vector<8x384xf32> to vector<8x128xf32>
    %228 = vector.extract_strided_slice %225 {offsets = [0, 256], sizes = [8, 128], strides = [1, 1]} : vector<8x384xf32> to vector<8x128xf32>
    %229 = vector.extract_strided_slice %217 {offsets = [0, 384], sizes = [8, 128], strides = [1, 1]} : vector<8x512xf32> to vector<8x128xf32>
    %230 = math.tanh %229 : vector<8x128xf32>
    %231 = arith.mulf %227, %184 : vector<8x128xf32>
    %232 = arith.mulf %226, %230 : vector<8x128xf32>
    %233 = arith.addf %231, %232 : vector<8x128xf32>
    %234 = math.tanh %233 : vector<8x128xf32>
    %235 = arith.mulf %228, %234 : vector<8x128xf32>
    %236 = arith.truncf %235 : vector<8x128xf32> to vector<8x128xbf16>
    %237 = arith.truncf %209 : vector<8x128xf32> to vector<8x128xbf16>
    %238 = tpu.concatenate %236, %237 in 1 : vector<8x128xbf16>, vector<8x128xbf16> -> vector<8x256xbf16>
    %cst_77 = arith.constant dense<0.000000e+00> : vector<8x512xf32>
    %239 = tpu.matmul %238, %13, %cst_77 {dimension_numbers = #tpu.dot_dimension_numbers<[1], [0], [0], [1], [0, 0, 1, 1], [], []>} : vector<8x256xbf16>, vector<256x512xbf16>, vector<8x512xf32> -> vector<8x512xf32>
    %240 = arith.addf %239, %16 : vector<8x512xf32>
    %241 = vector.extract_strided_slice %240 {offsets = [0, 0], sizes = [8, 384], strides = [1, 1]} : vector<8x512xf32> to vector<8x384xf32>
    %cst_78 = arith.constant 5.000000e-01 : f32
    %242 = vector.broadcast %cst_78 : f32 to vector<8x384xf32>
    %243 = arith.mulf %242, %241 : vector<8x384xf32>
    %244 = math.tanh %243 : vector<8x384xf32>
    %cst_79 = arith.constant 5.000000e-01 : f32
    %245 = vector.broadcast %cst_79 : f32 to vector<8x384xf32>
    %246 = arith.mulf %245, %244 : vector<8x384xf32>
    %cst_80 = arith.constant 5.000000e-01 : f32
    %247 = vector.broadcast %cst_80 : f32 to vector<8x384xf32>
    %248 = arith.addf %246, %247 : vector<8x384xf32>
    %249 = vector.extract_strided_slice %248 {offsets = [0, 0], sizes = [8, 128], strides = [1, 1]} : vector<8x384xf32> to vector<8x128xf32>
    %250 = vector.extract_strided_slice %248 {offsets = [0, 128], sizes = [8, 128], strides = [1, 1]} : vector<8x384xf32> to vector<8x128xf32>
    %251 = vector.extract_strided_slice %248 {offsets = [0, 256], sizes = [8, 128], strides = [1, 1]} : vector<8x384xf32> to vector<8x128xf32>
    %252 = vector.extract_strided_slice %240 {offsets = [0, 384], sizes = [8, 128], strides = [1, 1]} : vector<8x512xf32> to vector<8x128xf32>
    %253 = math.tanh %252 : vector<8x128xf32>
    %254 = arith.mulf %250, %207 : vector<8x128xf32>
    %255 = arith.mulf %249, %253 : vector<8x128xf32>
    %256 = arith.addf %254, %255 : vector<8x128xf32>
    %257 = math.tanh %256 : vector<8x128xf32>
    %258 = arith.mulf %251, %257 : vector<8x128xf32>
    %c4_81 = arith.constant 4 : index
    %c0_82 = arith.constant 0 : index
    %c0_83 = arith.constant 0 : index
    %259 = vector.load %arg7[%c4_81, %c0_82, %c0_83] : memref<8x8x128xf32, #tpu.memory_space<vmem>>, vector<1x8x128xf32>
    %260 = vector.shape_cast %259 : vector<1x8x128xf32> to vector<8x128xf32>
    %261 = vector.shape_cast %258 : vector<8x128xf32> to vector<1x8x128xf32>
    tpu.vector_store %arg7[%c4_81, %c0_82, %c0_83], %261 {strides = array<i32>} : memref<8x8x128xf32, #tpu.memory_space<vmem>>, vector<1x8x128xf32>,
    %c5 = arith.constant 5 : index
    %c0_84 = arith.constant 0 : index
    %c0_85 = arith.constant 0 : index
    %262 = vector.load %arg1[%c5, %c0_84, %c0_85] : memref<8x8x512xf32, #tpu.memory_space<vmem>>, vector<1x8x512xf32>
    %263 = vector.shape_cast %262 : vector<1x8x512xf32> to vector<8x512xf32>
    %264 = arith.truncf %235 : vector<8x128xf32> to vector<8x128xbf16>
    %cst_86 = arith.constant dense<0.000000e+00> : vector<8x512xf32>
    %265 = tpu.matmul %264, %12, %cst_86 {dimension_numbers = #tpu.dot_dimension_numbers<[1], [0], [0], [1], [0, 0, 1, 1], [], []>} : vector<8x128xbf16>, vector<128x512xbf16>, vector<8x512xf32> -> vector<8x512xf32>
    %266 = arith.addf %263, %265 : vector<8x512xf32>
    %267 = vector.extract_strided_slice %266 {offsets = [0, 0], sizes = [8, 384], strides = [1, 1]} : vector<8x512xf32> to vector<8x384xf32>
    %cst_87 = arith.constant 5.000000e-01 : f32
    %268 = vector.broadcast %cst_87 : f32 to vector<8x384xf32>
    %269 = arith.mulf %268, %267 : vector<8x384xf32>
    %270 = math.tanh %269 : vector<8x384xf32>
    %cst_88 = arith.constant 5.000000e-01 : f32
    %271 = vector.broadcast %cst_88 : f32 to vector<8x384xf32>
    %272 = arith.mulf %271, %270 : vector<8x384xf32>
    %cst_89 = arith.constant 5.000000e-01 : f32
    %273 = vector.broadcast %cst_89 : f32 to vector<8x384xf32>
    %274 = arith.addf %272, %273 : vector<8x384xf32>
    %275 = vector.extract_strided_slice %274 {offsets = [0, 0], sizes = [8, 128], strides = [1, 1]} : vector<8x384xf32> to vector<8x128xf32>
    %276 = vector.extract_strided_slice %274 {offsets = [0, 128], sizes = [8, 128], strides = [1, 1]} : vector<8x384xf32> to vector<8x128xf32>
    %277 = vector.extract_strided_slice %274 {offsets = [0, 256], sizes = [8, 128], strides = [1, 1]} : vector<8x384xf32> to vector<8x128xf32>
    %278 = vector.extract_strided_slice %266 {offsets = [0, 384], sizes = [8, 128], strides = [1, 1]} : vector<8x512xf32> to vector<8x128xf32>
    %279 = math.tanh %278 : vector<8x128xf32>
    %280 = arith.mulf %276, %233 : vector<8x128xf32>
    %281 = arith.mulf %275, %279 : vector<8x128xf32>
    %282 = arith.addf %280, %281 : vector<8x128xf32>
    %283 = math.tanh %282 : vector<8x128xf32>
    %284 = arith.mulf %277, %283 : vector<8x128xf32>
    %285 = arith.truncf %284 : vector<8x128xf32> to vector<8x128xbf16>
    %286 = arith.truncf %258 : vector<8x128xf32> to vector<8x128xbf16>
    %287 = tpu.concatenate %285, %286 in 1 : vector<8x128xbf16>, vector<8x128xbf16> -> vector<8x256xbf16>
    %cst_90 = arith.constant dense<0.000000e+00> : vector<8x512xf32>
    %288 = tpu.matmul %287, %13, %cst_90 {dimension_numbers = #tpu.dot_dimension_numbers<[1], [0], [0], [1], [0, 0, 1, 1], [], []>} : vector<8x256xbf16>, vector<256x512xbf16>, vector<8x512xf32> -> vector<8x512xf32>
    %289 = arith.addf %288, %16 : vector<8x512xf32>
    %290 = vector.extract_strided_slice %289 {offsets = [0, 0], sizes = [8, 384], strides = [1, 1]} : vector<8x512xf32> to vector<8x384xf32>
    %cst_91 = arith.constant 5.000000e-01 : f32
    %291 = vector.broadcast %cst_91 : f32 to vector<8x384xf32>
    %292 = arith.mulf %291, %290 : vector<8x384xf32>
    %293 = math.tanh %292 : vector<8x384xf32>
    %cst_92 = arith.constant 5.000000e-01 : f32
    %294 = vector.broadcast %cst_92 : f32 to vector<8x384xf32>
    %295 = arith.mulf %294, %293 : vector<8x384xf32>
    %cst_93 = arith.constant 5.000000e-01 : f32
    %296 = vector.broadcast %cst_93 : f32 to vector<8x384xf32>
    %297 = arith.addf %295, %296 : vector<8x384xf32>
    %298 = vector.extract_strided_slice %297 {offsets = [0, 0], sizes = [8, 128], strides = [1, 1]} : vector<8x384xf32> to vector<8x128xf32>
    %299 = vector.extract_strided_slice %297 {offsets = [0, 128], sizes = [8, 128], strides = [1, 1]} : vector<8x384xf32> to vector<8x128xf32>
    %300 = vector.extract_strided_slice %297 {offsets = [0, 256], sizes = [8, 128], strides = [1, 1]} : vector<8x384xf32> to vector<8x128xf32>
    %301 = vector.extract_strided_slice %289 {offsets = [0, 384], sizes = [8, 128], strides = [1, 1]} : vector<8x512xf32> to vector<8x128xf32>
    %302 = math.tanh %301 : vector<8x128xf32>
    %303 = arith.mulf %299, %256 : vector<8x128xf32>
    %304 = arith.mulf %298, %302 : vector<8x128xf32>
    %305 = arith.addf %303, %304 : vector<8x128xf32>
    %306 = math.tanh %305 : vector<8x128xf32>
    %307 = arith.mulf %300, %306 : vector<8x128xf32>
    %c5_94 = arith.constant 5 : index
    %c0_95 = arith.constant 0 : index
    %c0_96 = arith.constant 0 : index
    %308 = vector.load %arg7[%c5_94, %c0_95, %c0_96] : memref<8x8x128xf32, #tpu.memory_space<vmem>>, vector<1x8x128xf32>
    %309 = vector.shape_cast %308 : vector<1x8x128xf32> to vector<8x128xf32>
    %310 = vector.shape_cast %307 : vector<8x128xf32> to vector<1x8x128xf32>
    tpu.vector_store %arg7[%c5_94, %c0_95, %c0_96], %310 {strides = array<i32>} : memref<8x8x128xf32, #tpu.memory_space<vmem>>, vector<1x8x128xf32>,
    %c6 = arith.constant 6 : index
    %c0_97 = arith.constant 0 : index
    %c0_98 = arith.constant 0 : index
    %311 = vector.load %arg1[%c6, %c0_97, %c0_98] : memref<8x8x512xf32, #tpu.memory_space<vmem>>, vector<1x8x512xf32>
    %312 = vector.shape_cast %311 : vector<1x8x512xf32> to vector<8x512xf32>
    %313 = arith.truncf %284 : vector<8x128xf32> to vector<8x128xbf16>
    %cst_99 = arith.constant dense<0.000000e+00> : vector<8x512xf32>
    %314 = tpu.matmul %313, %12, %cst_99 {dimension_numbers = #tpu.dot_dimension_numbers<[1], [0], [0], [1], [0, 0, 1, 1], [], []>} : vector<8x128xbf16>, vector<128x512xbf16>, vector<8x512xf32> -> vector<8x512xf32>
    %315 = arith.addf %312, %314 : vector<8x512xf32>
    %316 = vector.extract_strided_slice %315 {offsets = [0, 0], sizes = [8, 384], strides = [1, 1]} : vector<8x512xf32> to vector<8x384xf32>
    %cst_100 = arith.constant 5.000000e-01 : f32
    %317 = vector.broadcast %cst_100 : f32 to vector<8x384xf32>
    %318 = arith.mulf %317, %316 : vector<8x384xf32>
    %319 = math.tanh %318 : vector<8x384xf32>
    %cst_101 = arith.constant 5.000000e-01 : f32
    %320 = vector.broadcast %cst_101 : f32 to vector<8x384xf32>
    %321 = arith.mulf %320, %319 : vector<8x384xf32>
    %cst_102 = arith.constant 5.000000e-01 : f32
    %322 = vector.broadcast %cst_102 : f32 to vector<8x384xf32>
    %323 = arith.addf %321, %322 : vector<8x384xf32>
    %324 = vector.extract_strided_slice %323 {offsets = [0, 0], sizes = [8, 128], strides = [1, 1]} : vector<8x384xf32> to vector<8x128xf32>
    %325 = vector.extract_strided_slice %323 {offsets = [0, 128], sizes = [8, 128], strides = [1, 1]} : vector<8x384xf32> to vector<8x128xf32>
    %326 = vector.extract_strided_slice %323 {offsets = [0, 256], sizes = [8, 128], strides = [1, 1]} : vector<8x384xf32> to vector<8x128xf32>
    %327 = vector.extract_strided_slice %315 {offsets = [0, 384], sizes = [8, 128], strides = [1, 1]} : vector<8x512xf32> to vector<8x128xf32>
    %328 = math.tanh %327 : vector<8x128xf32>
    %329 = arith.mulf %325, %282 : vector<8x128xf32>
    %330 = arith.mulf %324, %328 : vector<8x128xf32>
    %331 = arith.addf %329, %330 : vector<8x128xf32>
    %332 = math.tanh %331 : vector<8x128xf32>
    %333 = arith.mulf %326, %332 : vector<8x128xf32>
    %334 = arith.truncf %333 : vector<8x128xf32> to vector<8x128xbf16>
    %335 = arith.truncf %307 : vector<8x128xf32> to vector<8x128xbf16>
    %336 = tpu.concatenate %334, %335 in 1 : vector<8x128xbf16>, vector<8x128xbf16> -> vector<8x256xbf16>
    %cst_103 = arith.constant dense<0.000000e+00> : vector<8x512xf32>
    %337 = tpu.matmul %336, %13, %cst_103 {dimension_numbers = #tpu.dot_dimension_numbers<[1], [0], [0], [1], [0, 0, 1, 1], [], []>} : vector<8x256xbf16>, vector<256x512xbf16>, vector<8x512xf32> -> vector<8x512xf32>
    %338 = arith.addf %337, %16 : vector<8x512xf32>
    %339 = vector.extract_strided_slice %338 {offsets = [0, 0], sizes = [8, 384], strides = [1, 1]} : vector<8x512xf32> to vector<8x384xf32>
    %cst_104 = arith.constant 5.000000e-01 : f32
    %340 = vector.broadcast %cst_104 : f32 to vector<8x384xf32>
    %341 = arith.mulf %340, %339 : vector<8x384xf32>
    %342 = math.tanh %341 : vector<8x384xf32>
    %cst_105 = arith.constant 5.000000e-01 : f32
    %343 = vector.broadcast %cst_105 : f32 to vector<8x384xf32>
    %344 = arith.mulf %343, %342 : vector<8x384xf32>
    %cst_106 = arith.constant 5.000000e-01 : f32
    %345 = vector.broadcast %cst_106 : f32 to vector<8x384xf32>
    %346 = arith.addf %344, %345 : vector<8x384xf32>
    %347 = vector.extract_strided_slice %346 {offsets = [0, 0], sizes = [8, 128], strides = [1, 1]} : vector<8x384xf32> to vector<8x128xf32>
    %348 = vector.extract_strided_slice %346 {offsets = [0, 128], sizes = [8, 128], strides = [1, 1]} : vector<8x384xf32> to vector<8x128xf32>
    %349 = vector.extract_strided_slice %346 {offsets = [0, 256], sizes = [8, 128], strides = [1, 1]} : vector<8x384xf32> to vector<8x128xf32>
    %350 = vector.extract_strided_slice %338 {offsets = [0, 384], sizes = [8, 128], strides = [1, 1]} : vector<8x512xf32> to vector<8x128xf32>
    %351 = math.tanh %350 : vector<8x128xf32>
    %352 = arith.mulf %348, %305 : vector<8x128xf32>
    %353 = arith.mulf %347, %351 : vector<8x128xf32>
    %354 = arith.addf %352, %353 : vector<8x128xf32>
    %355 = math.tanh %354 : vector<8x128xf32>
    %356 = arith.mulf %349, %355 : vector<8x128xf32>
    %c6_107 = arith.constant 6 : index
    %c0_108 = arith.constant 0 : index
    %c0_109 = arith.constant 0 : index
    %357 = vector.load %arg7[%c6_107, %c0_108, %c0_109] : memref<8x8x128xf32, #tpu.memory_space<vmem>>, vector<1x8x128xf32>
    %358 = vector.shape_cast %357 : vector<1x8x128xf32> to vector<8x128xf32>
    %359 = vector.shape_cast %356 : vector<8x128xf32> to vector<1x8x128xf32>
    tpu.vector_store %arg7[%c6_107, %c0_108, %c0_109], %359 {strides = array<i32>} : memref<8x8x128xf32, #tpu.memory_space<vmem>>, vector<1x8x128xf32>,
    %c7 = arith.constant 7 : index
    %c0_110 = arith.constant 0 : index
    %c0_111 = arith.constant 0 : index
    %360 = vector.load %arg1[%c7, %c0_110, %c0_111] : memref<8x8x512xf32, #tpu.memory_space<vmem>>, vector<1x8x512xf32>
    %361 = vector.shape_cast %360 : vector<1x8x512xf32> to vector<8x512xf32>
    %362 = arith.truncf %333 : vector<8x128xf32> to vector<8x128xbf16>
    %cst_112 = arith.constant dense<0.000000e+00> : vector<8x512xf32>
    %363 = tpu.matmul %362, %12, %cst_112 {dimension_numbers = #tpu.dot_dimension_numbers<[1], [0], [0], [1], [0, 0, 1, 1], [], []>} : vector<8x128xbf16>, vector<128x512xbf16>, vector<8x512xf32> -> vector<8x512xf32>
    %364 = arith.addf %361, %363 : vector<8x512xf32>
    %365 = vector.extract_strided_slice %364 {offsets = [0, 0], sizes = [8, 384], strides = [1, 1]} : vector<8x512xf32> to vector<8x384xf32>
    %cst_113 = arith.constant 5.000000e-01 : f32
    %366 = vector.broadcast %cst_113 : f32 to vector<8x384xf32>
    %367 = arith.mulf %366, %365 : vector<8x384xf32>
    %368 = math.tanh %367 : vector<8x384xf32>
    %cst_114 = arith.constant 5.000000e-01 : f32
    %369 = vector.broadcast %cst_114 : f32 to vector<8x384xf32>
    %370 = arith.mulf %369, %368 : vector<8x384xf32>
    %cst_115 = arith.constant 5.000000e-01 : f32
    %371 = vector.broadcast %cst_115 : f32 to vector<8x384xf32>
    %372 = arith.addf %370, %371 : vector<8x384xf32>
    %373 = vector.extract_strided_slice %372 {offsets = [0, 0], sizes = [8, 128], strides = [1, 1]} : vector<8x384xf32> to vector<8x128xf32>
    %374 = vector.extract_strided_slice %372 {offsets = [0, 128], sizes = [8, 128], strides = [1, 1]} : vector<8x384xf32> to vector<8x128xf32>
    %375 = vector.extract_strided_slice %372 {offsets = [0, 256], sizes = [8, 128], strides = [1, 1]} : vector<8x384xf32> to vector<8x128xf32>
    %376 = vector.extract_strided_slice %364 {offsets = [0, 384], sizes = [8, 128], strides = [1, 1]} : vector<8x512xf32> to vector<8x128xf32>
    %377 = math.tanh %376 : vector<8x128xf32>
    %378 = arith.mulf %374, %331 : vector<8x128xf32>
    %379 = arith.mulf %373, %377 : vector<8x128xf32>
    %380 = arith.addf %378, %379 : vector<8x128xf32>
    %381 = math.tanh %380 : vector<8x128xf32>
    %382 = arith.mulf %375, %381 : vector<8x128xf32>
    %383 = arith.truncf %382 : vector<8x128xf32> to vector<8x128xbf16>
    %384 = arith.truncf %356 : vector<8x128xf32> to vector<8x128xbf16>
    %385 = tpu.concatenate %383, %384 in 1 : vector<8x128xbf16>, vector<8x128xbf16> -> vector<8x256xbf16>
    %cst_116 = arith.constant dense<0.000000e+00> : vector<8x512xf32>
    %386 = tpu.matmul %385, %13, %cst_116 {dimension_numbers = #tpu.dot_dimension_numbers<[1], [0], [0], [1], [0, 0, 1, 1], [], []>} : vector<8x256xbf16>, vector<256x512xbf16>, vector<8x512xf32> -> vector<8x512xf32>
    %387 = arith.addf %386, %16 : vector<8x512xf32>
    %388 = vector.extract_strided_slice %387 {offsets = [0, 0], sizes = [8, 384], strides = [1, 1]} : vector<8x512xf32> to vector<8x384xf32>
    %cst_117 = arith.constant 5.000000e-01 : f32
    %389 = vector.broadcast %cst_117 : f32 to vector<8x384xf32>
    %390 = arith.mulf %389, %388 : vector<8x384xf32>
    %391 = math.tanh %390 : vector<8x384xf32>
    %cst_118 = arith.constant 5.000000e-01 : f32
    %392 = vector.broadcast %cst_118 : f32 to vector<8x384xf32>
    %393 = arith.mulf %392, %391 : vector<8x384xf32>
    %cst_119 = arith.constant 5.000000e-01 : f32
    %394 = vector.broadcast %cst_119 : f32 to vector<8x384xf32>
    %395 = arith.addf %393, %394 : vector<8x384xf32>
    %396 = vector.extract_strided_slice %395 {offsets = [0, 0], sizes = [8, 128], strides = [1, 1]} : vector<8x384xf32> to vector<8x128xf32>
    %397 = vector.extract_strided_slice %395 {offsets = [0, 128], sizes = [8, 128], strides = [1, 1]} : vector<8x384xf32> to vector<8x128xf32>
    %398 = vector.extract_strided_slice %395 {offsets = [0, 256], sizes = [8, 128], strides = [1, 1]} : vector<8x384xf32> to vector<8x128xf32>
    %399 = vector.extract_strided_slice %387 {offsets = [0, 384], sizes = [8, 128], strides = [1, 1]} : vector<8x512xf32> to vector<8x128xf32>
    %400 = math.tanh %399 : vector<8x128xf32>
    %401 = arith.mulf %397, %354 : vector<8x128xf32>
    %402 = arith.mulf %396, %400 : vector<8x128xf32>
    %403 = arith.addf %401, %402 : vector<8x128xf32>
    %404 = math.tanh %403 : vector<8x128xf32>
    %405 = arith.mulf %398, %404 : vector<8x128xf32>
    %c7_120 = arith.constant 7 : index
    %c0_121 = arith.constant 0 : index
    %c0_122 = arith.constant 0 : index
    %406 = vector.load %arg7[%c7_120, %c0_121, %c0_122] : memref<8x8x128xf32, #tpu.memory_space<vmem>>, vector<1x8x128xf32>
    %407 = vector.shape_cast %406 : vector<1x8x128xf32> to vector<8x128xf32>
    %408 = vector.shape_cast %405 : vector<8x128xf32> to vector<1x8x128xf32>
    tpu.vector_store %arg7[%c7_120, %c0_121, %c0_122], %408 {strides = array<i32>} : memref<8x8x128xf32, #tpu.memory_space<vmem>>, vector<1x8x128xf32>,
    %c0_123 = arith.constant 0 : index
    %c0_124 = arith.constant 0 : index
    %c0_125 = arith.constant 0 : index
    %409 = vector.load %arg11[%c0_123, %c0_124, %c0_125] : memref<2x8x128xf32, #tpu.memory_space<vmem>>, vector<1x8x128xf32>
    %410 = vector.shape_cast %409 : vector<1x8x128xf32> to vector<8x128xf32>
    %411 = vector.shape_cast %382 : vector<8x128xf32> to vector<1x8x128xf32>
    tpu.vector_store %arg11[%c0_123, %c0_124, %c0_125], %411 {strides = array<i32>} : memref<2x8x128xf32, #tpu.memory_space<vmem>>, vector<1x8x128xf32>,
    %c0_126 = arith.constant 0 : index
    %c0_127 = arith.constant 0 : index
    %c0_128 = arith.constant 0 : index
    %412 = vector.load %arg12[%c0_126, %c0_127, %c0_128] : memref<2x8x128xf32, #tpu.memory_space<vmem>>, vector<1x8x128xf32>
    %413 = vector.shape_cast %412 : vector<1x8x128xf32> to vector<8x128xf32>
    %414 = vector.shape_cast %380 : vector<8x128xf32> to vector<1x8x128xf32>
    tpu.vector_store %arg12[%c0_126, %c0_127, %c0_128], %414 {strides = array<i32>} : memref<2x8x128xf32, #tpu.memory_space<vmem>>, vector<1x8x128xf32>,
    %c1_129 = arith.constant 1 : index
    %c0_130 = arith.constant 0 : index
    %c0_131 = arith.constant 0 : index
    %415 = vector.load %arg11[%c1_129, %c0_130, %c0_131] : memref<2x8x128xf32, #tpu.memory_space<vmem>>, vector<1x8x128xf32>
    %416 = vector.shape_cast %415 : vector<1x8x128xf32> to vector<8x128xf32>
    %417 = vector.shape_cast %405 : vector<8x128xf32> to vector<1x8x128xf32>
    tpu.vector_store %arg11[%c1_129, %c0_130, %c0_131], %417 {strides = array<i32>} : memref<2x8x128xf32, #tpu.memory_space<vmem>>, vector<1x8x128xf32>,
    %c1_132 = arith.constant 1 : index
    %c0_133 = arith.constant 0 : index
    %c0_134 = arith.constant 0 : index
    %418 = vector.load %arg12[%c1_132, %c0_133, %c0_134] : memref<2x8x128xf32, #tpu.memory_space<vmem>>, vector<1x8x128xf32>
    %419 = vector.shape_cast %418 : vector<1x8x128xf32> to vector<8x128xf32>
    %420 = vector.shape_cast %403 : vector<8x128xf32> to vector<1x8x128xf32>
    tpu.vector_store %arg12[%c1_132, %c0_133, %c0_134], %420 {strides = array<i32>} : memref<2x8x128xf32, #tpu.memory_space<vmem>>, vector<1x8x128xf32>,
    %421 = arith.extui %0 : i1 to i32
    %c0_i32_135 = arith.constant 0 : i32
    %422 = arith.cmpi ne, %421, %c0_i32_135 : i32
    scf.if %422 {
      %c0_136 = arith.constant 0 : index
      %c0_137 = arith.constant 0 : index
      %c0_138 = arith.constant 0 : index
      %423 = vector.load %arg8[%c0_136, %c0_137, %c0_138] : memref<2x8x128xf32, #tpu.memory_space<vmem>>, vector<1x8x128xf32>
      %424 = vector.shape_cast %423 : vector<1x8x128xf32> to vector<8x128xf32>
      %425 = vector.shape_cast %382 : vector<8x128xf32> to vector<1x8x128xf32>
      tpu.vector_store %arg8[%c0_136, %c0_137, %c0_138], %425 {strides = array<i32>} : memref<2x8x128xf32, #tpu.memory_space<vmem>>, vector<1x8x128xf32>,
      %c0_139 = arith.constant 0 : index
      %c0_140 = arith.constant 0 : index
      %c0_141 = arith.constant 0 : index
      %426 = vector.load %arg9[%c0_139, %c0_140, %c0_141] : memref<2x8x128xf32, #tpu.memory_space<vmem>>, vector<1x8x128xf32>
      %427 = vector.shape_cast %426 : vector<1x8x128xf32> to vector<8x128xf32>
      %428 = vector.shape_cast %380 : vector<8x128xf32> to vector<1x8x128xf32>
      tpu.vector_store %arg9[%c0_139, %c0_140, %c0_141], %428 {strides = array<i32>} : memref<2x8x128xf32, #tpu.memory_space<vmem>>, vector<1x8x128xf32>,
      %c0_142 = arith.constant 0 : index
      %c0_143 = arith.constant 0 : index
      %c0_144 = arith.constant 0 : index
      %c0_145 = arith.constant 0 : index
      %429 = vector.load %arg10[%c0_142, %c0_143, %c0_144, %c0_145] : memref<4x2x8x128xf32, #tpu.memory_space<vmem>>, vector<1x1x8x128xf32>
      %430 = vector.shape_cast %429 : vector<1x1x8x128xf32> to vector<8x128xf32>
      %431 = vector.shape_cast %373 : vector<8x128xf32> to vector<1x1x8x128xf32>
      tpu.vector_store %arg10[%c0_142, %c0_143, %c0_144, %c0_145], %431 {strides = array<i32>} : memref<4x2x8x128xf32, #tpu.memory_space<vmem>>, vector<1x1x8x128xf32>,
      %c1_146 = arith.constant 1 : index
      %c0_147 = arith.constant 0 : index
      %c0_148 = arith.constant 0 : index
      %c0_149 = arith.constant 0 : index
      %432 = vector.load %arg10[%c1_146, %c0_147, %c0_148, %c0_149] : memref<4x2x8x128xf32, #tpu.memory_space<vmem>>, vector<1x1x8x128xf32>
      %433 = vector.shape_cast %432 : vector<1x1x8x128xf32> to vector<8x128xf32>
      %434 = vector.shape_cast %374 : vector<8x128xf32> to vector<1x1x8x128xf32>
      tpu.vector_store %arg10[%c1_146, %c0_147, %c0_148, %c0_149], %434 {strides = array<i32>} : memref<4x2x8x128xf32, #tpu.memory_space<vmem>>, vector<1x1x8x128xf32>,
      %c2_150 = arith.constant 2 : index
      %c0_151 = arith.constant 0 : index
      %c0_152 = arith.constant 0 : index
      %c0_153 = arith.constant 0 : index
      %435 = vector.load %arg10[%c2_150, %c0_151, %c0_152, %c0_153] : memref<4x2x8x128xf32, #tpu.memory_space<vmem>>, vector<1x1x8x128xf32>
      %436 = vector.shape_cast %435 : vector<1x1x8x128xf32> to vector<8x128xf32>
      %437 = vector.shape_cast %377 : vector<8x128xf32> to vector<1x1x8x128xf32>
      tpu.vector_store %arg10[%c2_150, %c0_151, %c0_152, %c0_153], %437 {strides = array<i32>} : memref<4x2x8x128xf32, #tpu.memory_space<vmem>>, vector<1x1x8x128xf32>,
      %c3_154 = arith.constant 3 : index
      %c0_155 = arith.constant 0 : index
      %c0_156 = arith.constant 0 : index
      %c0_157 = arith.constant 0 : index
      %438 = vector.load %arg10[%c3_154, %c0_155, %c0_156, %c0_157] : memref<4x2x8x128xf32, #tpu.memory_space<vmem>>, vector<1x1x8x128xf32>
      %439 = vector.shape_cast %438 : vector<1x1x8x128xf32> to vector<8x128xf32>
      %440 = vector.shape_cast %375 : vector<8x128xf32> to vector<1x1x8x128xf32>
      tpu.vector_store %arg10[%c3_154, %c0_155, %c0_156, %c0_157], %440 {strides = array<i32>} : memref<4x2x8x128xf32, #tpu.memory_space<vmem>>, vector<1x1x8x128xf32>,
      %c1_158 = arith.constant 1 : index
      %c0_159 = arith.constant 0 : index
      %c0_160 = arith.constant 0 : index
      %441 = vector.load %arg8[%c1_158, %c0_159, %c0_160] : memref<2x8x128xf32, #tpu.memory_space<vmem>>, vector<1x8x128xf32>
      %442 = vector.shape_cast %441 : vector<1x8x128xf32> to vector<8x128xf32>
      %443 = vector.shape_cast %405 : vector<8x128xf32> to vector<1x8x128xf32>
      tpu.vector_store %arg8[%c1_158, %c0_159, %c0_160], %443 {strides = array<i32>} : memref<2x8x128xf32, #tpu.memory_space<vmem>>, vector<1x8x128xf32>,
      %c1_161 = arith.constant 1 : index
      %c0_162 = arith.constant 0 : index
      %c0_163 = arith.constant 0 : index
      %444 = vector.load %arg9[%c1_161, %c0_162, %c0_163] : memref<2x8x128xf32, #tpu.memory_space<vmem>>, vector<1x8x128xf32>
      %445 = vector.shape_cast %444 : vector<1x8x128xf32> to vector<8x128xf32>
      %446 = vector.shape_cast %403 : vector<8x128xf32> to vector<1x8x128xf32>
      tpu.vector_store %arg9[%c1_161, %c0_162, %c0_163], %446 {strides = array<i32>} : memref<2x8x128xf32, #tpu.memory_space<vmem>>, vector<1x8x128xf32>,
      %c0_164 = arith.constant 0 : index
      %c1_165 = arith.constant 1 : index
      %c0_166 = arith.constant 0 : index
      %c0_167 = arith.constant 0 : index
      %447 = vector.load %arg10[%c0_164, %c1_165, %c0_166, %c0_167] : memref<4x2x8x128xf32, #tpu.memory_space<vmem>>, vector<1x1x8x128xf32>
      %448 = vector.shape_cast %447 : vector<1x1x8x128xf32> to vector<8x128xf32>
      %449 = vector.shape_cast %396 : vector<8x128xf32> to vector<1x1x8x128xf32>
      tpu.vector_store %arg10[%c0_164, %c1_165, %c0_166, %c0_167], %449 {strides = array<i32>} : memref<4x2x8x128xf32, #tpu.memory_space<vmem>>, vector<1x1x8x128xf32>,
      %c1_168 = arith.constant 1 : index
      %c1_169 = arith.constant 1 : index
      %c0_170 = arith.constant 0 : index
      %c0_171 = arith.constant 0 : index
      %450 = vector.load %arg10[%c1_168, %c1_169, %c0_170, %c0_171] : memref<4x2x8x128xf32, #tpu.memory_space<vmem>>, vector<1x1x8x128xf32>
      %451 = vector.shape_cast %450 : vector<1x1x8x128xf32> to vector<8x128xf32>
      %452 = vector.shape_cast %397 : vector<8x128xf32> to vector<1x1x8x128xf32>
      tpu.vector_store %arg10[%c1_168, %c1_169, %c0_170, %c0_171], %452 {strides = array<i32>} : memref<4x2x8x128xf32, #tpu.memory_space<vmem>>, vector<1x1x8x128xf32>,
      %c2_172 = arith.constant 2 : index
      %c1_173 = arith.constant 1 : index
      %c0_174 = arith.constant 0 : index
      %c0_175 = arith.constant 0 : index
      %453 = vector.load %arg10[%c2_172, %c1_173, %c0_174, %c0_175] : memref<4x2x8x128xf32, #tpu.memory_space<vmem>>, vector<1x1x8x128xf32>
      %454 = vector.shape_cast %453 : vector<1x1x8x128xf32> to vector<8x128xf32>
      %455 = vector.shape_cast %400 : vector<8x128xf32> to vector<1x1x8x128xf32>
      tpu.vector_store %arg10[%c2_172, %c1_173, %c0_174, %c0_175], %455 {strides = array<i32>} : memref<4x2x8x128xf32, #tpu.memory_space<vmem>>, vector<1x1x8x128xf32>,
      %c3_176 = arith.constant 3 : index
      %c1_177 = arith.constant 1 : index
      %c0_178 = arith.constant 0 : index
      %c0_179 = arith.constant 0 : index
      %456 = vector.load %arg10[%c3_176, %c1_177, %c0_178, %c0_179] : memref<4x2x8x128xf32, #tpu.memory_space<vmem>>, vector<1x1x8x128xf32>
      %457 = vector.shape_cast %456 : vector<1x1x8x128xf32> to vector<8x128xf32>
      %458 = vector.shape_cast %398 : vector<8x128xf32> to vector<1x1x8x128xf32>
      tpu.vector_store %arg10[%c3_176, %c1_177, %c0_178, %c0_179], %458 {strides = array<i32>} : memref<4x2x8x128xf32, #tpu.memory_space<vmem>>, vector<1x1x8x128xf32>,
    } else {
    }
    return
  }
  func.func @transform_0(%arg0: i32) -> (i32, i32, i32) {
    %c0_i32 = arith.constant 0 : i32
    %c0_i32_0 = arith.constant 0 : i32
    %c0_i32_1 = arith.constant 0 : i32
    return %arg0, %c0_i32, %c0_i32_0 : i32, i32, i32
  }
  func.func @transform_1(%arg0: i32) -> (i32, i32, i32) {
    %c0_i32 = arith.constant 0 : i32
    %c0_i32_0 = arith.constant 0 : i32
    %c0_i32_1 = arith.constant 0 : i32
    %c0_i32_2 = arith.constant 0 : i32
    return %c0_i32, %c0_i32_0, %c0_i32_1 : i32, i32, i32
  }
  func.func @transform_2(%arg0: i32) -> (i32, i32, i32) {
    %c0_i32 = arith.constant 0 : i32
    %c0_i32_0 = arith.constant 0 : i32
    %c0_i32_1 = arith.constant 0 : i32
    %c0_i32_2 = arith.constant 0 : i32
    return %c0_i32, %c0_i32_0, %c0_i32_1 : i32, i32, i32
  }
  func.func @transform_3(%arg0: i32) -> (i32, i32) {
    %c0_i32 = arith.constant 0 : i32
    %c0_i32_0 = arith.constant 0 : i32
    %c0_i32_1 = arith.constant 0 : i32
    return %c0_i32, %c0_i32_0 : i32, i32
  }
  func.func @transform_4(%arg0: i32) -> (i32, i32) {
    %c0_i32 = arith.constant 0 : i32
    %c0_i32_0 = arith.constant 0 : i32
    %c0_i32_1 = arith.constant 0 : i32
    return %c0_i32, %c0_i32_0 : i32, i32
  }
  func.func @transform_5(%arg0: i32) -> (i32, i32) {
    %c0_i32 = arith.constant 0 : i32
    %c0_i32_0 = arith.constant 0 : i32
    %c0_i32_1 = arith.constant 0 : i32
    return %c0_i32, %c0_i32_0 : i32, i32
  }
  func.func @transform_6(%arg0: i32) -> (i32, i32, i32) {
    %c0_i32 = arith.constant 0 : i32
    %c0_i32_0 = arith.constant 0 : i32
    %c0_i32_1 = arith.constant 0 : i32
    return %arg0, %c0_i32, %c0_i32_0 : i32, i32, i32
  }
  func.func @transform_7(%arg0: i32) -> (i32, i32, i32) {
    %c0_i32 = arith.constant 0 : i32
    %c0_i32_0 = arith.constant 0 : i32
    %c0_i32_1 = arith.constant 0 : i32
    %c0_i32_2 = arith.constant 0 : i32
    return %c0_i32, %c0_i32_0, %c0_i32_1 : i32, i32, i32
  }
  func.func @transform_8(%arg0: i32) -> (i32, i32, i32) {
    %c0_i32 = arith.constant 0 : i32
    %c0_i32_0 = arith.constant 0 : i32
    %c0_i32_1 = arith.constant 0 : i32
    %c0_i32_2 = arith.constant 0 : i32
    return %c0_i32, %c0_i32_0, %c0_i32_1 : i32, i32, i32
  }
  func.func @transform_9(%arg0: i32) -> (i32, i32, i32, i32) {
    %c0_i32 = arith.constant 0 : i32
    %c0_i32_0 = arith.constant 0 : i32
    %c0_i32_1 = arith.constant 0 : i32
    %c0_i32_2 = arith.constant 0 : i32
    %c0_i32_3 = arith.constant 0 : i32
    return %c0_i32, %c0_i32_0, %c0_i32_1, %c0_i32_2 : i32, i32, i32, i32
  }
}

</mosaic_0001>

<bundles_post_ra>
// kernel: tpu_custom_call.1
= control target key start
LH: loop header
LB: loop body
LE: loop exit
PB: predicated region body
PF: predicated region fallthrough
CT: control target
= control target key end

     0   :  { %15 = vsyncpa [#allocation5], 0  ;;  %s4523_s0 = inlined_call_operand.hbm [shape: f32[8,8,512], index: 0, kind: input, shape index: {}]   ;;  %s4524_s1 = inlined_call_operand.hbm [shape: f32[2,8,128], index: 1, kind: input, shape index: {}]   ;;  %s4525_s2 = inlined_call_operand.hbm [shape: f32[2,8,128], index: 2, kind: input, shape index: {}]   ;;  %s4526_s3 = inlined_call_operand.hbm [shape: bf16[128,512], index: 3, kind: input, shape index: {}]   ;;  %s4527_s4 = inlined_call_operand.hbm [shape: bf16[256,512], index: 4, kind: input, shape index: {}]   ;;  %s4528_s5 = inlined_call_operand.vmem [shape: f32[1,512], index: 5, kind: input, shape index: {}]   ;;  %s4529_s6 = inlined_call_operand.hbm [shape: f32[8,8,128], index: 6, kind: output, shape index: {0}]   ;;  %s4530_s7 = inlined_call_operand.hbm [shape: f32[2,8,128], index: 7, kind: output, shape index: {1}]   ;;  %s4531_s8 = inlined_call_operand.hbm [shape: f32[2,8,128], index: 8, kind: output, shape index: {2}]   ;;  %s4532_s9 = inlined_call_operand.hbm [shape: f32[4,2,8,128], index: 9, kind: output, shape index: {3}]  }
   0x1   :  { %16 = vsyncpa [#allocation8], 0 }
   0x2   :  { %17 = vsyncpa [#allocation11], 0 }
   0x3   :  { %18 = vsyncpa [#allocation6], 0 }
   0x4   :  { %19 = vsyncpa [#allocation15], 0  ;;  %s38_s11 = sshll.u32 %s4524_s1, 4  ;;  %s39_s11 = int_to_ptr.hbm [resolvable:$true] %s38_s11 }
   0x5   :  { %20 = vsyncpa [#allocation18], 0  ;;  %s3336_s12 = smov [#allocation7]   ;;  %s64_s16 = sshll.u32 %s4526_s3, 4  ;;  %s65_s16 = int_to_ptr.hbm [resolvable:$true] %s64_s16 }
   0x6   :  { %s40_s13 = sshll.u32 %s3336_s12, 4  ;;  %s3337_s17 = smov 128   ;;  %s41_s13 = int_to_ptr.vmem [resolvable:$true] %s40_s13 }
   0x7   :  { %s3338_s18 = smov 8   ;;  %s3339_s19 = smov [#allocation10]  }
   0x8   :  { %46 = dma.hbm_to_vmem [thread:$0]  %s39_s11, 256, %s41_s13, [#allocation8], %s3337_s17, %s3337_s17, %s3338_s18  }
   0x9   :  { %s66_s20 = sshll.u32 %s3339_s19, 4  ;;  %s3340_s1 = smov 256   ;;  %s67_s20 = int_to_ptr.vmem [resolvable:$true] %s66_s20 }
   0xa   :  { %s3341_s21 = smov 16   ;;  %s25_s24 = sshll.u32 %s4523_s0, 4  ;;  %s26_s24 = int_to_ptr.hbm [resolvable:$true] %s25_s24 }
   0xb   :  { %72 = dma.hbm_to_vmem [thread:$0]  %s65_s16, 4096, %s67_s20, [#allocation11], %s3340_s1, %s3340_s1, %s3341_s21  }
   0xc   :  { %s3342_s25 = smov [#allocation4]   ;;  %s51_s28 = sshll.u32 %s4525_s2, 4  ;;  %s52_s28 = int_to_ptr.hbm [resolvable:$true] %s51_s28 }
   0xd   :  { %s27_s3 = sshll.u32 %s3342_s25, 4  ;;  %s3343_s29 = smov 512   ;;  %s28_s3 = int_to_ptr.vmem [resolvable:$true] %s27_s3 }
   0xe   :  { %s3344_s30 = smov 32   ;;  %s3345_s10 = smov [#allocation9]  }
   0xf   :  { %33 = dma.hbm_to_vmem [thread:$0]  %s26_s24, 4096, %s28_s3, [#allocation5], %s3343_s29, %s3343_s29, %s3344_s30  }
  0x10   :  { %s53_s11 = sshll.u32 %s3345_s10, 4  ;;  %s77_s14 = sshll.u32 %s4527_s4, 4  ;;  %s54_s11 = int_to_ptr.vmem [resolvable:$true] %s53_s11  ;;  %s78_s14 = int_to_ptr.hbm [resolvable:$true] %s77_s14 }
  0x11   :  { %59 = dma.hbm_to_vmem [thread:$0]  %s52_s28, 256, %s54_s11, [#allocation8], %s3337_s17, %s3337_s17, %s3338_s18  }
  0x12   :  { %s3346_s0 = smov [#allocation12]  }
  0x13   :  { %s79_s15 = sshll.u32 %s3346_s0, 4  ;;  %s80_s15 = int_to_ptr.vmem [resolvable:$true] %s79_s15 }
  0x14   :  { %85 = dma.hbm_to_vmem [thread:$0]  %s78_s14, 8192, %s80_s15, [#allocation11], %s3340_s1, %s3340_s1, %s3341_s21  }
  0x15   :  { %3324 = dma.done.wait [#allocation5], 4096  }
  0x16   :  { %3325 = vsyncadd [#allocation5], 4294963200 }
  0x17   :  { %3326 = dma.done.wait [#allocation8], 512  }
  0x18   :  { %3327 = vsyncadd [#allocation8], 4294966784 }
  0x19   :  { %3328 = dma.done.wait [#allocation11], 12288  }
  0x1a   :  { %3329 = vsyncadd [#allocation11], 4294955008  ;;  %v2567_v0 = vld [vmem:[#allocation10 + $0xe0] sm:$0xf]  ;;  %v2867_v1 = vld [vmem:[#allocation10 + $0xec] sm:$0xf0] }
  0x1b   :  { %v2865_v2 = vld [vmem:[#allocation10 + $0xe4] sm:$0xf]  ;;  %v3422_v3 = vor.u32 %v2867_v1, %v2567_v0  ;;  %v2569_v4 = vld [vmem:[#allocation10 + $0xf0] sm:$0xf0]  ;;  %v2575_v5 = vld [vmem:[#allocation10 + $0xe8] sm:$0xf] }
  0x1c   :  { %v2868_v6 = vld [vmem:[#allocation10 + $0xf4] sm:$0xf0]  ;;  %v3424_v7 = vor.u32 %v2865_v2, %v2569_v4  ;;  %v2866_v9 = vld [vmem:[#allocation10 + $0xec] sm:$0xf]  ;;  %v2577_v10 = vld [vmem:[#allocation10 + $0xf8] sm:$0xf0] }
  0x1d   :  { %v3426_v8 = vor.u32 %v2868_v6, %v2575_v5  ;;  %v2551_v11 = vld [vmem:[#allocation10 + $0xc0] sm:$0xf]  ;;  %397 = vmatpush.bf16.msra.mxu0 %v3422_v3  ;;  %v3429_v12 = vor.u32 %v2866_v9, %v2577_v10  ;;  %v2863_v13 = vld [vmem:[#allocation10 + $0xcc] sm:$0xf0]  ;;  %v2861_v14 = vld [vmem:[#allocation10 + $0xc4] sm:$0xf] }
  0x1e   :  { %v2553_v15 = vld [vmem:[#allocation10 + $0xd0] sm:$0xf0]  ;;  %410 = vmatpush.bf16.msra.mxu1 %v3424_v7  ;;  %v3433_v16 = vor.u32 %v2863_v13, %v2551_v11  ;;  %v2559_v18 = vld [vmem:[#allocation10 + $0xc8] sm:$0xf]  ;;  %v2864_v19 = vld [vmem:[#allocation10 + $0xd4] sm:$0xf0] }
  0x1f   :  { %423 = vmatpush.bf16.msra.mxu2 %v3426_v8  ;;  %v3435_v17 = vor.u32 %v2861_v14, %v2553_v15  ;;  %v2862_v20 = vld [vmem:[#allocation10 + $0xcc] sm:$0xf]  ;;  %436 = vmatpush.bf16.msra.mxu3 %v3429_v12  ;;  %v3438_v21 = vor.u32 %v2864_v19, %v2559_v18  ;;  %v2561_v22 = vld [vmem:[#allocation10 + $0xd8] sm:$0xf0]  ;;  %v2535_v23 = vld [vmem:[#allocation10 + $0xa0] sm:$0xf] }
  0x20   :  { %v2859_v24 = vld [vmem:[#allocation10 + $0xac] sm:$0xf0]  ;;  %v3440_v25 = vor.u32 %v2862_v20, %v2561_v22  ;;  %v2857_v26 = vld [vmem:[#allocation10 + $0xa4] sm:$0xf]  ;;  %v2537_v27 = vld [vmem:[#allocation10 + $0xb0] sm:$0xf0] }
  0x21   :  { %4729 = vst [vmem:[#allocation25_spill] sm:$0xff] %v3435_v17  ;;  %v2543_v28 = vld [vmem:[#allocation10 + $0xa8] sm:$0xf]  ;;  %398 = vmatpush.bf16.msra.mxu0 %v3433_v16  ;;  %v3443_v29 = vor.u32 %v2859_v24, %v2535_v23  ;;  %v2860_v30 = vld [vmem:[#allocation10 + $0xb4] sm:$0xf0]  ;;  %v3447_v33 = vor.u32 %v2857_v26, %v2537_v27  ;;  %s2424_s1 = sshll.u32 %s4532_s9, 4  ;;  %s2425_s1 = int_to_ptr.hbm [resolvable:$true] %s2424_s1 }
  0x22   :  { %4730 = vst [vmem:[#allocation26_spill] sm:$0xff] %v3440_v25  ;;  %v2858_v31 = vld [vmem:[#allocation10 + $0xac] sm:$0xf]  ;;  %v2545_v32 = vld [vmem:[#allocation10 + $0xb8] sm:$0xf0]  ;;  %411 = vmatpush.bf16.msra.mxu1 %v3435_v17  ;;  %v3449_v34 = vor.u32 %v2860_v30, %v2543_v28  ;;  %s3348_s21 = smov [#allocation13]  }
  0x23   :  { %424 = vmatpush.bf16.msra.mxu2 %v3438_v21  ;;  %4731 = vst [vmem:[#allocation27_spill] sm:$0xff] %v3447_v33  ;;  %v2519_v35 = vld [vmem:[#allocation10 + $0x80] sm:$0xf]  ;;  %v2855_v36 = vld [vmem:[#allocation10 + $0x8c] sm:$0xf0]  ;;  %437 = vmatpush.bf16.msra.mxu3 %v3440_v25  ;;  %v3452_v38 = vor.u32 %v2858_v31, %v2545_v32  ;;  %s2383_s22 = sshll.u32 %s3348_s21, 4  ;;  %s2384_s22 = int_to_ptr.vmem [resolvable:$true] %s2383_s22 }
  0x24   :  { %v2853_v37 = vld [vmem:[#allocation10 + $0x84] sm:$0xf]  ;;  %v2521_v39 = vld [vmem:[#allocation10 + $0x90] sm:$0xf0]  ;;  %v2527_v40 = vld [vmem:[#allocation10 + $0x88] sm:$0xf]  ;;  %v3455_v44 = vor.u32 %v2855_v36, %v2519_v35 }
  0x25   :  { %4732 = vst [vmem:[#allocation28_spill] sm:$0xff] %v3452_v38  ;;  %v2856_v41 = vld [vmem:[#allocation10 + $0x94] sm:$0xf0]  ;;  %v2854_v42 = vld [vmem:[#allocation10 + $0x8c] sm:$0xf]  ;;  %399 = vmatpush.bf16.msra.mxu0 %v3443_v29  ;;  %v3459_v45 = vor.u32 %v2853_v37, %v2521_v39  ;;  %s2385_s24 = sshll.u32 %s4529_s6, 4  ;;  %s2386_s24 = int_to_ptr.hbm [resolvable:$true] %s2385_s24 }
  0x26   :  { %v2529_v43 = vld [vmem:[#allocation10 + $0x98] sm:$0xf0]  ;;  %412 = vmatpush.bf16.msra.mxu1 %v3447_v33  ;;  %v3461_v46 = vor.u32 %v2856_v41, %v2527_v40  ;;  %v2503_v47 = vld [vmem:[#allocation10 + $0x60] sm:$0xf]  ;;  %v2851_v48 = vld [vmem:[#allocation10 + $0x6c] sm:$0xf0] }
  0x27   :  { %425 = vmatpush.bf16.msra.mxu2 %v3449_v34  ;;  %4733 = vst [vmem:[#allocation29_spill] sm:$0xff] %v3459_v45  ;;  %v2849_v49 = vld [vmem:[#allocation10 + $0x64] sm:$0xf]  ;;  %438 = vmatpush.bf16.msra.mxu3 %v3452_v38  ;;  %v3464_v50 = vor.u32 %v2854_v42, %v2529_v43  ;;  %v2505_v51 = vld [vmem:[#allocation10 + $0x70] sm:$0xf0]  ;;  %v3467_v56 = vor.u32 %v2851_v48, %v2503_v47  ;;  %s3349_s25 = smov [#allocation14]  }
  0x28   :  { %v2511_v52 = vld [vmem:[#allocation10 + $0x68] sm:$0xf]  ;;  %v2852_v53 = vld [vmem:[#allocation10 + $0x74] sm:$0xf0]  ;;  %v2850_v54 = vld [vmem:[#allocation10 + $0x6c] sm:$0xf]  ;;  %v3471_v57 = vor.u32 %v2849_v49, %v2505_v51 }
  0x29   :  { %4734 = vst [vmem:[#allocation30_spill] sm:$0xff] %v3464_v50  ;;  %v2513_v55 = vld [vmem:[#allocation10 + $0x78] sm:$0xf0]  ;;  %400 = vmatpush.bf16.msra.mxu0 %v3455_v44  ;;  %v3473_v58 = vor.u32 %v2852_v53, %v2511_v52  ;;  %v2487_v59 = vld [vmem:[#allocation10 + $0x40] sm:$0xf]  ;;  %s2396_s3 = sshll.u32 %s3349_s25, 4  ;;  %s2397_s3 = int_to_ptr.vmem [resolvable:$true] %s2396_s3 }
  0x2a   :  { %4735 = vst [vmem:[#allocation31_spill] sm:$0xff] %v3467_v56  ;;  %413 = vmatpush.bf16.msra.mxu1 %v3459_v45  ;;  %v2847_v60 = vld [vmem:[#allocation10 + $0x4c] sm:$0xf0]  ;;  %v2845_v61 = vld [vmem:[#allocation10 + $0x44] sm:$0xf]  ;;  %v3476_v62 = vor.u32 %v2850_v54, %v2513_v55  ;;  %s2398_s28 = sshll.u32 %s4530_s7, 4  ;;  %s2399_s28 = int_to_ptr.hbm [resolvable:$true] %s2398_s28 }
  0x2b   :  { %426 = vmatpush.bf16.msra.mxu2 %v3461_v46  ;;  %4736 = vst [vmem:[#allocation32_spill] sm:$0xff] %v3471_v57  ;;  %439 = vmatpush.bf16.msra.mxu3 %v3464_v50  ;;  %v2489_v63 = vld [vmem:[#allocation10 + $0x50] sm:$0xf0]  ;;  %v2495_v0 = vld [vmem:[#allocation10 + $0x48] sm:$0xf]  ;;  %v3479_v5 = vor.u32 %v2847_v60, %v2487_v59  ;;  %v112_v43 = vld [vmem:[#allocation7] sm:$0xff] }
  0x2c   :  { %4737 = vst [vmem:[#allocation33_spill] sm:$0xff] %v3473_v58  ;;  %v2848_v1 = vld [vmem:[#allocation10 + $0x54] sm:$0xf0]  ;;  %v2846_v2 = vld [vmem:[#allocation10 + $0x4c] sm:$0xf]  ;;  %v3483_v6 = vor.u32 %v2845_v61, %v2489_v63  ;;  %v236_v54 = vpack.c.bf16 %v112_v43, %v112_v43  ;;  %s3350_s29 = smov [#allocation16]  }
  0x2d   :  { %4738 = vst [vmem:[#allocation34_spill] sm:$0xff] %v3476_v62  ;;  %v2497_v4 = vld [vmem:[#allocation10 + $0x58] sm:$0xf0]  ;;  %401 = vmatpush.bf16.msra.mxu0 %v3467_v56  ;;  %v3485_v9 = vor.u32 %v2848_v1, %v2495_v0  ;;  %v2471_v10 = vld [vmem:[#allocation10 + $0x20] sm:$0xf]  ;;  %s2409_s30 = sshll.u32 %s3350_s29, 4  ;;  %s2410_s30 = int_to_ptr.vmem [resolvable:$true] %s2409_s30 }
  0x2e   :  { %4739 = vst [vmem:[#allocation35_spill] sm:$0xff] %v3479_v5  ;;  %414 = vmatpush.bf16.msra.mxu1 %v3471_v57  ;;  %v2843_v11 = vld [vmem:[#allocation10 + $0x2c] sm:$0xf0]  ;;  %v2841_v13 = vld [vmem:[#allocation10 + $0x24] sm:$0xf]  ;;  %v3488_v14 = vor.u32 %v2846_v2, %v2497_v4  ;;  %s2411_s12 = sshll.u32 %s4531_s8, 4  ;;  %s2412_s12 = int_to_ptr.hbm [resolvable:$true] %s2411_s12 }
  0x2f   :  { %427 = vmatpush.bf16.msra.mxu2 %v3473_v58  ;;  %4740 = vst [vmem:[#allocation36_spill] sm:$0xff] %v3483_v6  ;;  %440 = vmatpush.bf16.msra.mxu3 %v3476_v62  ;;  %v2473_v15 = vld [vmem:[#allocation10 + $0x30] sm:$0xf0]  ;;  %v2479_v18 = vld [vmem:[#allocation10 + $0x28] sm:$0xf]  ;;  %v3491_v23 = vor.u32 %v2843_v11, %v2471_v10 }
  0x30   :  { %4741 = vst [vmem:[#allocation37_spill] sm:$0xff] %v3485_v9  ;;  %v2844_v19 = vld [vmem:[#allocation10 + $0x34] sm:$0xf0]  ;;  %v2842_v20 = vld [vmem:[#allocation10 + $0x2c] sm:$0xf]  ;;  %v3495_v26 = vor.u32 %v2841_v13, %v2473_v15 }
  0x31   :  { %4742 = vst [vmem:[#allocation38_spill] sm:$0xff] %v3488_v14  ;;  %v2481_v22 = vld [vmem:[#allocation10 + $0x38] sm:$0xf0]  ;;  %402 = vmatpush.bf16.msra.mxu0 %v3479_v5  ;;  %v2455_v24 = vld [vmem:[#allocation10] sm:$0xf]  ;;  %v3497_v27 = vor.u32 %v2844_v19, %v2479_v18 }
  0x32   :  { %4743 = vst [vmem:[#allocation39_spill] sm:$0xff] %v3491_v23  ;;  %415 = vmatpush.bf16.msra.mxu1 %v3483_v6  ;;  %v2839_v28 = vld [vmem:[#allocation10 + $0xc] sm:$0xf0]  ;;  %v2837_v30 = vld [vmem:[#allocation10 + $0x4] sm:$0xf]  ;;  %v3500_v32 = vor.u32 %v2842_v20, %v2481_v22 }
  0x33   :  { %428 = vmatpush.bf16.msra.mxu2 %v3485_v9  ;;  %4744 = vst [vmem:[#allocation40_spill] sm:$0xff] %v3495_v26  ;;  %v2457_v31 = vld [vmem:[#allocation10 + $0x10] sm:$0xf0]  ;;  %441 = vmatpush.bf16.msra.mxu3 %v3488_v14  ;;  %v2463_v35 = vld [vmem:[#allocation10 + $0x8] sm:$0xf]  ;;  %v3503_v42 = vor.u32 %v2839_v28, %v2455_v24 }
  0x34   :  { %4745 = vst [vmem:[#allocation41_spill] sm:$0xff] %v3497_v27  ;;  %v2840_v36 = vld [vmem:[#allocation10 + $0x14] sm:$0xf0]  ;;  %v2838_v37 = vld [vmem:[#allocation10 + $0xc] sm:$0xf]  ;;  %v3507_v49 = vor.u32 %v2837_v30, %v2457_v31 }
  0x35   :  { %4746 = vst [vmem:[#allocation42_spill] sm:$0xff] %v3500_v32  ;;  %v2465_v39 = vld [vmem:[#allocation10 + $0x18] sm:$0xf0]  ;;  %v2823_v40 = vld [vmem:[#allocation12 + $0x1e0] sm:$0xf]  ;;  %403 = vmatpush.bf16.msra.mxu0 %v3491_v23  ;;  %v3509_v51 = vor.u32 %v2840_v36, %v2463_v35 }
  0x36   :  { %v2931_v41 = vld [vmem:[#allocation12 + $0x1ec] sm:$0xf0]  ;;  %4747 = vst [vmem:[#allocation43_spill] sm:$0xff] %v3503_v42  ;;  %v2929_v47 = vld [vmem:[#allocation12 + $0x1e4] sm:$0xf]  ;;  %416 = vmatpush.bf16.msra.mxu1 %v3495_v26  ;;  %v3512_v52 = vor.u32 %v2838_v37, %v2465_v39 }
  0x37   :  { %v2825_v48 = vld [vmem:[#allocation12 + $0x1f0] sm:$0xf0]  ;;  %429 = vmatpush.bf16.msra.mxu2 %v3497_v27  ;;  %4748 = vst [vmem:[#allocation44_spill] sm:$0xff] %v3507_v49  ;;  %442 = vmatpush.bf16.msra.mxu3 %v3500_v32  ;;  %v3514_v53 = vor.u32 %v2931_v41, %v2823_v40  ;;  %v2807_v59 = vld [vmem:[#allocation12 + $0x1c0] sm:$0xf] }
  0x38   :  { %4749 = vst [vmem:[#allocation45_spill] sm:$0xff] %v3509_v51  ;;  %v3516_v55 = vor.u32 %v2929_v47, %v2825_v48  ;;  %v2927_v60 = vld [vmem:[#allocation12 + $0x1cc] sm:$0xf0]  ;;  %v2925_v61 = vld [vmem:[#allocation12 + $0x1c4] sm:$0xf] }
  0x39   :  { %4750 = vst [vmem:[#allocation46_spill] sm:$0xff] %v3512_v52  ;;  %404 = vmatpush.bf16.msra.mxu0 %v3503_v42  ;;  %v2809_v63 = vld [vmem:[#allocation12 + $0x1d0] sm:$0xf0]  ;;  %v3523_v0 = vor.u32 %v2927_v60, %v2807_v59  ;;  %v2791_v1 = vld [vmem:[#allocation12 + $0x1a0] sm:$0xf] }
  0x3a   :  { %4751 = vst [vmem:[#allocation47_spill] sm:$0xff] %v3514_v53  ;;  %417 = vmatpush.bf16.msra.mxu1 %v3507_v49  ;;  %v2923_v2 = vld [vmem:[#allocation12 + $0x1ac] sm:$0xf0]  ;;  %v2695_v4 = vld [vmem:[#allocation12 + $0xe0] sm:$0xf]  ;;  %v3526_v10 = vor.u32 %v2925_v61, %v2809_v63 }
  0x3b   :  { %4752 = vst [vmem:[#allocation48_spill] sm:$0xff] %v3516_v55  ;;  %430 = vmatpush.bf16.msra.mxu2 %v3509_v51  ;;  %443 = vmatpush.bf16.msra.mxu3 %v3512_v52  ;;  %v2899_v11 = vld [vmem:[#allocation12 + $0xec] sm:$0xf0]  ;;  %v2897_v13 = vld [vmem:[#allocation12 + $0xe4] sm:$0xf]  ;;  %v3533_v30 = vor.u32 %v2923_v2, %v2791_v1 }
  0x3c   :  { %4753 = vst [vmem:[#allocation49_spill] sm:$0xff] %v3523_v0  ;;  %405 = vmatmul.bf16.vlgmr.msra.gmra.mxu0 %v236_v54  ;;  %v2697_v15 = vld [vmem:[#allocation12 + $0xf0] sm:$0xf0]  ;;  %v2921_v18 = vld [vmem:[#allocation12 + $0x1a4] sm:$0xf]  ;;  %v3528_v20 = vor.u32 %v2899_v11, %v2695_v4 }
  0x3d   :  { %4754 = vst [vmem:[#allocation50_spill] sm:$0xff] %v3526_v10  ;;  %418 = vmatmul.bf16.vlgmr.msra.gmra.mxu1 %v236_v54  ;;  %v2793_v19 = vld [vmem:[#allocation12 + $0x1b0] sm:$0xf0]  ;;  %v3530_v22 = vor.u32 %v2897_v13, %v2697_v15  ;;  %v2679_v24 = vld [vmem:[#allocation12 + $0xc0] sm:$0xf] }
  0x3e   :  { %806 = vmatpush.bf16.msrb.mxu1 %v3514_v53  ;;  %431 = vmatmul.bf16.vlgmr.msra.gmra.mxu2 %v236_v54  ;;  %4755 = vst [vmem:[#allocation51_spill] sm:$0xff] %v3528_v20  ;;  %v2895_v28 = vld [vmem:[#allocation12 + $0xcc] sm:$0xf0]  ;;  %v2775_v31 = vld [vmem:[#allocation12 + $0x180] sm:$0xf]  ;;  %v3539_v39 = vor.u32 %v2921_v18, %v2793_v19 }
  0x3f   :  { %832 = vmatpush.bf16.msrb.mxu3 %v3516_v55  ;;  %4756 = vst [vmem:[#allocation52_spill] sm:$0xff] %v3530_v22  ;;  %793 = vmatpush.bf16.msrb.mxu0 %v3528_v20  ;;  %v3536_v35 = vor.u32 %v2895_v28, %v2679_v24  ;;  %v2893_v36 = vld [vmem:[#allocation12 + $0xc4] sm:$0xf]  ;;  %v2681_v37 = vld [vmem:[#allocation12 + $0xd0] sm:$0xf0] }
  0x40   :  { %444 = vmatmul.bf16.vlgmr.msra.gmra.mxu3 %v236_v54  ;;  %4757 = vst [vmem:[#allocation53_spill] sm:$0xff] %v3533_v30  ;;  %v2919_v40 = vld [vmem:[#allocation12 + $0x18c] sm:$0xf0]  ;;  %v2917_v41 = vld [vmem:[#allocation12 + $0x184] sm:$0xf]  ;;  %819 = vmatpush.bf16.msrb.mxu2 %v3530_v22  ;;  %v3542_v47 = vor.u32 %v2893_v36, %v2681_v37 }
  0x41   :  { %4758 = vst [vmem:[#allocation54_spill] sm:$0xff] %v3536_v35  ;;  %v2777_v43 = vld [vmem:[#allocation12 + $0x190] sm:$0xf0]  ;;  %v2663_v48 = vld [vmem:[#allocation12 + $0xa0] sm:$0xf]  ;;  %v3545_v61 = vor.u32 %v2919_v40, %v2775_v31 }
  0x42   :  { %807 = vmatpush.bf16.msrb.mxu1 %v3523_v0  ;;  %4759 = vst [vmem:[#allocation55_spill] sm:$0xff] %v3539_v39  ;;  %v2891_v54 = vld [vmem:[#allocation12 + $0xac] sm:$0xf0]  ;;  %v2889_v59 = vld [vmem:[#allocation12 + $0xa4] sm:$0xf]  ;;  %v3551_v2 = vor.u32 %v2917_v41, %v2777_v43 }
  0x43   :  { %833 = vmatpush.bf16.msrb.mxu3 %v3526_v10  ;;  %4760 = vst [vmem:[#allocation56_spill] sm:$0xff] %v3542_v47  ;;  %v2665_v60 = vld [vmem:[#allocation12 + $0xb0] sm:$0xf0]  ;;  %v2759_v63 = vld [vmem:[#allocation12 + $0x160] sm:$0xf]  ;;  %794 = vmatpush.bf16.msrb.mxu0 %v3536_v35  ;;  %v3548_v1 = vor.u32 %v2891_v54, %v2663_v48 }
  0x44   :  { %4761 = vst [vmem:[#allocation57_spill] sm:$0xff] %v3545_v61  ;;  %v2915_v4 = vld [vmem:[#allocation12 + $0x16c] sm:$0xf0]  ;;  %v2913_v11 = vld [vmem:[#allocation12 + $0x164] sm:$0xf]  ;;  %820 = vmatpush.bf16.msrb.mxu2 %v3542_v47  ;;  %v3554_v15 = vor.u32 %v2889_v59, %v2665_v60 }
  0x45   :  { %4762 = vst [vmem:[#allocation58_spill] sm:$0xff] %v3548_v1  ;;  %v2761_v13 = vld [vmem:[#allocation12 + $0x170] sm:$0xf0]  ;;  %v2647_v18 = vld [vmem:[#allocation12 + $0x80] sm:$0xf]  ;;  %v3557_v31 = vor.u32 %v2915_v4, %v2759_v63 }
  0x46   :  { %808 = vmatpush.bf16.msrb.mxu1 %v3533_v30  ;;  %4763 = vst [vmem:[#allocation59_spill] sm:$0xff] %v3551_v2  ;;  %v2887_v19 = vld [vmem:[#allocation12 + $0x8c] sm:$0xf0]  ;;  %v2885_v24 = vld [vmem:[#allocation12 + $0x84] sm:$0xf]  ;;  %v3563_v40 = vor.u32 %v2913_v11, %v2761_v13 }
  0x47   :  { %834 = vmatpush.bf16.msrb.mxu3 %v3539_v39  ;;  %4764 = vst [vmem:[#allocation60_spill] sm:$0xff] %v3554_v15  ;;  %v2649_v28 = vld [vmem:[#allocation12 + $0x90] sm:$0xf0]  ;;  %v2743_v36 = vld [vmem:[#allocation12 + $0x140] sm:$0xf]  ;;  %795 = vmatpush.bf16.msrb.mxu0 %v3548_v1  ;;  %v3560_v37 = vor.u32 %v2887_v19, %v2647_v18 }
  0x48   :  { %4765 = vst [vmem:[#allocation61_spill] sm:$0xff] %v3557_v31  ;;  %v2911_v41 = vld [vmem:[#allocation12 + $0x14c] sm:$0xf0]  ;;  %v2909_v43 = vld [vmem:[#allocation12 + $0x144] sm:$0xf]  ;;  %821 = vmatpush.bf16.msrb.mxu2 %v3554_v15  ;;  %v3566_v54 = vor.u32 %v2885_v24, %v2649_v28 }
  0x49   :  { %4766 = vst [vmem:[#allocation62_spill] sm:$0xff] %v3560_v37  ;;  %v2745_v48 = vld [vmem:[#allocation12 + $0x150] sm:$0xf0]  ;;  %v2631_v59 = vld [vmem:[#allocation12 + $0x60] sm:$0xf]  ;;  %v3569_v1 = vor.u32 %v2911_v41, %v2743_v36 }
  0x4a   :  { %809 = vmatpush.bf16.msrb.mxu1 %v3545_v61  ;;  %4767 = vst [vmem:[#allocation63_spill] sm:$0xff] %v3563_v40  ;;  %v2883_v60 = vld [vmem:[#allocation12 + $0x6c] sm:$0xf0]  ;;  %v2881_v63 = vld [vmem:[#allocation12 + $0x64] sm:$0xf]  ;;  %v3575_v13 = vor.u32 %v2909_v43, %v2745_v48 }
  0x4b   :  { %835 = vmatpush.bf16.msrb.mxu3 %v3551_v2  ;;  %4768 = vst [vmem:[#allocation64_spill] sm:$0xff] %v3566_v54  ;;  %v2633_v4 = vld [vmem:[#allocation12 + $0x70] sm:$0xf0]  ;;  %v2727_v18 = vld [vmem:[#allocation12 + $0x120] sm:$0xf]  ;;  %796 = vmatpush.bf16.msrb.mxu0 %v3560_v37  ;;  %v3572_v11 = vor.u32 %v2883_v60, %v2631_v59 }
  0x4c   :  { %4769 = vst [vmem:[#allocation65_spill] sm:$0xff] %v3569_v1  ;;  %v2907_v19 = vld [vmem:[#allocation12 + $0x12c] sm:$0xf0]  ;;  %v2905_v24 = vld [vmem:[#allocation12 + $0x124] sm:$0xf]  ;;  %822 = vmatpush.bf16.msrb.mxu2 %v3566_v54  ;;  %v3578_v15 = vor.u32 %v2881_v63, %v2633_v4 }
  0x4d   :  { %4770 = vst [vmem:[#allocation66_spill] sm:$0xff] %v3572_v11  ;;  %v2729_v28 = vld [vmem:[#allocation12 + $0x130] sm:$0xf0]  ;;  %v2615_v47 = vld [vmem:[#allocation12 + $0x40] sm:$0xf]  ;;  %v3581_v37 = vor.u32 %v2907_v19, %v2727_v18 }
  0x4e   :  { %810 = vmatpush.bf16.msrb.mxu1 %v3557_v31  ;;  %4771 = vst [vmem:[#allocation67_spill] sm:$0xff] %v3575_v13  ;;  %v2879_v35 = vld [vmem:[#allocation12 + $0x4c] sm:$0xf0]  ;;  %v2877_v36 = vld [vmem:[#allocation12 + $0x44] sm:$0xf]  ;;  %v3587_v48 = vor.u32 %v2905_v24, %v2729_v28  ;;  %v113_v24 = vld [vmem:[#allocation7 + $0x8] sm:$0xff] }
  0x4f   :  { %836 = vmatpush.bf16.msrb.mxu3 %v3563_v40  ;;  %4772 = vst [vmem:[#allocation68_spill] sm:$0xff] %v3578_v15  ;;  %v2617_v41 = vld [vmem:[#allocation12 + $0x50] sm:$0xf0]  ;;  %v2711_v59 = vld [vmem:[#allocation12 + $0x100] sm:$0xf]  ;;  %797 = vmatpush.bf16.msrb.mxu0 %v3572_v11  ;;  %v3584_v43 = vor.u32 %v2879_v35, %v2615_v47 }
  0x50   :  { %4773 = vst [vmem:[#allocation69_spill] sm:$0xff] %v3581_v37  ;;  %v2903_v60 = vld [vmem:[#allocation12 + $0x10c] sm:$0xf0]  ;;  %v2901_v22 = vld [vmem:[#allocation12 + $0x104] sm:$0xf]  ;;  %823 = vmatpush.bf16.msrb.mxu2 %v3578_v15  ;;  %v3590_v20 = vor.u32 %v2877_v36, %v2617_v41 }
  0x51   :  { %4774 = vst [vmem:[#allocation70_spill] sm:$0xff] %v3584_v43  ;;  %v2713_v63 = vld [vmem:[#allocation12 + $0x110] sm:$0xf0]  ;;  %v2831_v4 = vld [vmem:[#allocation12 + $0x1e8] sm:$0xf]  ;;  %v3593_v35 = vor.u32 %v2903_v60, %v2711_v59 }
  0x52   :  { %811 = vmatpush.bf16.msrb.mxu1 %v3569_v1  ;;  %4775 = vst [vmem:[#allocation71_spill] sm:$0xff] %v3587_v48  ;;  %v2932_v54 = vld [vmem:[#allocation12 + $0x1f4] sm:$0xf0]  ;;  %v2930_v18 = vld [vmem:[#allocation12 + $0x1ec] sm:$0xf]  ;;  %v3599_v28 = vor.u32 %v2901_v22, %v2713_v63 }
  0x53   :  { %837 = vmatpush.bf16.msrb.mxu3 %v3575_v13  ;;  %4776 = vst [vmem:[#allocation72_spill] sm:$0xff] %v3590_v20  ;;  %v2599_v19 = vld [vmem:[#allocation12 + $0x20] sm:$0xf]  ;;  %v2875_v51 = vld [vmem:[#allocation12 + $0x2c] sm:$0xf0]  ;;  %798 = vmatpush.bf16.msrb.mxu0 %v3584_v43  ;;  %v3601_v36 = vor.u32 %v2932_v54, %v2831_v4  ;;  %v3608_v43 = vpack.c.bf16 %v113_v24, %v113_v24 }
  0x54   :  { %v2833_v42 = vld [vmem:[#allocation12 + $0x1f8] sm:$0xf0]  ;;  %v2873_v27 = vld [vmem:[#allocation12 + $0x24] sm:$0xf]  ;;  %v2601_v23 = vld [vmem:[#allocation12 + $0x30] sm:$0xf0]  ;;  %v3596_v47 = vor.u32 %v2875_v51, %v2599_v19  ;;  %824 = vmatpush.bf16.msrb.mxu2 %v3590_v20 }
  0x55   :  { %4777 = vst [vmem:[#allocation73_spill] sm:$0xff] %v3593_v35  ;;  %v3604_v41 = vor.u32 %v2930_v18, %v2833_v42  ;;  %v2815_v15 = vld [vmem:[#allocation12 + $0x1c8] sm:$0xf]  ;;  %v2928_v11 = vld [vmem:[#allocation12 + $0x1d4] sm:$0xf0]  ;;  %v3606_v9 = vor.u32 %v2873_v27, %v2601_v23 }
  0x56   :  { %812 = vmatpush.bf16.msrb.mxu1 %v3581_v37  ;;  %4778 = vst [vmem:[#allocation74_spill] sm:$0xff] %v3596_v47  ;;  %v2926_v59 = vld [vmem:[#allocation12 + $0x1cc] sm:$0xf]  ;;  %v2817_v60 = vld [vmem:[#allocation12 + $0x1d8] sm:$0xf0]  ;;  %v3614_v51 = vor.u32 %v2928_v11, %v2815_v15 }
  0x57   :  { %838 = vmatpush.bf16.msrb.mxu3 %v3587_v48  ;;  %4779 = vst [vmem:[#allocation75_spill] sm:$0xff] %v3599_v28  ;;  %799 = vmatpush.bf16.msrb.mxu0 %v3596_v47  ;;  %v3617_v42 = vor.u32 %v2926_v59, %v2817_v60  ;;  %v2799_v23 = vld [vmem:[#allocation12 + $0x1a8] sm:$0xf]  ;;  %v2924_v27 = vld [vmem:[#allocation12 + $0x1b4] sm:$0xf0] }
  0x58   :  { %4780 = vst [vmem:[#allocation76_spill] sm:$0xff] %v3601_v36  ;;  %825 = vmatpush.bf16.msrb.mxu2 %v3606_v9  ;;  %v2922_v22 = vld [vmem:[#allocation12 + $0x1ac] sm:$0xf]  ;;  %v2801_v54 = vld [vmem:[#allocation12 + $0x1b8] sm:$0xf0]  ;;  %v3623_v63 = vor.u32 %v2924_v27, %v2799_v23 }
  0x59   :  { %4781 = vst [vmem:[#allocation77_spill] sm:$0xff] %v3604_v41  ;;  %v3626_v15 = vor.u32 %v2922_v22, %v2801_v54  ;;  %v2783_v11 = vld [vmem:[#allocation12 + $0x188] sm:$0xf]  ;;  %v2920_v4 = vld [vmem:[#allocation12 + $0x194] sm:$0xf0] }
  0x5a   :  { %4782 = vst [vmem:[#allocation78_spill] sm:$0xff] %v3606_v9  ;;  %813 = vmatpush.bf16.msrb.mxu1 %v3593_v35  ;;  %v2918_v18 = vld [vmem:[#allocation12 + $0x18c] sm:$0xf]  ;;  %v2785_v19 = vld [vmem:[#allocation12 + $0x198] sm:$0xf0]  ;;  %v3629_v24 = vor.u32 %v2920_v4, %v2783_v11 }
  0x5b   :  { %839 = vmatpush.bf16.msrb.mxu3 %v3599_v28  ;;  %4783 = vst [vmem:[#allocation79_spill] sm:$0xff] %v3614_v51  ;;  %v3632_v59 = vor.u32 %v2918_v18, %v2785_v19  ;;  %v2767_v60 = vld [vmem:[#allocation12 + $0x168] sm:$0xf]  ;;  %v2916_v9 = vld [vmem:[#allocation12 + $0x174] sm:$0xf0] }
  0x5c   :  { %4784 = vst [vmem:[#allocation80_spill] sm:$0xff] %v3617_v42  ;;  %v2914_v23 = vld [vmem:[#allocation12 + $0x16c] sm:$0xf]  ;;  %v2769_v27 = vld [vmem:[#allocation12 + $0x178] sm:$0xf0]  ;;  %v3635_v22 = vor.u32 %v2916_v9, %v2767_v60 }
  0x5d   :  { %814 = vmatmul.bf16.vlgmr.msrb.gmra.mxu1 %v3608_v43  ;;  %4785 = vst [vmem:[#allocation81_spill] sm:$0xff] %v3623_v63  ;;  %v3638_v54 = vor.u32 %v2914_v23, %v2769_v27  ;;  %v2751_v47 = vld [vmem:[#allocation12 + $0x148] sm:$0xf]  ;;  %v2912_v20 = vld [vmem:[#allocation12 + $0x154] sm:$0xf0] }
  0x5e   :  { %858 = vmatpush.bf16.msra.mxu1 %v3601_v36  ;;  %840 = vmatmul.bf16.vlgmr.msrb.gmra.mxu3 %v3608_v43  ;;  %4786 = vst [vmem:[#allocation82_spill] sm:$0xff] %v3626_v15  ;;  %v2910_v11 = vld [vmem:[#allocation12 + $0x14c] sm:$0xf]  ;;  %v2753_v4 = vld [vmem:[#allocation12 + $0x158] sm:$0xf0]  ;;  %v3641_v18 = vor.u32 %v2912_v20, %v2751_v47 }
  0x5f   :  { %884 = vmatpush.bf16.msra.mxu3 %v3604_v41  ;;  %4787 = vst [vmem:[#allocation83_spill] sm:$0xff] %v3629_v24  ;;  %v3644_v19 = vor.u32 %v2910_v11, %v2753_v4  ;;  %v2735_v5 = vld [vmem:[#allocation12 + $0x128] sm:$0xf]  ;;  %v2908_v58 = vld [vmem:[#allocation12 + $0x134] sm:$0xf0] }
  0x60   :  { %4788 = vst [vmem:[#allocation84_spill] sm:$0xff] %v3632_v59  ;;  %v2906_v9 = vld [vmem:[#allocation12 + $0x12c] sm:$0xf]  ;;  %v2737_v60 = vld [vmem:[#allocation12 + $0x138] sm:$0xf0]  ;;  %v3647_v23 = vor.u32 %v2908_v58, %v2735_v5 }
  0x61   :  { %4789 = vst [vmem:[#allocation85_spill] sm:$0xff] %v3635_v22  ;;  %v3650_v27 = vor.u32 %v2906_v9, %v2737_v60  ;;  %v2719_v56 = vld [vmem:[#allocation12 + $0x108] sm:$0xf]  ;;  %v2902_v20 = vld [vmem:[#allocation12 + $0x10c] sm:$0xf] }
  0x62   :  { %859 = vmatpush.bf16.msra.mxu1 %v3614_v51  ;;  %4790 = vst [vmem:[#allocation86_spill] sm:$0xff] %v3638_v54  ;;  %v2721_v47 = vld [vmem:[#allocation12 + $0x118] sm:$0xf0]  ;;  %v2871_v58 = vld [vmem:[#allocation12 + $0xc] sm:$0xf0] }
  0x63   :  { %885 = vmatpush.bf16.msra.mxu3 %v3617_v42  ;;  %4791 = vst [vmem:[#allocation87_spill] sm:$0xff] %v3641_v18  ;;  %v3656_v4 = vor.u32 %v2902_v20, %v2721_v47  ;;  %v2869_v5 = vld [vmem:[#allocation12 + $0x4] sm:$0xf]  ;;  %v2703_v9 = vld [vmem:[#allocation12 + $0xe8] sm:$0xf] }
  0x64   :  { %4792 = vst [vmem:[#allocation88_spill] sm:$0xff] %v3644_v19  ;;  %v2900_v20 = vld [vmem:[#allocation12 + $0xf4] sm:$0xf0]  ;;  %v2898_v47 = vld [vmem:[#allocation12 + $0xec] sm:$0xf] }
  0x65   :  { %4793 = vst [vmem:[#allocation89_spill] sm:$0xff] %v3647_v23 }
  0x66   :  { %860 = vmatpush.bf16.msra.mxu1 %v3623_v63  ;;  %4794 = vst [vmem:[#allocation90_spill] sm:$0xff] %v3650_v27 }
  0x67   :  { %886 = vmatpush.bf16.msra.mxu3 %v3626_v15  ;;  %4796 = vst [vmem:[#allocation92_spill] sm:$0xff] %v3656_v4 }
  0x6a   :  { %861 = vmatpush.bf16.msra.mxu1 %v3629_v24 }
  0x6b   :  { %887 = vmatpush.bf16.msra.mxu3 %v3632_v59 }
  0x6e   :  { %862 = vmatpush.bf16.msra.mxu1 %v3635_v22  ;;  %v2904_v22 = vld [vmem:[#allocation12 + $0x114] sm:$0xf0] }
  0x6f   :  { %888 = vmatpush.bf16.msra.mxu3 %v3638_v54  ;;  %v3653_v11 = vor.u32 %v2904_v22, %v2719_v56  ;;  %v2583_v56 = vld [vmem:[#allocation12] sm:$0xf]  ;;  %v2585_v22 = vld [vmem:[#allocation12 + $0x10] sm:$0xf0] }
  0x70   :  { %v3686_v60 = vor.u32 %v2869_v5, %v2585_v22  ;;  %v2894_v5 = vld [vmem:[#allocation12 + $0xcc] sm:$0xf] }
  0x71   :  { %4795 = vst [vmem:[#allocation91_spill] sm:$0xff] %v3653_v11 }
  0x72   :  { %863 = vmatpush.bf16.msra.mxu1 %v3641_v18  ;;  %4798 = vst [vmem:[#allocation94_spill] sm:$0xff] %v3686_v60  ;;  %826 = vmatpush.bf16.msrb.mxu2 %v3686_v60 }
  0x73   :  { %889 = vmatpush.bf16.msra.mxu3 %v3644_v19 }
  0x76   :  { %864 = vmatpush.bf16.msra.mxu1 %v3647_v23 }
  0x77   :  { %890 = vmatpush.bf16.msra.mxu3 %v3650_v27 }
  0x7a   :  { %865 = vmatpush.bf16.msra.mxu1 %v3653_v11 }
  0x7b   :  { %891 = vmatpush.bf16.msra.mxu3 %v3656_v4 }
  0x7d   :  { %866 = vmatmul.bf16.vlgmr.msra.gmra.mxu1 %v3608_v43 }
  0x7e   :  { %934 = vmatpush.bf16.msrb.mxu1 %v3424_v7  ;;  %892 = vmatmul.bf16.vlgmr.msra.gmra.mxu3 %v3608_v43  ;;  %v3683_v43 = vor.u32 %v2871_v58, %v2583_v56  ;;  %v2687_v56 = vld [vmem:[#allocation12 + $0xc8] sm:$0xf]  ;;  %v2896_v58 = vld [vmem:[#allocation12 + $0xd4] sm:$0xf0] }
  0x7f   :  { %960 = vmatpush.bf16.msrb.mxu3 %v3429_v12  ;;  %v3697_v22 = vor.u32 %v2896_v58, %v2687_v56  ;;  %v2888_v58 = vld [vmem:[#allocation12 + $0x94] sm:$0xf0] }
  0x80   :  { %4797 = vst [vmem:[#allocation93_spill] sm:$0xff] %v3683_v43  ;;  %800 = vmatpush.bf16.msrb.mxu0 %v3683_v43 }
  0x81   :  { %4801 = vst [vmem:[#allocation97_spill] sm:$0xff] %v3697_v22 }
  0x82   :  { %935 = vmatpush.bf16.msrb.mxu1 %v3435_v17 }
  0x83   :  { %961 = vmatpush.bf16.msrb.mxu3 %v3440_v25 }
  0x86   :  { %936 = vmatpush.bf16.msrb.mxu1 %v3447_v33 }
  0x87   :  { %962 = vmatpush.bf16.msrb.mxu3 %v3452_v38 }
  0x8a   :  { %937 = vmatpush.bf16.msrb.mxu1 %v3459_v45 }
  0x8b   :  { %963 = vmatpush.bf16.msrb.mxu3 %v3464_v50 }
  0x8e   :  { %938 = vmatpush.bf16.msrb.mxu1 %v3471_v57 }
  0x8f   :  { %964 = vmatpush.bf16.msrb.mxu3 %v3476_v62  ;;  %v235_v62 = vld [vmem:[#allocation4 + $0x18] sm:$0xff] }
  0x92   :  { %939 = vmatpush.bf16.msrb.mxu1 %v3483_v6  ;;  %v234_v6 = vld [vmem:[#allocation4 + $0x10] sm:$0xff] }
  0x93   :  { %965 = vmatpush.bf16.msrb.mxu3 %v3488_v14 }
  0x96   :  { %940 = vmatpush.bf16.msrb.mxu1 %v3495_v26 }
  0x97   :  { %966 = vmatpush.bf16.msrb.mxu3 %v3500_v32 }
  0x9a   :  { %941 = vmatpush.bf16.msrb.mxu1 %v3507_v49  ;;  %v2593_v49 = vld [vmem:[#allocation12 + $0x18] sm:$0xf0] }
  0x9b   :  { %967 = vmatpush.bf16.msrb.mxu3 %v3512_v52  ;;  %v232_v52 = vld [vmem:[#allocation4] sm:$0xff] }
  0x9e   :  { %1010 = vmatpush.bf16.msra.mxu1 %v3514_v53 }
  0x9f   :  { %1036 = vmatpush.bf16.msra.mxu3 %v3516_v55  ;;  %v2705_v55 = vld [vmem:[#allocation12 + $0xf8] sm:$0xf0] }
  0xa2   :  { %1011 = vmatpush.bf16.msra.mxu1 %v3523_v0  ;;  %v3689_v0 = vor.u32 %v2900_v20, %v2703_v9  ;;  %v2892_v20 = vld [vmem:[#allocation12 + $0xb4] sm:$0xf0] }
  0xa3   :  { %1037 = vmatpush.bf16.msra.mxu3 %v3526_v10  ;;  %v3691_v10 = vor.u32 %v2898_v47, %v2705_v55  ;;  %v2671_v55 = vld [vmem:[#allocation12 + $0xa8] sm:$0xf]  ;;  %v2890_v47 = vld [vmem:[#allocation12 + $0xac] sm:$0xf] }
  0xa4   :  { %4799 = vst [vmem:[#allocation95_spill] sm:$0xff] %v3689_v0  ;;  %845 = vmatpush.bf16.msra.mxu0 %v3689_v0 }
  0xa5   :  { %4800 = vst [vmem:[#allocation96_spill] sm:$0xff] %v3691_v10  ;;  %871 = vmatpush.bf16.msra.mxu2 %v3691_v10 }
  0xa6   :  { %1012 = vmatpush.bf16.msra.mxu1 %v3533_v30  ;;  %v2673_v30 = vld [vmem:[#allocation12 + $0xb8] sm:$0xf0] }
  0xa7   :  { %1038 = vmatpush.bf16.msra.mxu3 %v3539_v39  ;;  %v2689_v39 = vld [vmem:[#allocation12 + $0xd8] sm:$0xf0]  ;;  %v3708_v56 = vor.u32 %v2890_v47, %v2673_v30  ;;  %v2639_v30 = vld [vmem:[#allocation12 + $0x68] sm:$0xf]  ;;  %v2882_v47 = vld [vmem:[#allocation12 + $0x6c] sm:$0xf] }
  0xa8   :  { %v3700_v9 = vor.u32 %v2894_v5, %v2689_v39  ;;  %846 = vmatpush.bf16.msra.mxu0 %v3697_v22  ;;  %v2655_v39 = vld [vmem:[#allocation12 + $0x88] sm:$0xf] }
  0xa9   :  { %4804 = vst [vmem:[#allocation100_spill] sm:$0xff] %v3708_v56  ;;  %v3713_v5 = vor.u32 %v2888_v58, %v2655_v39  ;;  %v2878_v58 = vld [vmem:[#allocation12 + $0x4c] sm:$0xf] }
  0xaa   :  { %1013 = vmatpush.bf16.msra.mxu1 %v3545_v61  ;;  %4802 = vst [vmem:[#allocation98_spill] sm:$0xff] %v3700_v9  ;;  %872 = vmatpush.bf16.msra.mxu2 %v3700_v9  ;;  %v3705_v61 = vor.u32 %v2892_v20, %v2671_v55  ;;  %v2884_v20 = vld [vmem:[#allocation12 + $0x74] sm:$0xf0] }
  0xab   :  { %1039 = vmatpush.bf16.msra.mxu3 %v3551_v2  ;;  %4805 = vst [vmem:[#allocation101_spill] sm:$0xff] %v3713_v5  ;;  %v2657_v2 = vld [vmem:[#allocation12 + $0x98] sm:$0xf0] }
  0xac   :  { %4803 = vst [vmem:[#allocation99_spill] sm:$0xff] %v3705_v61  ;;  %847 = vmatpush.bf16.msra.mxu0 %v3705_v61 }
  0xae   :  { %1014 = vmatpush.bf16.msra.mxu1 %v3557_v31  ;;  %873 = vmatpush.bf16.msra.mxu2 %v3708_v56  ;;  %v2886_v31 = vld [vmem:[#allocation12 + $0x8c] sm:$0xf] }
  0xaf   :  { %1040 = vmatpush.bf16.msra.mxu3 %v3563_v40  ;;  %v3716_v55 = vor.u32 %v2886_v31, %v2657_v2  ;;  %v2641_v40 = vld [vmem:[#allocation12 + $0x78] sm:$0xf0]  ;;  %v2623_v2 = vld [vmem:[#allocation12 + $0x48] sm:$0xf]  ;;  %v2880_v31 = vld [vmem:[#allocation12 + $0x54] sm:$0xf0] }
  0xb0   :  { %848 = vmatpush.bf16.msra.mxu0 %v3713_v5  ;;  %v3724_v39 = vor.u32 %v2882_v47, %v2641_v40  ;;  %v2607_v40 = vld [vmem:[#allocation12 + $0x28] sm:$0xf]  ;;  %v2874_v47 = vld [vmem:[#allocation12 + $0x2c] sm:$0xf] }
  0xb1   :  { %4806 = vst [vmem:[#allocation102_spill] sm:$0xff] %v3716_v55 }
  0xb2   :  { %1015 = vmatpush.bf16.msra.mxu1 %v3569_v1  ;;  %874 = vmatpush.bf16.msra.mxu2 %v3716_v55  ;;  %v3721_v1 = vor.u32 %v2884_v20, %v2639_v30  ;;  %4808 = vst [vmem:[#allocation104_spill] sm:$0xff] %v3724_v39  ;;  %v2876_v20 = vld [vmem:[#allocation12 + $0x34] sm:$0xf0] }
  0xb3   :  { %1041 = vmatpush.bf16.msra.mxu3 %v3575_v13  ;;  %v2625_v13 = vld [vmem:[#allocation12 + $0x58] sm:$0xf0] }
  0xb4   :  { %4807 = vst [vmem:[#allocation103_spill] sm:$0xff] %v3721_v1  ;;  %849 = vmatpush.bf16.msra.mxu0 %v3721_v1  ;;  %v3732_v30 = vor.u32 %v2878_v58, %v2625_v13  ;;  %v2872_v13 = vld [vmem:[#allocation12 + $0x14] sm:$0xf0]  ;;  %v233_v58 = vld [vmem:[#allocation4 + $0x8] sm:$0xff] }
  0xb6   :  { %1016 = vmatpush.bf16.msra.mxu1 %v3581_v37  ;;  %875 = vmatpush.bf16.msra.mxu2 %v3724_v39  ;;  %v3729_v37 = vor.u32 %v2880_v31, %v2623_v2  ;;  %4810 = vst [vmem:[#allocation106_spill] sm:$0xff] %v3732_v30  ;;  %v2591_v2 = vld [vmem:[#allocation12 + $0x8] sm:$0xf]  ;;  %v2870_v31 = vld [vmem:[#allocation12 + $0xc] sm:$0xf] }
  0xb7   :  { %1042 = vmatpush.bf16.msra.mxu3 %v3587_v48  ;;  %v2609_v48 = vld [vmem:[#allocation12 + $0x38] sm:$0xf0]  ;;  %v3744_v26 = vor.u32 %v2870_v31, %v2593_v49 }
  0xb8   :  { %4809 = vst [vmem:[#allocation105_spill] sm:$0xff] %v3729_v37  ;;  %850 = vmatpush.bf16.msra.mxu0 %v3729_v37  ;;  %v3738_v53 = vor.u32 %v2874_v47, %v2609_v48 }
  0xb9   :  { %v406_v32 = vpop.f32.mrf.mxu0  ;;  %4814 = vst [vmem:[#allocation110_spill] sm:$0xff] %v3744_v26 }
  0xba   :  { %1017 = vmatpush.bf16.msra.mxu1 %v3593_v35  ;;  %876 = vmatpush.bf16.msra.mxu2 %v3732_v30  ;;  %v3736_v35 = vor.u32 %v2876_v20, %v2607_v40  ;;  %4812 = vst [vmem:[#allocation108_spill] sm:$0xff] %v3738_v53  ;;  %v449_v40 = vadd.f32 %v406_v32, %v232_v52  ;;  %v419_v20 = vpop.f32.mrf.mxu1 }
  0xbb   :  { %1043 = vmatpush.bf16.msra.mxu3 %v3599_v28  ;;  %v3742_v28 = vor.u32 %v2872_v13, %v2591_v2  ;;  %v450_v14 = vadd.f32 %v419_v20, %v233_v58 }
  0xbc   :  { %4811 = vst [vmem:[#allocation107_spill] sm:$0xff] %v3736_v35  ;;  %851 = vmatpush.bf16.msra.mxu0 %v3736_v35  ;;  %v453_v48 = vmul.f32 0.5, %v449_v40  ;;  %v116_v40 = vld [vmem:[#allocation9] sm:$0xff] }
  0xbd   :  { %4813 = vst [vmem:[#allocation109_spill] sm:$0xff] %v3742_v28  ;;  %v454_v47 = vmul.f32 0.5, %v450_v14 }
  0xbe   :  { %877 = vmatpush.bf16.msra.mxu2 %v3738_v53  ;;  %2948 = vtanh.f32 %v453_v48 }
  0xbf   :  { %2950 = vtanh.f32 %v454_v47 }
  0xc0   :  { %852 = vmatpush.bf16.msra.mxu0 %v3742_v28 }
  0xc1   :  { %v432_v57 = vpop.f32.mrf.mxu2  ;;  %v408_v50 = vpop.f32.mrf.mxu0 }
  0xc2   :  { %878 = vmatpush.bf16.msra.mxu2 %v3744_v26  ;;  %v451_v2 = vadd.f32 %v432_v57, %v234_v6  ;;  %v421_v49 = vpop.f32.mrf.mxu1 }
  0xc3   :  { %v445_v13 = vpop.f32.mrf.mxu3 }
  0xc4   :  { %v452_v45 = vadd.f32 %v445_v13, %v235_v62  ;;  %v455_v31 = vmul.f32 0.5, %v451_v2  ;;  %v2949_v32 = vpop.eup %2948 }
  0xc5   :  { %v2951_v52 = vpop.eup %2950  ;;  %v459_v58 = vmul.f32 0.5, %v2949_v32  ;;  %v4817_v32 = vld [vmem:[#allocation85_spill] sm:$0xff] }
  0xc6   :  { %2952 = vtanh.f32 %v452_v45  ;;  %v460_v20 = vmul.f32 0.5, %v2951_v52  ;;  %v4818_v52 = vld [vmem:[#allocation35_spill] sm:$0xff] }
  0xc7   :  { %2954 = vtanh.f32 %v455_v31  ;;  %v462_v38 = vadd.f32 0.5, %v459_v58  ;;  %v4816_v31 = vld [vmem:[#allocation33_spill] sm:$0xff] }
  0xc8   :  { %v463_v14 = vadd.f32 0.5, %v460_v20  ;;  %v4819_v58 = vld [vmem:[#allocation37_spill] sm:$0xff]  ;;  %v4820_v20 = vld [vmem:[#allocation39_spill] sm:$0xff] }
  0xc9   :  { %v434_v48 = vpop.f32.mrf.mxu2 }
  0xca   :  { %v466_v25 = vmul.f32 %v463_v14, %v116_v40  ;;  %v4821_v40 = vld [vmem:[#allocation41_spill] sm:$0xff]  ;;  %v4822_v48 = vld [vmem:[#allocation43_spill] sm:$0xff] }
  0xcb   :  { %v447_v33 = vpop.f32.mrf.mxu3 }
  0xcc   :  { %v2953_v47 = vpop.eup %2952 }
  0xcd   :  { %v2955_v17 = vpop.eup %2954  ;;  %v467_v57 = vmul.f32 %v2953_v47, %v462_v38  ;;  %v4815_v38 = vld [vmem:[#allocation31_spill] sm:$0xff]  ;;  %v4823_v47 = vld [vmem:[#allocation45_spill] sm:$0xff] }
  0xce   :  { %v461_v50 = vmul.f32 0.5, %v2955_v17 }
  0xcf   :  { %v3748_v6 = vadd.f32 %v467_v57, %v466_v25  ;;  %v4824_v57 = vld [vmem:[#allocation51_spill] sm:$0xff] }
  0xd0   :  { %v464_v62 = vadd.f32 0.5, %v461_v50  ;;  %v4825_v50 = vld [vmem:[#allocation52_spill] sm:$0xff] }
  0xd1   :  { %2956 = vtanh.f32 %v3748_v6 }
  0xd7   :  { %v2957_v45 = vpop.eup %2956 }
  0xd8   :  { %v470_v2 = vmul.f32 %v2957_v45, %v464_v62 }
  0xda   :  { %v471_v13 = vpack.c.bf16 %v470_v2, %v470_v2  ;;  %v3751_v49 = vpop.f32.mrf.mxu1  ;;  %v4826_v2 = vld [vmem:[#allocation54_spill] sm:$0xff] }
  0xdc   :  { %801 = vmatmul.bf16.vlgmr.msrb.gmra.mxu0 %v471_v13  ;;  %827 = vmatmul.bf16.vlgmr.msrb.gmra.mxu2 %v471_v13 }
  0xdd   :  { %942 = vmatmul.bf16.vlgmr.msrb.gmra.mxu1 %v471_v13  ;;  %968 = vmatmul.bf16.vlgmr.msrb.gmra.mxu3 %v471_v13 }
  0xde   :  { %921 = vmatpush.bf16.msrb.mxu0 %v3422_v3  ;;  %947 = vmatpush.bf16.msrb.mxu2 %v3426_v8 }
  0xdf   :  { %1062 = vmatpush.bf16.msrb.mxu1 %v3601_v36  ;;  %1088 = vmatpush.bf16.msrb.mxu3 %v3604_v41 }
  0xe1   :  { %v3757_v17 = vpop.f32.mrf.mxu3 }
  0xe2   :  { %922 = vmatpush.bf16.msrb.mxu0 %v3433_v16  ;;  %948 = vmatpush.bf16.msrb.mxu2 %v3438_v21  ;;  %v817_v25 = vpop.f32.mrf.mxu1 }
  0xe3   :  { %1063 = vmatpush.bf16.msrb.mxu1 %v3614_v51  ;;  %1089 = vmatpush.bf16.msrb.mxu3 %v3617_v42  ;;  %v4827_v25 = vld [vmem:[#allocation56_spill] sm:$0xff] }
  0xe6   :  { %923 = vmatpush.bf16.msrb.mxu0 %v3443_v29  ;;  %949 = vmatpush.bf16.msrb.mxu2 %v3449_v34 }
  0xe7   :  { %1064 = vmatpush.bf16.msrb.mxu1 %v3623_v63  ;;  %1090 = vmatpush.bf16.msrb.mxu3 %v3626_v15 }
  0xe9   :  { %v843_v33 = vpop.f32.mrf.mxu3 }
  0xea   :  { %924 = vmatpush.bf16.msrb.mxu0 %v3455_v44  ;;  %950 = vmatpush.bf16.msrb.mxu2 %v3461_v46  ;;  %v4828_v33 = vld [vmem:[#allocation58_spill] sm:$0xff] }
  0xeb   :  { %1065 = vmatpush.bf16.msrb.mxu1 %v3629_v24  ;;  %1091 = vmatpush.bf16.msrb.mxu3 %v3632_v59 }
  0xec   :  { %853 = vmatmul.bf16.vlgmr.msra.gmra.mxu0 %v471_v13  ;;  %879 = vmatmul.bf16.vlgmr.msra.gmra.mxu2 %v471_v13 }
  0xee   :  { %925 = vmatpush.bf16.msrb.mxu0 %v4815_v38  ;;  %951 = vmatpush.bf16.msrb.mxu2 %v4816_v31 }
  0xef   :  { %1066 = vmatpush.bf16.msrb.mxu1 %v4817_v32  ;;  %1092 = vmatpush.bf16.msrb.mxu3 %v3638_v54  ;;  %v4836_v54 = vld [vmem:[#allocation74_spill] sm:$0xff] }
  0xf0   :  { %v4837_v32 = vld [vmem:[#allocation78_spill] sm:$0xff] }
  0xf2   :  { %926 = vmatpush.bf16.msrb.mxu0 %v4818_v52  ;;  %952 = vmatpush.bf16.msrb.mxu2 %v4819_v58 }
  0xf3   :  { %1067 = vmatpush.bf16.msrb.mxu1 %v3641_v18  ;;  %1093 = vmatpush.bf16.msrb.mxu3 %v3644_v19  ;;  %v4830_v19 = vld [vmem:[#allocation62_spill] sm:$0xff]  ;;  %v4831_v18 = vld [vmem:[#allocation64_spill] sm:$0xff] }
  0xf6   :  { %927 = vmatpush.bf16.msrb.mxu0 %v4820_v20  ;;  %953 = vmatpush.bf16.msrb.mxu2 %v4821_v40 }
  0xf7   :  { %1068 = vmatpush.bf16.msrb.mxu1 %v3647_v23  ;;  %1094 = vmatpush.bf16.msrb.mxu3 %v3650_v27  ;;  %v4829_v27 = vld [vmem:[#allocation60_spill] sm:$0xff] }
  0xfa   :  { %v3781_v14 = vpop.f32.mrf.mxu1  ;;  %928 = vmatpush.bf16.msrb.mxu0 %v4822_v48  ;;  %954 = vmatpush.bf16.msrb.mxu2 %v4823_v47 }
  0xfb   :  { %1069 = vmatpush.bf16.msrb.mxu1 %v3653_v11  ;;  %1095 = vmatpush.bf16.msrb.mxu3 %v3656_v4  ;;  %v4832_v11 = vld [vmem:[#allocation66_spill] sm:$0xff]  ;;  %v4833_v4 = vld [vmem:[#allocation68_spill] sm:$0xff] }
  0xfd   :  { %929 = vmatmul.bf16.vlgmr.msrb.gmra.mxu0 %v471_v13  ;;  %955 = vmatmul.bf16.vlgmr.msrb.gmra.mxu2 %v471_v13  ;;  %v4834_v13 = vld [vmem:[#allocation70_spill] sm:$0xff] }
  0xfe   :  { %997 = vmatpush.bf16.msra.mxu0 %v4824_v57  ;;  %1023 = vmatpush.bf16.msra.mxu2 %v4825_v50 }
 0x101   :  { %v3791_v62 = vpop.f32.mrf.mxu3 }
 0x102   :  { %v869_v45 = vpop.f32.mrf.mxu1  ;;  %998 = vmatpush.bf16.msra.mxu0 %v4826_v2  ;;  %1024 = vmatpush.bf16.msra.mxu2 %v4827_v25 }
 0x103   :  { %v4835_v45 = vld [vmem:[#allocation72_spill] sm:$0xff] }
 0x106   :  { %999 = vmatpush.bf16.msra.mxu0 %v4828_v33  ;;  %1025 = vmatpush.bf16.msra.mxu2 %v4829_v27 }
 0x109   :  { %v895_v23 = vpop.f32.mrf.mxu3 }
 0x10a   :  { %1000 = vmatpush.bf16.msra.mxu0 %v4830_v19  ;;  %1026 = vmatpush.bf16.msra.mxu2 %v4831_v18  ;;  %v222_v23 = vld [vmem:[%s4528_s5] sm:$0xf]  ;;  %s3347_s5 = smov [#allocation17]  }
 0x10b   :  { %v3834_v59 = vperm.slane %v222_v23, 2  ;;  %s2422_s16 = sshll.u32 %s3347_s5, 4  ;;  %s2423_s16 = int_to_ptr.vmem [resolvable:$true] %s2422_s16 }
 0x10d   :  { %4840 = vst [vmem:[#allocation35_spill] sm:$0xff] %v3834_v59 }
 0x10e   :  { %1001 = vmatpush.bf16.msra.mxu0 %v4832_v11  ;;  %1027 = vmatpush.bf16.msra.mxu2 %v4833_v4 }
 0x112   :  { %1002 = vmatpush.bf16.msra.mxu0 %v4834_v13  ;;  %1028 = vmatpush.bf16.msra.mxu2 %v4835_v45 }
 0x116   :  { %1003 = vmatpush.bf16.msra.mxu0 %v4836_v54  ;;  %1029 = vmatpush.bf16.msra.mxu2 %v4837_v32 }
 0x11a   :  { %1004 = vmatpush.bf16.msra.mxu0 %v3683_v43  ;;  %1030 = vmatpush.bf16.msra.mxu2 %v3686_v60 }
 0x11e   :  { %1049 = vmatpush.bf16.msrb.mxu0 %v3689_v0  ;;  %1075 = vmatpush.bf16.msrb.mxu2 %v3691_v10 }
 0x122   :  { %1050 = vmatpush.bf16.msrb.mxu0 %v3697_v22  ;;  %1076 = vmatpush.bf16.msrb.mxu2 %v3700_v9 }
 0x126   :  { %1051 = vmatpush.bf16.msrb.mxu0 %v3705_v61  ;;  %1077 = vmatpush.bf16.msrb.mxu2 %v3708_v56 }
 0x12a   :  { %1052 = vmatpush.bf16.msrb.mxu0 %v3713_v5  ;;  %1078 = vmatpush.bf16.msrb.mxu2 %v3716_v55  ;;  %v3826_v5 = vperm.slane %v222_v23, 0 }
 0x12c   :  { %4838 = vst [vmem:[#allocation31_spill] sm:$0xff] %v3826_v5 }
 0x12e   :  { %1053 = vmatpush.bf16.msrb.mxu0 %v3721_v1  ;;  %1079 = vmatpush.bf16.msrb.mxu2 %v3724_v39  ;;  %v3828_v39 = vperm.slane %v222_v23, 1 }
 0x130   :  { %4839 = vst [vmem:[#allocation33_spill] sm:$0xff] %v3828_v39 }
 0x132   :  { %1054 = vmatpush.bf16.msrb.mxu0 %v3729_v37  ;;  %1080 = vmatpush.bf16.msrb.mxu2 %v3732_v30 }
 0x136   :  { %1055 = vmatpush.bf16.msrb.mxu0 %v3736_v35  ;;  %1081 = vmatpush.bf16.msrb.mxu2 %v3738_v53 }
 0x13a   :  { %1056 = vmatpush.bf16.msrb.mxu0 %v3742_v28  ;;  %1082 = vmatpush.bf16.msrb.mxu2 %v3744_v26 }
 0x159   :  { %v802_v55 = vpop.f32.mrf.mxu0 }
 0x15a   :  { %v943_v1 = vpop.f32.mrf.mxu1  ;;  %v803_v30 = vadd.f32 %v802_v55, %v3826_v5  ;;  %v3837_v55 = vperm.slane %v222_v23, 3 }
 0x15c   :  { %v816_v61 = vadd.f32 %v3751_v49, %v803_v30  ;;  %4841 = vst [vmem:[#allocation37_spill] sm:$0xff] %v3837_v55 }
 0x15e   :  { %v897_v24 = vmul.f32 0.5, %v816_v61 }
 0x15f   :  { %v828_v37 = vpop.f32.mrf.mxu2 }
 0x160   :  { %v829_v35 = vadd.f32 %v828_v37, %v3828_v39  ;;  %v969_v53 = vpop.f32.mrf.mxu3  ;;  %v918_v37 = vld [vmem:[#allocation4 + $0x28] sm:$0xff]  ;;  %v917_v39 = vld [vmem:[#allocation4 + $0x20] sm:$0xff] }
 0x161   :  { %v804_v56 = vpop.f32.mrf.mxu0  ;;  %v974_v49 = vadd.f32 %v943_v1, %v918_v37  ;;  %v920_v37 = vld [vmem:[#allocation4 + $0x38] sm:$0xff] }
 0x162   :  { %v842_v28 = vadd.f32 %v3757_v17, %v829_v35  ;;  %v945_v26 = vpop.f32.mrf.mxu1 }
 0x164   :  { %v898_v9 = vmul.f32 0.5, %v842_v28 }
 0x166   :  { %2958 = vtanh.f32 %v898_v9 }
 0x167   :  { %v830_v22 = vpop.f32.mrf.mxu2  ;;  %2960 = vtanh.f32 %v897_v24 }
 0x168   :  { %v971_v10 = vpop.f32.mrf.mxu3 }
 0x169   :  { %v854_v0 = vpop.f32.mrf.mxu0 }
 0x16a   :  { %v855_v60 = vadd.f32 %v854_v0, %v3834_v59  ;;  %v978_v0 = vmul.f32 0.5, %v974_v49  ;;  %v117_v59 = vld [vmem:[#allocation9 + $0x8] sm:$0xff] }
 0x16c   :  { %v868_v56 = vadd.f32 %v3781_v14, %v855_v60  ;;  %v2959_v26 = vpop.eup %2958 }
 0x16d   :  { %v2961_v22 = vpop.eup %2960  ;;  %v904_v10 = vmul.f32 0.5, %v2959_v26  ;;  %v919_v26 = vld [vmem:[#allocation4 + $0x30] sm:$0xff] }
 0x16e   :  { %v899_v17 = vmul.f32 0.5, %v868_v56  ;;  %v903_v9 = vmul.f32 0.5, %v2961_v22  ;;  %v976_v22 = vadd.f32 %v969_v53, %v920_v37 }
 0x16f   :  { %v880_v35 = vpop.f32.mrf.mxu2  ;;  %v907_v24 = vadd.f32 0.5, %v904_v10 }
 0x170   :  { %v881_v30 = vadd.f32 %v880_v35, %v3837_v55  ;;  %v906_v60 = vadd.f32 0.5, %v903_v9 }
 0x171   :  { %v856_v28 = vpop.f32.mrf.mxu0  ;;  %v910_v35 = vmul.f32 %v907_v24, %v117_v59 }
 0x172   :  { %v894_v61 = vadd.f32 %v3791_v62, %v881_v30 }
 0x174   :  { %2962 = vtanh.f32 %v894_v61 }
 0x175   :  { %2964 = vtanh.f32 %v899_v17 }
 0x176   :  { %2966 = vtanh.f32 %v978_v0 }
 0x177   :  { %v882_v23 = vpop.f32.mrf.mxu2 }
 0x17a   :  { %v2963_v14 = vpop.eup %2962  ;;  %v930_v5 = vpop.f32.mrf.mxu0 }
 0x17b   :  { %v911_v28 = vmul.f32 %v2963_v14, %v906_v60  ;;  %v973_v55 = vadd.f32 %v930_v5, %v917_v39  ;;  %v2965_v1 = vpop.eup %2964 }
 0x17c   :  { %v2967_v30 = vpop.eup %2966  ;;  %v905_v49 = vmul.f32 0.5, %v2965_v1 }
 0x17d   :  { %v3842_v62 = vadd.f32 %v911_v28, %v910_v35  ;;  %v977_v56 = vmul.f32 0.5, %v973_v55  ;;  %v984_v9 = vmul.f32 0.5, %v2967_v30  ;;  %v4843_v30 = vld [vmem:[#allocation26_spill] sm:$0xff] }
 0x17e   :  { %v908_v59 = vadd.f32 0.5, %v905_v49  ;;  %v4844_v49 = vld [vmem:[#allocation27_spill] sm:$0xff] }
 0x17f   :  { %2968 = vtanh.f32 %v3842_v62  ;;  %v987_v23 = vadd.f32 0.5, %v984_v9  ;;  %v4846_v9 = vld [vmem:[#allocation29_spill] sm:$0xff] }
 0x180   :  { %2970 = vtanh.f32 %v977_v56  ;;  %v956_v61 = vpop.f32.mrf.mxu2 }
 0x181   :  { %v975_v10 = vadd.f32 %v956_v61, %v919_v26  ;;  %2972 = vtanh.f32 %v976_v22  ;;  %v990_v28 = vmul.f32 %v987_v23, %v3748_v6  ;;  %v4842_v26 = vld [vmem:[#allocation25_spill] sm:$0xff]  ;;  %v4845_v61 = vld [vmem:[#allocation28_spill] sm:$0xff]  ;;  %v4851_v23 = vld [vmem:[#allocation38_spill] sm:$0xff] }
 0x182   :  { %v932_v17 = vpop.f32.mrf.mxu0 }
 0x183   :  { %v979_v0 = vmul.f32 0.5, %v975_v10 }
 0x185   :  { %v2969_v5 = vpop.eup %2968  ;;  %2974 = vtanh.f32 %v979_v0  ;;  %v4847_v0 = vld [vmem:[#allocation30_spill] sm:$0xff] }
 0x186   :  { %v2971_v39 = vpop.eup %2970  ;;  %v914_v24 = vmul.f32 %v2969_v5, %v908_v59  ;;  %v4848_v5 = vld [vmem:[#allocation32_spill] sm:$0xff] }
 0x187   :  { %v983_v60 = vmul.f32 0.5, %v2971_v39  ;;  %v2973_v53 = vpop.eup %2972  ;;  %v4849_v39 = vld [vmem:[#allocation34_spill] sm:$0xff] }
 0x188   :  { %v958_v55 = vpop.f32.mrf.mxu2  ;;  %915 = vst [vmem:[#allocation13] sm:$0xff] %v914_v24  ;;  %v996_v14 = vpack.c.bf16 %v914_v24, %v914_v24  ;;  %v4850_v24 = vld [vmem:[#allocation36_spill] sm:$0xff] }
 0x189   :  { %v986_v35 = vadd.f32 0.5, %v983_v60  ;;  %v4852_v60 = vld [vmem:[#allocation40_spill] sm:$0xff]  ;;  %v4853_v55 = vld [vmem:[#allocation42_spill] sm:$0xff] }
 0x18a   :  { %1018 = vmatmul.bf16.vlgmr.msra.gmra.mxu1 %v996_v14  ;;  %1044 = vmatmul.bf16.vlgmr.msra.gmra.mxu3 %v996_v14 }
 0x18b   :  { %v991_v1 = vmul.f32 %v2973_v53, %v986_v35  ;;  %1139 = vmatpush.bf16.msra.mxu1 %v3424_v7  ;;  %1165 = vmatpush.bf16.msra.mxu3 %v3429_v12  ;;  %v2975_v37 = vpop.eup %2974  ;;  %v4855_v35 = vld [vmem:[#allocation46_spill] sm:$0xff]  ;;  %v4856_v53 = vld [vmem:[#allocation47_spill] sm:$0xff] }
 0x18c   :  { %v985_v22 = vmul.f32 0.5, %v2975_v37  ;;  %v4859_v37 = vld [vmem:[#allocation50_spill] sm:$0xff] }
 0x18d   :  { %v3848_v56 = vadd.f32 %v991_v1, %v990_v28  ;;  %v4857_v28 = vld [vmem:[#allocation48_spill] sm:$0xff]  ;;  %v4858_v1 = vld [vmem:[#allocation49_spill] sm:$0xff] }
 0x18e   :  { %v988_v6 = vadd.f32 0.5, %v985_v22  ;;  %v4860_v22 = vld [vmem:[#allocation53_spill] sm:$0xff] }
 0x18f   :  { %2976 = vtanh.f32 %v3848_v56  ;;  %1140 = vmatpush.bf16.msra.mxu1 %v4842_v26  ;;  %1166 = vmatpush.bf16.msra.mxu3 %v4843_v30 }
 0x193   :  { %1141 = vmatpush.bf16.msra.mxu1 %v4844_v49  ;;  %1167 = vmatpush.bf16.msra.mxu3 %v4845_v61 }
 0x195   :  { %v2977_v10 = vpop.eup %2976 }
 0x196   :  { %v994_v17 = vmul.f32 %v2977_v10, %v988_v6  ;;  %v4861_v6 = vld [vmem:[#allocation55_spill] sm:$0xff]  ;;  %v4862_v10 = vld [vmem:[#allocation57_spill] sm:$0xff] }
 0x197   :  { %1142 = vmatpush.bf16.msra.mxu1 %v4846_v9  ;;  %1168 = vmatpush.bf16.msra.mxu3 %v4847_v0 }
 0x198   :  { %v995_v59 = vpack.c.bf16 %v994_v17, %v994_v17  ;;  %v4863_v17 = vld [vmem:[#allocation59_spill] sm:$0xff] }
 0x19a   :  { %1005 = vmatmul.bf16.vlgmr.msra.gmra.mxu0 %v995_v59  ;;  %1031 = vmatmul.bf16.vlgmr.msra.gmra.mxu2 %v995_v59 }
 0x19b   :  { %1126 = vmatpush.bf16.msra.mxu0 %v3422_v3  ;;  %1152 = vmatpush.bf16.msra.mxu2 %v3426_v8 }
 0x19c   :  { %1070 = vmatmul.bf16.vlgmr.msrb.gmra.mxu1 %v996_v14  ;;  %1096 = vmatmul.bf16.vlgmr.msrb.gmra.mxu3 %v996_v14  ;;  %v4854_v14 = vld [vmem:[#allocation44_spill] sm:$0xff] }
 0x19d   :  { %1143 = vmatpush.bf16.msra.mxu1 %v4848_v5  ;;  %1169 = vmatpush.bf16.msra.mxu3 %v4849_v39 }
 0x19f   :  { %1127 = vmatpush.bf16.msra.mxu0 %v3433_v16  ;;  %1153 = vmatpush.bf16.msra.mxu2 %v3438_v21 }
 0x1a1   :  { %1144 = vmatpush.bf16.msra.mxu1 %v4850_v24  ;;  %1170 = vmatpush.bf16.msra.mxu3 %v4851_v23 }
 0x1a3   :  { %1128 = vmatpush.bf16.msra.mxu0 %v3443_v29  ;;  %1154 = vmatpush.bf16.msra.mxu2 %v3449_v34 }
 0x1a5   :  { %1145 = vmatpush.bf16.msra.mxu1 %v4852_v60  ;;  %1171 = vmatpush.bf16.msra.mxu3 %v4853_v55 }
 0x1a7   :  { %1129 = vmatpush.bf16.msra.mxu0 %v3455_v44  ;;  %1155 = vmatpush.bf16.msra.mxu2 %v3461_v46 }
 0x1a9   :  { %1146 = vmatpush.bf16.msra.mxu1 %v4854_v14  ;;  %1172 = vmatpush.bf16.msra.mxu3 %v4855_v35 }
 0x1aa   :  { %1057 = vmatmul.bf16.vlgmr.msrb.gmra.mxu0 %v995_v59  ;;  %1083 = vmatmul.bf16.vlgmr.msrb.gmra.mxu2 %v995_v59 }
 0x1ab   :  { %1130 = vmatpush.bf16.msra.mxu0 %v4815_v38  ;;  %1156 = vmatpush.bf16.msra.mxu2 %v4816_v31 }
 0x1ac   :  { %1147 = vmatmul.bf16.vlgmr.msra.gmra.mxu1 %v995_v59  ;;  %1173 = vmatmul.bf16.vlgmr.msra.gmra.mxu3 %v995_v59 }
 0x1ad   :  { %1215 = vmatpush.bf16.msrb.mxu1 %v4856_v53  ;;  %1241 = vmatpush.bf16.msrb.mxu3 %v4857_v28 }
 0x1af   :  { %1131 = vmatpush.bf16.msra.mxu0 %v4818_v52  ;;  %1157 = vmatpush.bf16.msra.mxu2 %v4819_v58 }
 0x1b1   :  { %1216 = vmatpush.bf16.msrb.mxu1 %v4858_v1  ;;  %1242 = vmatpush.bf16.msrb.mxu3 %v4859_v37 }
 0x1b3   :  { %1132 = vmatpush.bf16.msra.mxu0 %v4820_v20  ;;  %1158 = vmatpush.bf16.msra.mxu2 %v4821_v40 }
 0x1b5   :  { %1217 = vmatpush.bf16.msrb.mxu1 %v4860_v22  ;;  %1243 = vmatpush.bf16.msrb.mxu3 %v4861_v6  ;;  %v4864_v22 = vld [vmem:[#allocation61_spill] sm:$0xff]  ;;  %v4865_v6 = vld [vmem:[#allocation63_spill] sm:$0xff] }
 0x1b7   :  { %1133 = vmatpush.bf16.msra.mxu0 %v4822_v48  ;;  %1159 = vmatpush.bf16.msra.mxu2 %v4823_v47 }
 0x1b9   :  { %1218 = vmatpush.bf16.msrb.mxu1 %v4862_v10  ;;  %1244 = vmatpush.bf16.msrb.mxu3 %v4863_v17 }
 0x1ba   :  { %1134 = vmatmul.bf16.vlgmr.msra.gmra.mxu0 %v995_v59  ;;  %1160 = vmatmul.bf16.vlgmr.msra.gmra.mxu2 %v995_v59  ;;  %v4868_v59 = vld [vmem:[#allocation69_spill] sm:$0xff] }
 0x1bb   :  { %1202 = vmatpush.bf16.msrb.mxu0 %v4824_v57  ;;  %1228 = vmatpush.bf16.msrb.mxu2 %v4825_v50  ;;  %v4866_v57 = vld [vmem:[#allocation65_spill] sm:$0xff]  ;;  %v4867_v50 = vld [vmem:[#allocation67_spill] sm:$0xff] }
 0x1bd   :  { %1219 = vmatpush.bf16.msrb.mxu1 %v4864_v22  ;;  %1245 = vmatpush.bf16.msrb.mxu3 %v4865_v6  ;;  %v4870_v6 = vld [vmem:[#allocation73_spill] sm:$0xff]  ;;  %v1123_v22 = vld [vmem:[#allocation4 + $0x48] sm:$0xff] }
 0x1bf   :  { %1203 = vmatpush.bf16.msrb.mxu0 %v4826_v2  ;;  %1229 = vmatpush.bf16.msrb.mxu2 %v4827_v25  ;;  %v4869_v2 = vld [vmem:[#allocation71_spill] sm:$0xff] }
 0x1c1   :  { %1220 = vmatpush.bf16.msrb.mxu1 %v4866_v57  ;;  %1246 = vmatpush.bf16.msrb.mxu3 %v4867_v50 }
 0x1c3   :  { %1204 = vmatpush.bf16.msrb.mxu0 %v4828_v33  ;;  %1230 = vmatpush.bf16.msrb.mxu2 %v4829_v27  ;;  %v4871_v33 = vld [vmem:[#allocation75_spill] sm:$0xff] }
 0x1c5   :  { %1221 = vmatpush.bf16.msrb.mxu1 %v4868_v59  ;;  %1247 = vmatpush.bf16.msrb.mxu3 %v4869_v2 }
 0x1c7   :  { %1205 = vmatpush.bf16.msrb.mxu0 %v4830_v19  ;;  %1231 = vmatpush.bf16.msrb.mxu2 %v4831_v18 }
 0x1c9   :  { %1222 = vmatpush.bf16.msrb.mxu1 %v4870_v6  ;;  %1248 = vmatpush.bf16.msrb.mxu3 %v4871_v33 }
 0x1cb   :  { %1206 = vmatpush.bf16.msrb.mxu0 %v4832_v11  ;;  %1232 = vmatpush.bf16.msrb.mxu2 %v4833_v4 }
 0x1cd   :  { %1267 = vmatpush.bf16.msra.mxu1 %v3601_v36  ;;  %1293 = vmatpush.bf16.msra.mxu3 %v3604_v41  ;;  %v4872_v36 = vld [vmem:[#allocation94_spill] sm:$0xff]  ;;  %v4873_v41 = vld [vmem:[#allocation95_spill] sm:$0xff] }
 0x1cf   :  { %1207 = vmatpush.bf16.msrb.mxu0 %v4834_v13  ;;  %1233 = vmatpush.bf16.msrb.mxu2 %v4835_v45  ;;  %v4874_v13 = vld [vmem:[#allocation96_spill] sm:$0xff]  ;;  %v4875_v45 = vld [vmem:[#allocation83_spill] sm:$0xff] }
 0x1d1   :  { %1268 = vmatpush.bf16.msra.mxu1 %v3614_v51  ;;  %1294 = vmatpush.bf16.msra.mxu3 %v3617_v42  ;;  %v4876_v51 = vld [vmem:[#allocation84_spill] sm:$0xff]  ;;  %v4877_v42 = vld [vmem:[#allocation97_spill] sm:$0xff] }
 0x1d3   :  { %1208 = vmatpush.bf16.msrb.mxu0 %v4836_v54  ;;  %1234 = vmatpush.bf16.msrb.mxu2 %v4837_v32  ;;  %v4878_v54 = vld [vmem:[#allocation98_spill] sm:$0xff]  ;;  %v4879_v32 = vld [vmem:[#allocation85_spill] sm:$0xff] }
 0x1d5   :  { %1269 = vmatpush.bf16.msra.mxu1 %v3623_v63  ;;  %1295 = vmatpush.bf16.msra.mxu3 %v3626_v15  ;;  %v4880_v63 = vld [vmem:[#allocation86_spill] sm:$0xff]  ;;  %v4881_v15 = vld [vmem:[#allocation99_spill] sm:$0xff] }
 0x1d7   :  { %1209 = vmatpush.bf16.msrb.mxu0 %v3683_v43  ;;  %1235 = vmatpush.bf16.msrb.mxu2 %v4872_v36  ;;  %v4882_v43 = vld [vmem:[#allocation100_spill] sm:$0xff]  ;;  %v4883_v36 = vld [vmem:[#allocation87_spill] sm:$0xff] }
 0x1d9   :  { %1270 = vmatpush.bf16.msra.mxu1 %v4875_v45  ;;  %1296 = vmatpush.bf16.msra.mxu3 %v4876_v51  ;;  %v4886_v45 = vld [vmem:[#allocation102_spill] sm:$0xff]  ;;  %v4887_v51 = vld [vmem:[#allocation89_spill] sm:$0xff] }
 0x1db   :  { %1254 = vmatpush.bf16.msra.mxu0 %v4873_v41  ;;  %1280 = vmatpush.bf16.msra.mxu2 %v4874_v13  ;;  %v4884_v41 = vld [vmem:[#allocation88_spill] sm:$0xff]  ;;  %v4885_v13 = vld [vmem:[#allocation101_spill] sm:$0xff] }
 0x1dd   :  { %1271 = vmatpush.bf16.msra.mxu1 %v4879_v32  ;;  %1297 = vmatpush.bf16.msra.mxu3 %v4880_v63  ;;  %v4890_v32 = vld [vmem:[#allocation104_spill] sm:$0xff]  ;;  %v4891_v63 = vld [vmem:[#allocation91_spill] sm:$0xff] }
 0x1df   :  { %1255 = vmatpush.bf16.msra.mxu0 %v4877_v42  ;;  %1281 = vmatpush.bf16.msra.mxu2 %v4878_v54  ;;  %v4888_v42 = vld [vmem:[#allocation90_spill] sm:$0xff]  ;;  %v4889_v54 = vld [vmem:[#allocation103_spill] sm:$0xff] }
 0x1e1   :  { %1272 = vmatpush.bf16.msra.mxu1 %v4883_v36  ;;  %1298 = vmatpush.bf16.msra.mxu3 %v4884_v41  ;;  %v4894_v36 = vld [vmem:[#allocation106_spill] sm:$0xff]  ;;  %v4895_v41 = vld [vmem:[#allocation107_spill] sm:$0xff] }
 0x1e3   :  { %1256 = vmatpush.bf16.msra.mxu0 %v4881_v15  ;;  %1282 = vmatpush.bf16.msra.mxu2 %v4882_v43  ;;  %v4892_v15 = vld [vmem:[#allocation92_spill] sm:$0xff]  ;;  %v4893_v43 = vld [vmem:[#allocation105_spill] sm:$0xff] }
 0x1e5   :  { %1273 = vmatpush.bf16.msra.mxu1 %v4887_v51  ;;  %1299 = vmatpush.bf16.msra.mxu3 %v4888_v42  ;;  %v4898_v51 = vld [vmem:[#allocation110_spill] sm:$0xff] }
 0x1e7   :  { %1257 = vmatpush.bf16.msra.mxu0 %v4885_v13  ;;  %1283 = vmatpush.bf16.msra.mxu2 %v4886_v45  ;;  %v4896_v13 = vld [vmem:[#allocation108_spill] sm:$0xff]  ;;  %v4897_v45 = vld [vmem:[#allocation109_spill] sm:$0xff] }
 0x1e9   :  { %1274 = vmatpush.bf16.msra.mxu1 %v4891_v63  ;;  %1300 = vmatpush.bf16.msra.mxu3 %v4892_v15  ;;  %v4899_v15 = vld [vmem:[#allocation31_spill] sm:$0xff] }
 0x1eb   :  { %1258 = vmatpush.bf16.msra.mxu0 %v4889_v54  ;;  %1284 = vmatpush.bf16.msra.mxu2 %v4890_v32 }
 0x1ef   :  { %1259 = vmatpush.bf16.msra.mxu0 %v4893_v43  ;;  %1285 = vmatpush.bf16.msra.mxu2 %v4894_v36  ;;  %v4900_v43 = vld [vmem:[#allocation33_spill] sm:$0xff] }
 0x1f3   :  { %1260 = vmatpush.bf16.msra.mxu0 %v4895_v41  ;;  %1286 = vmatpush.bf16.msra.mxu2 %v4896_v13 }
 0x1f7   :  { %1261 = vmatpush.bf16.msra.mxu0 %v4897_v45  ;;  %1287 = vmatpush.bf16.msra.mxu2 %v4898_v51 }
 0x207   :  { %v1019_v42 = vpop.f32.mrf.mxu1 }
 0x20d   :  { %v1045_v54 = vpop.f32.mrf.mxu3 }
 0x20f   :  { %v1021_v33 = vpop.f32.mrf.mxu1 }
 0x210   :  { %v4901_v33 = vld [vmem:[#allocation35_spill] sm:$0xff] }
 0x215   :  { %v1047_v32 = vpop.f32.mrf.mxu3 }
 0x217   :  { %v1006_v6 = vpop.f32.mrf.mxu0 }
 0x218   :  { %v1007_v11 = vadd.f32 %v1006_v6, %v4899_v15 }
 0x219   :  { %v1071_v63 = vpop.f32.mrf.mxu1 }
 0x21a   :  { %v1020_v13 = vadd.f32 %v1019_v42, %v1007_v11 }
 0x21c   :  { %v1101_v50 = vmul.f32 0.5, %v1020_v13 }
 0x21d   :  { %v1032_v4 = vpop.f32.mrf.mxu2 }
 0x21e   :  { %v1033_v2 = vadd.f32 %v1032_v4, %v4900_v43 }
 0x21f   :  { %v1008_v36 = vpop.f32.mrf.mxu0  ;;  %v1097_v59 = vpop.f32.mrf.mxu3 }
 0x220   :  { %v1046_v41 = vadd.f32 %v1045_v54, %v1033_v2  ;;  %v4902_v36 = vld [vmem:[#allocation37_spill] sm:$0xff] }
 0x221   :  { %v1073_v18 = vpop.f32.mrf.mxu1 }
 0x222   :  { %v1102_v19 = vmul.f32 0.5, %v1046_v41 }
 0x224   :  { %2978 = vtanh.f32 %v1102_v19 }
 0x225   :  { %v1034_v45 = vpop.f32.mrf.mxu2  ;;  %2980 = vtanh.f32 %v1101_v50 }
 0x226   :  { %v1122_v45 = vld [vmem:[#allocation4 + $0x40] sm:$0xff] }
 0x227   :  { %v1058_v51 = vpop.f32.mrf.mxu0  ;;  %v1099_v57 = vpop.f32.mrf.mxu3 }
 0x228   :  { %v1059_v32 = vadd.f32 %v1058_v51, %v4901_v33 }
 0x229   :  { %v1148_v27 = vpop.f32.mrf.mxu1 }
 0x22a   :  { %v1072_v25 = vadd.f32 %v1071_v63, %v1059_v32  ;;  %v2979_v15 = vpop.eup %2978  ;;  %v1179_v4 = vadd.f32 %v1148_v27, %v1123_v22 }
 0x22b   :  { %v2981_v42 = vpop.eup %2980  ;;  %v1108_v11 = vmul.f32 0.5, %v2979_v15 }
 0x22c   :  { %v1103_v2 = vmul.f32 0.5, %v1072_v25  ;;  %v1183_v57 = vmul.f32 0.5, %v1179_v4  ;;  %v1107_v19 = vmul.f32 0.5, %v2981_v42  ;;  %v1124_v4 = vld [vmem:[#allocation4 + $0x50] sm:$0xff] }
 0x22d   :  { %v1084_v6 = vpop.f32.mrf.mxu2  ;;  %v1111_v51 = vadd.f32 0.5, %v1108_v11 }
 0x22e   :  { %v1085_v43 = vadd.f32 %v1084_v6, %v4902_v36  ;;  %v1110_v63 = vadd.f32 0.5, %v1107_v19 }
 0x22f   :  { %v1060_v54 = vpop.f32.mrf.mxu0  ;;  %v1174_v18 = vpop.f32.mrf.mxu3 }
 0x230   :  { %v1098_v41 = vadd.f32 %v1097_v59, %v1085_v43  ;;  %v1114_v54 = vmul.f32 %v1111_v51, %v3842_v62  ;;  %v1125_v43 = vld [vmem:[#allocation4 + $0x58] sm:$0xff] }
 0x231   :  { %v1150_v13 = vpop.f32.mrf.mxu1 }
 0x232   :  { %2982 = vtanh.f32 %v1098_v41  ;;  %v1181_v41 = vadd.f32 %v1174_v18, %v1125_v43 }
 0x233   :  { %2984 = vtanh.f32 %v1103_v2 }
 0x234   :  { %2986 = vtanh.f32 %v1183_v57 }
 0x235   :  { %v1086_v50 = vpop.f32.mrf.mxu2 }
 0x237   :  { %v1135_v32 = vpop.f32.mrf.mxu0  ;;  %v1176_v27 = vpop.f32.mrf.mxu3 }
 0x238   :  { %v2983_v22 = vpop.eup %2982  ;;  %v1178_v6 = vadd.f32 %v1135_v32, %v1122_v45 }
 0x239   :  { %v1115_v36 = vmul.f32 %v2983_v22, %v1110_v63  ;;  %v2985_v25 = vpop.eup %2984 }
 0x23a   :  { %v1182_v15 = vmul.f32 0.5, %v1178_v6  ;;  %v2987_v42 = vpop.eup %2986  ;;  %v1109_v2 = vmul.f32 0.5, %v2985_v25 }
 0x23b   :  { %v3950_v59 = vadd.f32 %v1115_v36, %v1114_v54  ;;  %v1189_v57 = vmul.f32 0.5, %v2987_v42 }
 0x23c   :  { %2988 = vtanh.f32 %v1182_v15  ;;  %v1112_v51 = vadd.f32 0.5, %v1109_v2  ;;  %v4903_v2 = vld [vmem:[#allocation53_spill] sm:$0xff] }
 0x23d   :  { %2990 = vtanh.f32 %v3950_v59  ;;  %v1161_v11 = vpop.f32.mrf.mxu2  ;;  %v1192_v63 = vadd.f32 0.5, %v1189_v57  ;;  %v4905_v57 = vld [vmem:[#allocation51_spill] sm:$0xff] }
 0x23e   :  { %v1180_v13 = vadd.f32 %v1161_v11, %v1124_v4  ;;  %2992 = vtanh.f32 %v1181_v41 }
 0x23f   :  { %v1137_v19 = vpop.f32.mrf.mxu0  ;;  %v1195_v54 = vmul.f32 %v1192_v63, %v3848_v56  ;;  %v4911_v63 = vld [vmem:[#allocation58_spill] sm:$0xff] }
 0x240   :  { %v1184_v50 = vmul.f32 0.5, %v1180_v13  ;;  %v4904_v13 = vld [vmem:[#allocation55_spill] sm:$0xff]  ;;  %v4906_v19 = vld [vmem:[#allocation52_spill] sm:$0xff] }
 0x242   :  { %v2989_v62 = vpop.eup %2988  ;;  %2994 = vtanh.f32 %v1184_v50  ;;  %v4907_v50 = vld [vmem:[#allocation54_spill] sm:$0xff] }
 0x243   :  { %v2991_v45 = vpop.eup %2990  ;;  %v1188_v32 = vmul.f32 0.5, %v2989_v62  ;;  %v4908_v62 = vld [vmem:[#allocation56_spill] sm:$0xff] }
 0x244   :  { %v1118_v36 = vmul.f32 %v2991_v45, %v1112_v51  ;;  %v2993_v18 = vpop.eup %2992  ;;  %v4909_v51 = vld [vmem:[#allocation61_spill] sm:$0xff]  ;;  %v4910_v45 = vld [vmem:[#allocation63_spill] sm:$0xff] }
 0x245   :  { %v1191_v27 = vadd.f32 0.5, %v1188_v32  ;;  %v1163_v22 = vpop.f32.mrf.mxu2  ;;  %v4912_v32 = vld [vmem:[#allocation60_spill] sm:$0xff] }
 0x246   :  { %1120 = vst [vmem:[#allocation13 + $0x8] sm:$0xff] %v1118_v36  ;;  %v1201_v6 = vpack.c.bf16 %v1118_v36, %v1118_v36  ;;  %v4913_v36 = vld [vmem:[#allocation65_spill] sm:$0xff]  ;;  %v4915_v22 = vld [vmem:[#allocation62_spill] sm:$0xff] }
 0x247   :  { %v1196_v43 = vmul.f32 %v2993_v18, %v1191_v27  ;;  %v4914_v27 = vld [vmem:[#allocation67_spill] sm:$0xff]  ;;  %v4916_v18 = vld [vmem:[#allocation64_spill] sm:$0xff] }
 0x248   :  { %1223 = vmatmul.bf16.vlgmr.msrb.gmra.mxu1 %v1201_v6  ;;  %1249 = vmatmul.bf16.vlgmr.msrb.gmra.mxu3 %v1201_v6  ;;  %v2995_v15 = vpop.eup %2994 }
 0x249   :  { %v3954_v25 = vadd.f32 %v1196_v43, %v1195_v54  ;;  %1344 = vmatpush.bf16.msrb.mxu1 %v3424_v7  ;;  %1370 = vmatpush.bf16.msrb.mxu3 %v3429_v12  ;;  %v1190_v4 = vmul.f32 0.5, %v2995_v15  ;;  %v4918_v54 = vld [vmem:[#allocation71_spill] sm:$0xff]  ;;  %v4919_v43 = vld [vmem:[#allocation66_spill] sm:$0xff]  ;;  %v4920_v15 = vld [vmem:[#allocation68_spill] sm:$0xff] }
 0x24b   :  { %2996 = vtanh.f32 %v3954_v25  ;;  %v1193_v42 = vadd.f32 0.5, %v1190_v4  ;;  %v4921_v4 = vld [vmem:[#allocation73_spill] sm:$0xff] }
 0x24d   :  { %1345 = vmatpush.bf16.msrb.mxu1 %v4842_v26  ;;  %1371 = vmatpush.bf16.msrb.mxu3 %v4843_v30 }
 0x251   :  { %v2997_v41 = vpop.eup %2996  ;;  %1346 = vmatpush.bf16.msrb.mxu1 %v4844_v49  ;;  %1372 = vmatpush.bf16.msrb.mxu3 %v4845_v61 }
 0x252   :  { %v1199_v56 = vmul.f32 %v2997_v41, %v1193_v42  ;;  %v4922_v42 = vld [vmem:[#allocation75_spill] sm:$0xff]  ;;  %v4923_v41 = vld [vmem:[#allocation76_spill] sm:$0xff] }
 0x254   :  { %v1200_v11 = vpack.c.bf16 %v1199_v56, %v1199_v56  ;;  %v4924_v56 = vld [vmem:[#allocation77_spill] sm:$0xff] }
 0x255   :  { %1347 = vmatpush.bf16.msrb.mxu1 %v4846_v9  ;;  %1373 = vmatpush.bf16.msrb.mxu3 %v4847_v0 }
 0x256   :  { %1210 = vmatmul.bf16.vlgmr.msrb.gmra.mxu0 %v1200_v11  ;;  %1236 = vmatmul.bf16.vlgmr.msrb.gmra.mxu2 %v1200_v11 }
 0x257   :  { %1331 = vmatpush.bf16.msrb.mxu0 %v3422_v3  ;;  %1357 = vmatpush.bf16.msrb.mxu2 %v3426_v8 }
 0x258   :  { %1275 = vmatmul.bf16.vlgmr.msra.gmra.mxu1 %v1201_v6  ;;  %1301 = vmatmul.bf16.vlgmr.msra.gmra.mxu3 %v1201_v6  ;;  %v4917_v6 = vld [vmem:[#allocation69_spill] sm:$0xff] }
 0x259   :  { %1348 = vmatpush.bf16.msrb.mxu1 %v4848_v5  ;;  %1374 = vmatpush.bf16.msrb.mxu3 %v4849_v39 }
 0x25b   :  { %1332 = vmatpush.bf16.msrb.mxu0 %v3433_v16  ;;  %1358 = vmatpush.bf16.msrb.mxu2 %v3438_v21 }
 0x25d   :  { %1349 = vmatpush.bf16.msrb.mxu1 %v4850_v24  ;;  %1375 = vmatpush.bf16.msrb.mxu3 %v4851_v23 }
 0x25f   :  { %1333 = vmatpush.bf16.msrb.mxu0 %v3443_v29  ;;  %1359 = vmatpush.bf16.msrb.mxu2 %v3449_v34 }
 0x261   :  { %1350 = vmatpush.bf16.msrb.mxu1 %v4852_v60  ;;  %1376 = vmatpush.bf16.msrb.mxu3 %v4853_v55 }
 0x263   :  { %1334 = vmatpush.bf16.msrb.mxu0 %v3455_v44  ;;  %1360 = vmatpush.bf16.msrb.mxu2 %v3461_v46 }
 0x265   :  { %1351 = vmatpush.bf16.msrb.mxu1 %v4854_v14  ;;  %1377 = vmatpush.bf16.msrb.mxu3 %v4855_v35 }
 0x266   :  { %1262 = vmatmul.bf16.vlgmr.msra.gmra.mxu0 %v1200_v11  ;;  %1288 = vmatmul.bf16.vlgmr.msra.gmra.mxu2 %v1200_v11 }
 0x267   :  { %1335 = vmatpush.bf16.msrb.mxu0 %v4815_v38  ;;  %1361 = vmatpush.bf16.msrb.mxu2 %v4816_v31 }
 0x268   :  { %1352 = vmatmul.bf16.vlgmr.msrb.gmra.mxu1 %v1200_v11  ;;  %1378 = vmatmul.bf16.vlgmr.msrb.gmra.mxu3 %v1200_v11 }
 0x269   :  { %1420 = vmatpush.bf16.msra.mxu1 %v4856_v53  ;;  %1446 = vmatpush.bf16.msra.mxu3 %v4857_v28 }
 0x26b   :  { %1336 = vmatpush.bf16.msrb.mxu0 %v4818_v52  ;;  %1362 = vmatpush.bf16.msrb.mxu2 %v4819_v58 }
 0x26d   :  { %1421 = vmatpush.bf16.msra.mxu1 %v4858_v1  ;;  %1447 = vmatpush.bf16.msra.mxu3 %v4859_v37 }
 0x26f   :  { %1337 = vmatpush.bf16.msrb.mxu0 %v4820_v20  ;;  %1363 = vmatpush.bf16.msrb.mxu2 %v4821_v40 }
 0x271   :  { %1422 = vmatpush.bf16.msra.mxu1 %v4903_v2  ;;  %1448 = vmatpush.bf16.msra.mxu3 %v4904_v13 }
 0x273   :  { %1338 = vmatpush.bf16.msrb.mxu0 %v4822_v48  ;;  %1364 = vmatpush.bf16.msrb.mxu2 %v4823_v47 }
 0x275   :  { %1423 = vmatpush.bf16.msra.mxu1 %v4862_v10  ;;  %1449 = vmatpush.bf16.msra.mxu3 %v4863_v17 }
 0x276   :  { %1339 = vmatmul.bf16.vlgmr.msrb.gmra.mxu0 %v1200_v11  ;;  %1365 = vmatmul.bf16.vlgmr.msrb.gmra.mxu2 %v1200_v11  ;;  %v4925_v11 = vld [vmem:[#allocation70_spill] sm:$0xff] }
 0x277   :  { %1407 = vmatpush.bf16.msra.mxu0 %v4905_v57  ;;  %1433 = vmatpush.bf16.msra.mxu2 %v4906_v19  ;;  %v1328_v19 = vld [vmem:[#allocation4 + $0x68] sm:$0xff] }
 0x279   :  { %1424 = vmatpush.bf16.msra.mxu1 %v4909_v51  ;;  %1450 = vmatpush.bf16.msra.mxu3 %v4910_v45 }
 0x27b   :  { %1408 = vmatpush.bf16.msra.mxu0 %v4907_v50  ;;  %1434 = vmatpush.bf16.msra.mxu2 %v4908_v62 }
 0x27d   :  { %1425 = vmatpush.bf16.msra.mxu1 %v4913_v36  ;;  %1451 = vmatpush.bf16.msra.mxu3 %v4914_v27 }
 0x27f   :  { %1409 = vmatpush.bf16.msra.mxu0 %v4911_v63  ;;  %1435 = vmatpush.bf16.msra.mxu2 %v4912_v32 }
 0x281   :  { %1426 = vmatpush.bf16.msra.mxu1 %v4917_v6  ;;  %1452 = vmatpush.bf16.msra.mxu3 %v4918_v54  ;;  %v4928_v6 = vld [vmem:[#allocation80_spill] sm:$0xff]  ;;  %v4929_v54 = vld [vmem:[#allocation74_spill] sm:$0xff] }
 0x283   :  { %1410 = vmatpush.bf16.msra.mxu0 %v4915_v22  ;;  %1436 = vmatpush.bf16.msra.mxu2 %v4916_v18  ;;  %v4926_v22 = vld [vmem:[#allocation72_spill] sm:$0xff]  ;;  %v4927_v18 = vld [vmem:[#allocation79_spill] sm:$0xff] }
 0x285   :  { %1427 = vmatpush.bf16.msra.mxu1 %v4921_v4  ;;  %1453 = vmatpush.bf16.msra.mxu3 %v4922_v42  ;;  %v4932_v4 = vld [vmem:[#allocation82_spill] sm:$0xff]  ;;  %v4933_v42 = vld [vmem:[#allocation93_spill] sm:$0xff] }
 0x287   :  { %1411 = vmatpush.bf16.msra.mxu0 %v4919_v43  ;;  %1437 = vmatpush.bf16.msra.mxu2 %v4920_v15  ;;  %v4930_v43 = vld [vmem:[#allocation78_spill] sm:$0xff]  ;;  %v4931_v15 = vld [vmem:[#allocation81_spill] sm:$0xff] }
 0x289   :  { %1472 = vmatpush.bf16.msrb.mxu1 %v4923_v41  ;;  %1498 = vmatpush.bf16.msrb.mxu3 %v4924_v56  ;;  %v4934_v41 = vld [vmem:[#allocation94_spill] sm:$0xff]  ;;  %v4935_v56 = vld [vmem:[#allocation95_spill] sm:$0xff] }
 0x28b   :  { %1412 = vmatpush.bf16.msra.mxu0 %v4925_v11  ;;  %1438 = vmatpush.bf16.msra.mxu2 %v4926_v22  ;;  %v4936_v11 = vld [vmem:[#allocation96_spill] sm:$0xff]  ;;  %v4937_v22 = vld [vmem:[#allocation83_spill] sm:$0xff] }
 0x28d   :  { %1473 = vmatpush.bf16.msrb.mxu1 %v4927_v18  ;;  %1499 = vmatpush.bf16.msrb.mxu3 %v4928_v6  ;;  %v4938_v18 = vld [vmem:[#allocation84_spill] sm:$0xff]  ;;  %v4939_v6 = vld [vmem:[#allocation97_spill] sm:$0xff] }
 0x28f   :  { %1413 = vmatpush.bf16.msra.mxu0 %v4929_v54  ;;  %1439 = vmatpush.bf16.msra.mxu2 %v4930_v43  ;;  %v4940_v54 = vld [vmem:[#allocation98_spill] sm:$0xff]  ;;  %v4941_v43 = vld [vmem:[#allocation85_spill] sm:$0xff] }
 0x291   :  { %1474 = vmatpush.bf16.msrb.mxu1 %v4931_v15  ;;  %1500 = vmatpush.bf16.msrb.mxu3 %v4932_v4  ;;  %v4942_v15 = vld [vmem:[#allocation86_spill] sm:$0xff]  ;;  %v4943_v4 = vld [vmem:[#allocation99_spill] sm:$0xff] }
 0x293   :  { %1414 = vmatpush.bf16.msra.mxu0 %v4933_v42  ;;  %1440 = vmatpush.bf16.msra.mxu2 %v4934_v41  ;;  %v4944_v42 = vld [vmem:[#allocation100_spill] sm:$0xff]  ;;  %v4945_v41 = vld [vmem:[#allocation87_spill] sm:$0xff] }
 0x295   :  { %1475 = vmatpush.bf16.msrb.mxu1 %v4937_v22  ;;  %1501 = vmatpush.bf16.msrb.mxu3 %v4938_v18  ;;  %v4948_v22 = vld [vmem:[#allocation102_spill] sm:$0xff]  ;;  %v4949_v18 = vld [vmem:[#allocation89_spill] sm:$0xff] }
 0x297   :  { %1459 = vmatpush.bf16.msrb.mxu0 %v4935_v56  ;;  %1485 = vmatpush.bf16.msrb.mxu2 %v4936_v11  ;;  %v4946_v56 = vld [vmem:[#allocation88_spill] sm:$0xff]  ;;  %v4947_v11 = vld [vmem:[#allocation101_spill] sm:$0xff] }
 0x299   :  { %1476 = vmatpush.bf16.msrb.mxu1 %v4941_v43  ;;  %1502 = vmatpush.bf16.msrb.mxu3 %v4942_v15  ;;  %v4952_v43 = vld [vmem:[#allocation104_spill] sm:$0xff]  ;;  %v4953_v15 = vld [vmem:[#allocation91_spill] sm:$0xff] }
 0x29b   :  { %1460 = vmatpush.bf16.msrb.mxu0 %v4939_v6  ;;  %1486 = vmatpush.bf16.msrb.mxu2 %v4940_v54  ;;  %v4950_v6 = vld [vmem:[#allocation90_spill] sm:$0xff]  ;;  %v4951_v54 = vld [vmem:[#allocation103_spill] sm:$0xff] }
 0x29d   :  { %1477 = vmatpush.bf16.msrb.mxu1 %v4945_v41  ;;  %1503 = vmatpush.bf16.msrb.mxu3 %v4946_v56  ;;  %v4956_v41 = vld [vmem:[#allocation106_spill] sm:$0xff]  ;;  %v4957_v56 = vld [vmem:[#allocation107_spill] sm:$0xff] }
 0x29f   :  { %1461 = vmatpush.bf16.msrb.mxu0 %v4943_v4  ;;  %1487 = vmatpush.bf16.msrb.mxu2 %v4944_v42  ;;  %v4954_v4 = vld [vmem:[#allocation92_spill] sm:$0xff]  ;;  %v4955_v42 = vld [vmem:[#allocation105_spill] sm:$0xff] }
 0x2a1   :  { %1478 = vmatpush.bf16.msrb.mxu1 %v4949_v18  ;;  %1504 = vmatpush.bf16.msrb.mxu3 %v4950_v6  ;;  %v4960_v18 = vld [vmem:[#allocation110_spill] sm:$0xff] }
 0x2a3   :  { %1462 = vmatpush.bf16.msrb.mxu0 %v4947_v11  ;;  %1488 = vmatpush.bf16.msrb.mxu2 %v4948_v22  ;;  %v4958_v11 = vld [vmem:[#allocation108_spill] sm:$0xff]  ;;  %v4959_v22 = vld [vmem:[#allocation109_spill] sm:$0xff] }
 0x2a5   :  { %1479 = vmatpush.bf16.msrb.mxu1 %v4953_v15  ;;  %1505 = vmatpush.bf16.msrb.mxu3 %v4954_v4  ;;  %v4961_v4 = vld [vmem:[#allocation31_spill] sm:$0xff] }
 0x2a7   :  { %1463 = vmatpush.bf16.msrb.mxu0 %v4951_v54  ;;  %1489 = vmatpush.bf16.msrb.mxu2 %v4952_v43 }
 0x2ab   :  { %1464 = vmatpush.bf16.msrb.mxu0 %v4955_v42  ;;  %1490 = vmatpush.bf16.msrb.mxu2 %v4956_v41  ;;  %v4962_v42 = vld [vmem:[#allocation33_spill] sm:$0xff] }
 0x2af   :  { %1465 = vmatpush.bf16.msrb.mxu0 %v4957_v56  ;;  %1491 = vmatpush.bf16.msrb.mxu2 %v4958_v11 }
 0x2b3   :  { %1466 = vmatpush.bf16.msrb.mxu0 %v4959_v22  ;;  %1492 = vmatpush.bf16.msrb.mxu2 %v4960_v18 }
 0x2c5   :  { %v1224_v6 = vpop.f32.mrf.mxu1 }
 0x2cb   :  { %v1250_v54 = vpop.f32.mrf.mxu3 }
 0x2cd   :  { %v1226_v27 = vpop.f32.mrf.mxu1 }
 0x2d3   :  { %v1211_v43 = vpop.f32.mrf.mxu0  ;;  %v1252_v36 = vpop.f32.mrf.mxu3 }
 0x2d4   :  { %v1212_v63 = vadd.f32 %v1211_v43, %v4961_v4 }
 0x2d5   :  { %v1276_v15 = vpop.f32.mrf.mxu1 }
 0x2d6   :  { %v1225_v11 = vadd.f32 %v1224_v6, %v1212_v63 }
 0x2d8   :  { %v1306_v17 = vmul.f32 0.5, %v1225_v11  ;;  %v1327_v11 = vld [vmem:[#allocation4 + $0x60] sm:$0xff] }
 0x2d9   :  { %v1237_v32 = vpop.f32.mrf.mxu2 }
 0x2da   :  { %v1238_v45 = vadd.f32 %v1237_v32, %v4962_v42 }
 0x2db   :  { %v1213_v41 = vpop.f32.mrf.mxu0  ;;  %v1302_v51 = vpop.f32.mrf.mxu3 }
 0x2dc   :  { %v1251_v56 = vadd.f32 %v1250_v54, %v1238_v45  ;;  %v4963_v41 = vld [vmem:[#allocation37_spill] sm:$0xff] }
 0x2dd   :  { %v1278_v62 = vpop.f32.mrf.mxu1 }
 0x2de   :  { %v1307_v50 = vmul.f32 0.5, %v1251_v56 }
 0x2e0   :  { %2998 = vtanh.f32 %v1307_v50 }
 0x2e1   :  { %v1239_v22 = vpop.f32.mrf.mxu2  ;;  %3000 = vtanh.f32 %v1306_v17 }
 0x2e3   :  { %v1263_v18 = vpop.f32.mrf.mxu0  ;;  %v1304_v10 = vpop.f32.mrf.mxu3 }
 0x2e4   :  { %v1264_v27 = vadd.f32 %v1263_v18, %v4901_v33 }
 0x2e5   :  { %v1353_v36 = vpop.f32.mrf.mxu1 }
 0x2e6   :  { %v1277_v57 = vadd.f32 %v1276_v15, %v1264_v27  ;;  %v2999_v4 = vpop.eup %2998  ;;  %v1384_v32 = vadd.f32 %v1353_v36, %v1328_v19 }
 0x2e7   :  { %v3001_v63 = vpop.eup %3000  ;;  %v1313_v22 = vmul.f32 0.5, %v2999_v4 }
 0x2e8   :  { %v1308_v54 = vmul.f32 0.5, %v1277_v57  ;;  %v1388_v10 = vmul.f32 0.5, %v1384_v32  ;;  %v1312_v50 = vmul.f32 0.5, %v3001_v63  ;;  %v1329_v32 = vld [vmem:[#allocation4 + $0x70] sm:$0xff] }
 0x2e9   :  { %v1289_v43 = vpop.f32.mrf.mxu2  ;;  %v1316_v18 = vadd.f32 0.5, %v1313_v22 }
 0x2ea   :  { %v1290_v42 = vadd.f32 %v1289_v43, %v4963_v41  ;;  %v1315_v15 = vadd.f32 0.5, %v1312_v50 }
 0x2eb   :  { %v1265_v45 = vpop.f32.mrf.mxu0  ;;  %v1379_v62 = vpop.f32.mrf.mxu3 }
 0x2ec   :  { %v1303_v6 = vadd.f32 %v1302_v51, %v1290_v42  ;;  %v1319_v45 = vmul.f32 %v1316_v18, %v3950_v59  ;;  %v1330_v51 = vld [vmem:[#allocation4 + $0x78] sm:$0xff] }
 0x2ed   :  { %v1355_v56 = vpop.f32.mrf.mxu1 }
 0x2ee   :  { %3002 = vtanh.f32 %v1303_v6  ;;  %v1386_v6 = vadd.f32 %v1379_v62, %v1330_v51 }
 0x2ef   :  { %3004 = vtanh.f32 %v1308_v54 }
 0x2f0   :  { %3006 = vtanh.f32 %v1388_v10 }
 0x2f1   :  { %v1291_v17 = vpop.f32.mrf.mxu2 }
 0x2f3   :  { %v1340_v27 = vpop.f32.mrf.mxu0  ;;  %v1381_v19 = vpop.f32.mrf.mxu3 }
 0x2f4   :  { %v3003_v36 = vpop.eup %3002  ;;  %v1383_v43 = vadd.f32 %v1340_v27, %v1327_v11 }
 0x2f5   :  { %v1320_v41 = vmul.f32 %v3003_v36, %v1315_v15  ;;  %v3005_v57 = vpop.eup %3004 }
 0x2f6   :  { %v1387_v4 = vmul.f32 0.5, %v1383_v43  ;;  %v3007_v63 = vpop.eup %3006  ;;  %v1314_v54 = vmul.f32 0.5, %v3005_v57 }
 0x2f7   :  { %v4058_v42 = vadd.f32 %v1320_v41, %v1319_v45  ;;  %v1394_v10 = vmul.f32 0.5, %v3007_v63 }
 0x2f8   :  { %3008 = vtanh.f32 %v1387_v4  ;;  %v1317_v18 = vadd.f32 0.5, %v1314_v54  ;;  %v4964_v54 = vld [vmem:[#allocation51_spill] sm:$0xff] }
 0x2f9   :  { %3010 = vtanh.f32 %v4058_v42  ;;  %v1366_v22 = vpop.f32.mrf.mxu2  ;;  %v1397_v15 = vadd.f32 0.5, %v1394_v10  ;;  %v4966_v10 = vld [vmem:[#allocation57_spill] sm:$0xff] }
 0x2fa   :  { %v1385_v56 = vadd.f32 %v1366_v22, %v1329_v32  ;;  %3012 = vtanh.f32 %v1386_v6 }
 0x2fb   :  { %v1342_v50 = vpop.f32.mrf.mxu0  ;;  %v1400_v45 = vmul.f32 %v1397_v15, %v3954_v25  ;;  %v4972_v15 = vld [vmem:[#allocation58_spill] sm:$0xff] }
 0x2fc   :  { %v1389_v17 = vmul.f32 0.5, %v1385_v56  ;;  %v4965_v56 = vld [vmem:[#allocation52_spill] sm:$0xff]  ;;  %v4967_v50 = vld [vmem:[#allocation59_spill] sm:$0xff] }
 0x2fe   :  { %v3009_v59 = vpop.eup %3008  ;;  %3014 = vtanh.f32 %v1389_v17  ;;  %v4968_v17 = vld [vmem:[#allocation54_spill] sm:$0xff] }
 0x2ff   :  { %v3011_v11 = vpop.eup %3010  ;;  %v1393_v27 = vmul.f32 0.5, %v3009_v59  ;;  %v4969_v59 = vld [vmem:[#allocation56_spill] sm:$0xff] }
 0x300   :  { %v1323_v41 = vmul.f32 %v3011_v11, %v1317_v18  ;;  %v3013_v62 = vpop.eup %3012  ;;  %v4970_v18 = vld [vmem:[#allocation61_spill] sm:$0xff]  ;;  %v4971_v11 = vld [vmem:[#allocation63_spill] sm:$0xff] }
 0x301   :  { %v1396_v19 = vadd.f32 0.5, %v1393_v27  ;;  %v1368_v36 = vpop.f32.mrf.mxu2  ;;  %v4973_v27 = vld [vmem:[#allocation60_spill] sm:$0xff] }
 0x302   :  { %1325 = vst [vmem:[#allocation13 + $0x10] sm:$0xff] %v1323_v41  ;;  %v1406_v43 = vpack.c.bf16 %v1323_v41, %v1323_v41  ;;  %v4974_v41 = vld [vmem:[#allocation65_spill] sm:$0xff]  ;;  %v4976_v36 = vld [vmem:[#allocation62_spill] sm:$0xff] }
 0x303   :  { %v1401_v51 = vmul.f32 %v3013_v62, %v1396_v19  ;;  %v4975_v19 = vld [vmem:[#allocation67_spill] sm:$0xff]  ;;  %v4977_v62 = vld [vmem:[#allocation64_spill] sm:$0xff] }
 0x304   :  { %1428 = vmatmul.bf16.vlgmr.msra.gmra.mxu1 %v1406_v43  ;;  %1454 = vmatmul.bf16.vlgmr.msra.gmra.mxu3 %v1406_v43  ;;  %v3015_v4 = vpop.eup %3014 }
 0x305   :  { %v4062_v57 = vadd.f32 %v1401_v51, %v1400_v45  ;;  %1549 = vmatpush.bf16.msra.mxu1 %v3424_v7  ;;  %1575 = vmatpush.bf16.msra.mxu3 %v3429_v12  ;;  %v1395_v32 = vmul.f32 0.5, %v3015_v4  ;;  %v4979_v45 = vld [vmem:[#allocation71_spill] sm:$0xff]  ;;  %v4980_v51 = vld [vmem:[#allocation66_spill] sm:$0xff]  ;;  %v4981_v4 = vld [vmem:[#allocation68_spill] sm:$0xff] }
 0x307   :  { %3016 = vtanh.f32 %v4062_v57  ;;  %v1398_v63 = vadd.f32 0.5, %v1395_v32  ;;  %v4982_v32 = vld [vmem:[#allocation73_spill] sm:$0xff] }
 0x309   :  { %1550 = vmatpush.bf16.msra.mxu1 %v4842_v26  ;;  %1576 = vmatpush.bf16.msra.mxu3 %v4843_v30 }
 0x30d   :  { %v3017_v6 = vpop.eup %3016  ;;  %1551 = vmatpush.bf16.msra.mxu1 %v4844_v49  ;;  %1577 = vmatpush.bf16.msra.mxu3 %v4845_v61 }
 0x30e   :  { %v1404_v25 = vmul.f32 %v3017_v6, %v1398_v63  ;;  %v4983_v63 = vld [vmem:[#allocation75_spill] sm:$0xff]  ;;  %v4984_v6 = vld [vmem:[#allocation76_spill] sm:$0xff] }
 0x310   :  { %v1405_v22 = vpack.c.bf16 %v1404_v25, %v1404_v25  ;;  %v4985_v25 = vld [vmem:[#allocation77_spill] sm:$0xff] }
 0x311   :  { %1552 = vmatpush.bf16.msra.mxu1 %v4846_v9  ;;  %1578 = vmatpush.bf16.msra.mxu3 %v4847_v0 }
 0x312   :  { %1415 = vmatmul.bf16.vlgmr.msra.gmra.mxu0 %v1405_v22  ;;  %1441 = vmatmul.bf16.vlgmr.msra.gmra.mxu2 %v1405_v22 }
 0x313   :  { %1536 = vmatpush.bf16.msra.mxu0 %v3422_v3  ;;  %1562 = vmatpush.bf16.msra.mxu2 %v3426_v8 }
 0x314   :  { %1480 = vmatmul.bf16.vlgmr.msrb.gmra.mxu1 %v1406_v43  ;;  %1506 = vmatmul.bf16.vlgmr.msrb.gmra.mxu3 %v1406_v43  ;;  %v4978_v43 = vld [vmem:[#allocation69_spill] sm:$0xff] }
 0x315   :  { %1553 = vmatpush.bf16.msra.mxu1 %v4848_v5  ;;  %1579 = vmatpush.bf16.msra.mxu3 %v4849_v39 }
 0x317   :  { %1537 = vmatpush.bf16.msra.mxu0 %v3433_v16  ;;  %1563 = vmatpush.bf16.msra.mxu2 %v3438_v21 }
 0x319   :  { %1554 = vmatpush.bf16.msra.mxu1 %v4850_v24  ;;  %1580 = vmatpush.bf16.msra.mxu3 %v4851_v23 }
 0x31b   :  { %1538 = vmatpush.bf16.msra.mxu0 %v3443_v29  ;;  %1564 = vmatpush.bf16.msra.mxu2 %v3449_v34 }
 0x31d   :  { %1555 = vmatpush.bf16.msra.mxu1 %v4852_v60  ;;  %1581 = vmatpush.bf16.msra.mxu3 %v4853_v55 }
 0x31f   :  { %1539 = vmatpush.bf16.msra.mxu0 %v3455_v44  ;;  %1565 = vmatpush.bf16.msra.mxu2 %v3461_v46 }
 0x321   :  { %1556 = vmatpush.bf16.msra.mxu1 %v4854_v14  ;;  %1582 = vmatpush.bf16.msra.mxu3 %v4855_v35 }
 0x322   :  { %1467 = vmatmul.bf16.vlgmr.msrb.gmra.mxu0 %v1405_v22  ;;  %1493 = vmatmul.bf16.vlgmr.msrb.gmra.mxu2 %v1405_v22 }
 0x323   :  { %1540 = vmatpush.bf16.msra.mxu0 %v4815_v38  ;;  %1566 = vmatpush.bf16.msra.mxu2 %v4816_v31 }
 0x324   :  { %1557 = vmatmul.bf16.vlgmr.msra.gmra.mxu1 %v1405_v22  ;;  %1583 = vmatmul.bf16.vlgmr.msra.gmra.mxu3 %v1405_v22 }
 0x325   :  { %1625 = vmatpush.bf16.msrb.mxu1 %v4856_v53  ;;  %1651 = vmatpush.bf16.msrb.mxu3 %v4857_v28 }
 0x327   :  { %1541 = vmatpush.bf16.msra.mxu0 %v4818_v52  ;;  %1567 = vmatpush.bf16.msra.mxu2 %v4819_v58 }
 0x329   :  { %1626 = vmatpush.bf16.msrb.mxu1 %v4858_v1  ;;  %1652 = vmatpush.bf16.msrb.mxu3 %v4859_v37 }
 0x32b   :  { %1542 = vmatpush.bf16.msra.mxu0 %v4820_v20  ;;  %1568 = vmatpush.bf16.msra.mxu2 %v4821_v40 }
 0x32d   :  { %1627 = vmatpush.bf16.msrb.mxu1 %v4903_v2  ;;  %1653 = vmatpush.bf16.msrb.mxu3 %v4904_v13 }
 0x32f   :  { %1543 = vmatpush.bf16.msra.mxu0 %v4822_v48  ;;  %1569 = vmatpush.bf16.msra.mxu2 %v4823_v47 }
 0x331   :  { %1628 = vmatpush.bf16.msrb.mxu1 %v4966_v10  ;;  %1654 = vmatpush.bf16.msrb.mxu3 %v4967_v50 }
 0x332   :  { %1544 = vmatmul.bf16.vlgmr.msra.gmra.mxu0 %v1405_v22  ;;  %1570 = vmatmul.bf16.vlgmr.msra.gmra.mxu2 %v1405_v22  ;;  %v4986_v22 = vld [vmem:[#allocation70_spill] sm:$0xff] }
 0x333   :  { %1612 = vmatpush.bf16.msrb.mxu0 %v4964_v54  ;;  %1638 = vmatpush.bf16.msrb.mxu2 %v4965_v56  ;;  %v1533_v56 = vld [vmem:[#allocation4 + $0x88] sm:$0xff] }
 0x335   :  { %1629 = vmatpush.bf16.msrb.mxu1 %v4970_v18  ;;  %1655 = vmatpush.bf16.msrb.mxu3 %v4971_v11 }
 0x337   :  { %1613 = vmatpush.bf16.msrb.mxu0 %v4968_v17  ;;  %1639 = vmatpush.bf16.msrb.mxu2 %v4969_v59 }
 0x339   :  { %1630 = vmatpush.bf16.msrb.mxu1 %v4974_v41  ;;  %1656 = vmatpush.bf16.msrb.mxu3 %v4975_v19 }
 0x33b   :  { %1614 = vmatpush.bf16.msrb.mxu0 %v4972_v15  ;;  %1640 = vmatpush.bf16.msrb.mxu2 %v4973_v27 }
 0x33d   :  { %1631 = vmatpush.bf16.msrb.mxu1 %v4978_v43  ;;  %1657 = vmatpush.bf16.msrb.mxu3 %v4979_v45  ;;  %v4989_v43 = vld [vmem:[#allocation80_spill] sm:$0xff]  ;;  %v4990_v45 = vld [vmem:[#allocation74_spill] sm:$0xff] }
 0x33f   :  { %1615 = vmatpush.bf16.msrb.mxu0 %v4976_v36  ;;  %1641 = vmatpush.bf16.msrb.mxu2 %v4977_v62  ;;  %v4987_v36 = vld [vmem:[#allocation72_spill] sm:$0xff]  ;;  %v4988_v62 = vld [vmem:[#allocation79_spill] sm:$0xff] }
 0x341   :  { %1632 = vmatpush.bf16.msrb.mxu1 %v4982_v32  ;;  %1658 = vmatpush.bf16.msrb.mxu3 %v4983_v63  ;;  %v4993_v32 = vld [vmem:[#allocation82_spill] sm:$0xff]  ;;  %v4994_v63 = vld [vmem:[#allocation93_spill] sm:$0xff] }
 0x343   :  { %1616 = vmatpush.bf16.msrb.mxu0 %v4980_v51  ;;  %1642 = vmatpush.bf16.msrb.mxu2 %v4981_v4  ;;  %v4991_v51 = vld [vmem:[#allocation78_spill] sm:$0xff]  ;;  %v4992_v4 = vld [vmem:[#allocation81_spill] sm:$0xff] }
 0x345   :  { %1677 = vmatpush.bf16.msra.mxu1 %v4984_v6  ;;  %1703 = vmatpush.bf16.msra.mxu3 %v4985_v25  ;;  %v4995_v6 = vld [vmem:[#allocation94_spill] sm:$0xff]  ;;  %v4996_v25 = vld [vmem:[#allocation95_spill] sm:$0xff] }
 0x347   :  { %1617 = vmatpush.bf16.msrb.mxu0 %v4986_v22  ;;  %1643 = vmatpush.bf16.msrb.mxu2 %v4987_v36  ;;  %v4997_v22 = vld [vmem:[#allocation96_spill] sm:$0xff]  ;;  %v4998_v36 = vld [vmem:[#allocation83_spill] sm:$0xff] }
 0x349   :  { %1678 = vmatpush.bf16.msra.mxu1 %v4988_v62  ;;  %1704 = vmatpush.bf16.msra.mxu3 %v4989_v43  ;;  %v4999_v62 = vld [vmem:[#allocation84_spill] sm:$0xff]  ;;  %v5000_v43 = vld [vmem:[#allocation97_spill] sm:$0xff] }
 0x34b   :  { %1618 = vmatpush.bf16.msrb.mxu0 %v4990_v45  ;;  %1644 = vmatpush.bf16.msrb.mxu2 %v4991_v51  ;;  %v5001_v45 = vld [vmem:[#allocation98_spill] sm:$0xff]  ;;  %v5002_v51 = vld [vmem:[#allocation85_spill] sm:$0xff] }
 0x34d   :  { %1679 = vmatpush.bf16.msra.mxu1 %v4992_v4  ;;  %1705 = vmatpush.bf16.msra.mxu3 %v4993_v32  ;;  %v5003_v4 = vld [vmem:[#allocation86_spill] sm:$0xff]  ;;  %v5004_v32 = vld [vmem:[#allocation99_spill] sm:$0xff] }
 0x34f   :  { %1619 = vmatpush.bf16.msrb.mxu0 %v4994_v63  ;;  %1645 = vmatpush.bf16.msrb.mxu2 %v4995_v6  ;;  %v5005_v63 = vld [vmem:[#allocation100_spill] sm:$0xff]  ;;  %v5006_v6 = vld [vmem:[#allocation87_spill] sm:$0xff] }
 0x351   :  { %1680 = vmatpush.bf16.msra.mxu1 %v4998_v36  ;;  %1706 = vmatpush.bf16.msra.mxu3 %v4999_v62  ;;  %v5009_v36 = vld [vmem:[#allocation102_spill] sm:$0xff]  ;;  %v5010_v62 = vld [vmem:[#allocation89_spill] sm:$0xff] }
 0x353   :  { %1664 = vmatpush.bf16.msra.mxu0 %v4996_v25  ;;  %1690 = vmatpush.bf16.msra.mxu2 %v4997_v22  ;;  %v5007_v25 = vld [vmem:[#allocation88_spill] sm:$0xff]  ;;  %v5008_v22 = vld [vmem:[#allocation101_spill] sm:$0xff] }
 0x355   :  { %1681 = vmatpush.bf16.msra.mxu1 %v5002_v51  ;;  %1707 = vmatpush.bf16.msra.mxu3 %v5003_v4  ;;  %v5013_v51 = vld [vmem:[#allocation104_spill] sm:$0xff]  ;;  %v5014_v4 = vld [vmem:[#allocation91_spill] sm:$0xff] }
 0x357   :  { %1665 = vmatpush.bf16.msra.mxu0 %v5000_v43  ;;  %1691 = vmatpush.bf16.msra.mxu2 %v5001_v45  ;;  %v5011_v43 = vld [vmem:[#allocation90_spill] sm:$0xff]  ;;  %v5012_v45 = vld [vmem:[#allocation103_spill] sm:$0xff] }
 0x359   :  { %1682 = vmatpush.bf16.msra.mxu1 %v5006_v6  ;;  %1708 = vmatpush.bf16.msra.mxu3 %v5007_v25  ;;  %v5017_v6 = vld [vmem:[#allocation106_spill] sm:$0xff]  ;;  %v5018_v25 = vld [vmem:[#allocation107_spill] sm:$0xff] }
 0x35b   :  { %1666 = vmatpush.bf16.msra.mxu0 %v5004_v32  ;;  %1692 = vmatpush.bf16.msra.mxu2 %v5005_v63  ;;  %v5015_v32 = vld [vmem:[#allocation92_spill] sm:$0xff]  ;;  %v5016_v63 = vld [vmem:[#allocation105_spill] sm:$0xff] }
 0x35d   :  { %1683 = vmatpush.bf16.msra.mxu1 %v5010_v62  ;;  %1709 = vmatpush.bf16.msra.mxu3 %v5011_v43  ;;  %v5021_v62 = vld [vmem:[#allocation110_spill] sm:$0xff] }
 0x35f   :  { %1667 = vmatpush.bf16.msra.mxu0 %v5008_v22  ;;  %1693 = vmatpush.bf16.msra.mxu2 %v5009_v36  ;;  %v5019_v22 = vld [vmem:[#allocation108_spill] sm:$0xff]  ;;  %v5020_v36 = vld [vmem:[#allocation109_spill] sm:$0xff] }
 0x361   :  { %1684 = vmatpush.bf16.msra.mxu1 %v5014_v4  ;;  %1710 = vmatpush.bf16.msra.mxu3 %v5015_v32  ;;  %v5022_v32 = vld [vmem:[#allocation31_spill] sm:$0xff] }
 0x363   :  { %1668 = vmatpush.bf16.msra.mxu0 %v5012_v45  ;;  %1694 = vmatpush.bf16.msra.mxu2 %v5013_v51 }
 0x367   :  { %1669 = vmatpush.bf16.msra.mxu0 %v5016_v63  ;;  %1695 = vmatpush.bf16.msra.mxu2 %v5017_v6  ;;  %v5023_v63 = vld [vmem:[#allocation33_spill] sm:$0xff] }
 0x36b   :  { %1670 = vmatpush.bf16.msra.mxu0 %v5018_v25  ;;  %1696 = vmatpush.bf16.msra.mxu2 %v5019_v22 }
 0x36f   :  { %1671 = vmatpush.bf16.msra.mxu0 %v5020_v36  ;;  %1697 = vmatpush.bf16.msra.mxu2 %v5021_v62 }
 0x381   :  { %v1429_v43 = vpop.f32.mrf.mxu1 }
 0x387   :  { %v1455_v45 = vpop.f32.mrf.mxu3 }
 0x389   :  { %v1431_v19 = vpop.f32.mrf.mxu1 }
 0x38f   :  { %v1416_v51 = vpop.f32.mrf.mxu0  ;;  %v1457_v41 = vpop.f32.mrf.mxu3 }
 0x390   :  { %v1417_v15 = vadd.f32 %v1416_v51, %v5022_v32 }
 0x391   :  { %v1481_v4 = vpop.f32.mrf.mxu1 }
 0x392   :  { %v1430_v22 = vadd.f32 %v1429_v43, %v1417_v15 }
 0x394   :  { %v1511_v50 = vmul.f32 0.5, %v1430_v22  ;;  %v1532_v22 = vld [vmem:[#allocation4 + $0x80] sm:$0xff] }
 0x395   :  { %v1442_v27 = vpop.f32.mrf.mxu2 }
 0x396   :  { %v1443_v11 = vadd.f32 %v1442_v27, %v5023_v63 }
 0x397   :  { %v1418_v6 = vpop.f32.mrf.mxu0  ;;  %v1507_v18 = vpop.f32.mrf.mxu3 }
 0x398   :  { %v1456_v25 = vadd.f32 %v1455_v45, %v1443_v11  ;;  %v5024_v6 = vld [vmem:[#allocation37_spill] sm:$0xff] }
 0x399   :  { %v1483_v59 = vpop.f32.mrf.mxu1 }
 0x39a   :  { %v1512_v17 = vmul.f32 0.5, %v1456_v25 }
 0x39c   :  { %3018 = vtanh.f32 %v1512_v17 }
 0x39d   :  { %v1444_v36 = vpop.f32.mrf.mxu2  ;;  %3020 = vtanh.f32 %v1511_v50 }
 0x39f   :  { %v1468_v62 = vpop.f32.mrf.mxu0  ;;  %v1509_v10 = vpop.f32.mrf.mxu3 }
 0x3a0   :  { %v1469_v19 = vadd.f32 %v1468_v62, %v4901_v33 }
 0x3a1   :  { %v1558_v41 = vpop.f32.mrf.mxu1 }
 0x3a2   :  { %v1482_v54 = vadd.f32 %v1481_v4, %v1469_v19  ;;  %v3019_v32 = vpop.eup %3018  ;;  %v1589_v27 = vadd.f32 %v1558_v41, %v1533_v56 }
 0x3a3   :  { %v3021_v15 = vpop.eup %3020  ;;  %v1518_v36 = vmul.f32 0.5, %v3019_v32 }
 0x3a4   :  { %v1513_v45 = vmul.f32 0.5, %v1482_v54  ;;  %v1593_v10 = vmul.f32 0.5, %v1589_v27  ;;  %v1517_v17 = vmul.f32 0.5, %v3021_v15  ;;  %v1534_v27 = vld [vmem:[#allocation4 + $0x90] sm:$0xff] }
 0x3a5   :  { %v1494_v51 = vpop.f32.mrf.mxu2  ;;  %v1521_v62 = vadd.f32 0.5, %v1518_v36 }
 0x3a6   :  { %v1495_v63 = vadd.f32 %v1494_v51, %v5024_v6  ;;  %v1520_v4 = vadd.f32 0.5, %v1517_v17 }
 0x3a7   :  { %v1470_v11 = vpop.f32.mrf.mxu0  ;;  %v1584_v59 = vpop.f32.mrf.mxu3 }
 0x3a8   :  { %v1508_v43 = vadd.f32 %v1507_v18, %v1495_v63  ;;  %v1524_v11 = vmul.f32 %v1521_v62, %v4058_v42  ;;  %v1535_v18 = vld [vmem:[#allocation4 + $0x98] sm:$0xff] }
 0x3a9   :  { %v1560_v25 = vpop.f32.mrf.mxu1 }
 0x3aa   :  { %3022 = vtanh.f32 %v1508_v43  ;;  %v1591_v43 = vadd.f32 %v1584_v59, %v1535_v18 }
 0x3ab   :  { %3024 = vtanh.f32 %v1513_v45 }
 0x3ac   :  { %3026 = vtanh.f32 %v1593_v10 }
 0x3ad   :  { %v1496_v50 = vpop.f32.mrf.mxu2 }
 0x3af   :  { %v1545_v19 = vpop.f32.mrf.mxu0  ;;  %v1586_v56 = vpop.f32.mrf.mxu3 }
 0x3b0   :  { %v3023_v41 = vpop.eup %3022  ;;  %v1588_v51 = vadd.f32 %v1545_v19, %v1532_v22 }
 0x3b1   :  { %v1525_v6 = vmul.f32 %v3023_v41, %v1520_v4  ;;  %v3025_v54 = vpop.eup %3024 }
 0x3b2   :  { %v1592_v32 = vmul.f32 0.5, %v1588_v51  ;;  %v3027_v15 = vpop.eup %3026  ;;  %v1519_v45 = vmul.f32 0.5, %v3025_v54 }
 0x3b3   :  { %v4166_v63 = vadd.f32 %v1525_v6, %v1524_v11  ;;  %v1599_v10 = vmul.f32 0.5, %v3027_v15 }
 0x3b4   :  { %3028 = vtanh.f32 %v1592_v32  ;;  %v1522_v62 = vadd.f32 0.5, %v1519_v45  ;;  %v5025_v45 = vld [vmem:[#allocation51_spill] sm:$0xff] }
 0x3b5   :  { %3030 = vtanh.f32 %v4166_v63  ;;  %v1571_v36 = vpop.f32.mrf.mxu2  ;;  %v1602_v4 = vadd.f32 0.5, %v1599_v10  ;;  %v5027_v10 = vld [vmem:[#allocation57_spill] sm:$0xff] }
 0x3b6   :  { %v1590_v25 = vadd.f32 %v1571_v36, %v1534_v27  ;;  %3032 = vtanh.f32 %v1591_v43 }
 0x3b7   :  { %v1547_v17 = vpop.f32.mrf.mxu0  ;;  %v1605_v11 = vmul.f32 %v1602_v4, %v4062_v57  ;;  %v5033_v4 = vld [vmem:[#allocation58_spill] sm:$0xff] }
 0x3b8   :  { %v1594_v50 = vmul.f32 0.5, %v1590_v25  ;;  %v5026_v25 = vld [vmem:[#allocation52_spill] sm:$0xff]  ;;  %v5028_v17 = vld [vmem:[#allocation59_spill] sm:$0xff] }
 0x3ba   :  { %v3029_v42 = vpop.eup %3028  ;;  %3034 = vtanh.f32 %v1594_v50  ;;  %v5029_v50 = vld [vmem:[#allocation54_spill] sm:$0xff] }
 0x3bb   :  { %v3031_v22 = vpop.eup %3030  ;;  %v1598_v19 = vmul.f32 0.5, %v3029_v42  ;;  %v5030_v42 = vld [vmem:[#allocation56_spill] sm:$0xff] }
 0x3bc   :  { %v1528_v6 = vmul.f32 %v3031_v22, %v1522_v62  ;;  %v3033_v59 = vpop.eup %3032  ;;  %v5031_v62 = vld [vmem:[#allocation61_spill] sm:$0xff]  ;;  %v5032_v22 = vld [vmem:[#allocation63_spill] sm:$0xff] }
 0x3bd   :  { %v1601_v56 = vadd.f32 0.5, %v1598_v19  ;;  %v1573_v41 = vpop.f32.mrf.mxu2  ;;  %v5034_v19 = vld [vmem:[#allocation60_spill] sm:$0xff] }
 0x3be   :  { %1530 = vst [vmem:[#allocation13 + $0x18] sm:$0xff] %v1528_v6  ;;  %v1611_v51 = vpack.c.bf16 %v1528_v6, %v1528_v6  ;;  %v5035_v6 = vld [vmem:[#allocation65_spill] sm:$0xff]  ;;  %v5037_v41 = vld [vmem:[#allocation62_spill] sm:$0xff] }
 0x3bf   :  { %v1606_v18 = vmul.f32 %v3033_v59, %v1601_v56  ;;  %v5036_v56 = vld [vmem:[#allocation67_spill] sm:$0xff]  ;;  %v5038_v59 = vld [vmem:[#allocation64_spill] sm:$0xff] }
 0x3c0   :  { %1633 = vmatmul.bf16.vlgmr.msrb.gmra.mxu1 %v1611_v51  ;;  %1659 = vmatmul.bf16.vlgmr.msrb.gmra.mxu3 %v1611_v51  ;;  %v3035_v32 = vpop.eup %3034 }
 0x3c1   :  { %v4170_v54 = vadd.f32 %v1606_v18, %v1605_v11  ;;  %1754 = vmatpush.bf16.msrb.mxu1 %v3424_v7  ;;  %1780 = vmatpush.bf16.msrb.mxu3 %v3429_v12  ;;  %v1600_v27 = vmul.f32 0.5, %v3035_v32  ;;  %v5040_v11 = vld [vmem:[#allocation71_spill] sm:$0xff]  ;;  %v5041_v18 = vld [vmem:[#allocation66_spill] sm:$0xff]  ;;  %v5042_v32 = vld [vmem:[#allocation68_spill] sm:$0xff] }
 0x3c3   :  { %3036 = vtanh.f32 %v4170_v54  ;;  %v1603_v15 = vadd.f32 0.5, %v1600_v27  ;;  %v5043_v27 = vld [vmem:[#allocation73_spill] sm:$0xff] }
 0x3c5   :  { %1755 = vmatpush.bf16.msrb.mxu1 %v4842_v26  ;;  %1781 = vmatpush.bf16.msrb.mxu3 %v4843_v30 }
 0x3c9   :  { %v3037_v43 = vpop.eup %3036  ;;  %1756 = vmatpush.bf16.msrb.mxu1 %v4844_v49  ;;  %1782 = vmatpush.bf16.msrb.mxu3 %v4845_v61 }
 0x3ca   :  { %v1609_v57 = vmul.f32 %v3037_v43, %v1603_v15  ;;  %v5044_v15 = vld [vmem:[#allocation75_spill] sm:$0xff]  ;;  %v5045_v43 = vld [vmem:[#allocation76_spill] sm:$0xff] }
 0x3cc   :  { %v1610_v36 = vpack.c.bf16 %v1609_v57, %v1609_v57  ;;  %v5046_v57 = vld [vmem:[#allocation77_spill] sm:$0xff] }
 0x3cd   :  { %1757 = vmatpush.bf16.msrb.mxu1 %v4846_v9  ;;  %1783 = vmatpush.bf16.msrb.mxu3 %v4847_v0 }
 0x3ce   :  { %1620 = vmatmul.bf16.vlgmr.msrb.gmra.mxu0 %v1610_v36  ;;  %1646 = vmatmul.bf16.vlgmr.msrb.gmra.mxu2 %v1610_v36 }
 0x3cf   :  { %1741 = vmatpush.bf16.msrb.mxu0 %v3422_v3  ;;  %1767 = vmatpush.bf16.msrb.mxu2 %v3426_v8 }
 0x3d0   :  { %1685 = vmatmul.bf16.vlgmr.msra.gmra.mxu1 %v1611_v51  ;;  %1711 = vmatmul.bf16.vlgmr.msra.gmra.mxu3 %v1611_v51  ;;  %v5039_v51 = vld [vmem:[#allocation69_spill] sm:$0xff] }
 0x3d1   :  { %1758 = vmatpush.bf16.msrb.mxu1 %v4848_v5  ;;  %1784 = vmatpush.bf16.msrb.mxu3 %v4849_v39 }
 0x3d3   :  { %1742 = vmatpush.bf16.msrb.mxu0 %v3433_v16  ;;  %1768 = vmatpush.bf16.msrb.mxu2 %v3438_v21 }
 0x3d5   :  { %1759 = vmatpush.bf16.msrb.mxu1 %v4850_v24  ;;  %1785 = vmatpush.bf16.msrb.mxu3 %v4851_v23 }
 0x3d7   :  { %1743 = vmatpush.bf16.msrb.mxu0 %v3443_v29  ;;  %1769 = vmatpush.bf16.msrb.mxu2 %v3449_v34 }
 0x3d9   :  { %1760 = vmatpush.bf16.msrb.mxu1 %v4852_v60  ;;  %1786 = vmatpush.bf16.msrb.mxu3 %v4853_v55 }
 0x3db   :  { %1744 = vmatpush.bf16.msrb.mxu0 %v3455_v44  ;;  %1770 = vmatpush.bf16.msrb.mxu2 %v3461_v46 }
 0x3dd   :  { %1761 = vmatpush.bf16.msrb.mxu1 %v4854_v14  ;;  %1787 = vmatpush.bf16.msrb.mxu3 %v4855_v35 }
 0x3de   :  { %1672 = vmatmul.bf16.vlgmr.msra.gmra.mxu0 %v1610_v36  ;;  %1698 = vmatmul.bf16.vlgmr.msra.gmra.mxu2 %v1610_v36 }
 0x3df   :  { %1745 = vmatpush.bf16.msrb.mxu0 %v4815_v38  ;;  %1771 = vmatpush.bf16.msrb.mxu2 %v4816_v31 }
 0x3e0   :  { %1762 = vmatmul.bf16.vlgmr.msrb.gmra.mxu1 %v1610_v36  ;;  %1788 = vmatmul.bf16.vlgmr.msrb.gmra.mxu3 %v1610_v36 }
 0x3e1   :  { %1830 = vmatpush.bf16.msra.mxu1 %v4856_v53  ;;  %1856 = vmatpush.bf16.msra.mxu3 %v4857_v28 }
 0x3e3   :  { %1746 = vmatpush.bf16.msrb.mxu0 %v4818_v52  ;;  %1772 = vmatpush.bf16.msrb.mxu2 %v4819_v58 }
 0x3e5   :  { %1831 = vmatpush.bf16.msra.mxu1 %v4858_v1  ;;  %1857 = vmatpush.bf16.msra.mxu3 %v4859_v37 }
 0x3e7   :  { %1747 = vmatpush.bf16.msrb.mxu0 %v4820_v20  ;;  %1773 = vmatpush.bf16.msrb.mxu2 %v4821_v40 }
 0x3e9   :  { %1832 = vmatpush.bf16.msra.mxu1 %v4903_v2  ;;  %1858 = vmatpush.bf16.msra.mxu3 %v4904_v13 }
 0x3eb   :  { %1748 = vmatpush.bf16.msrb.mxu0 %v4822_v48  ;;  %1774 = vmatpush.bf16.msrb.mxu2 %v4823_v47 }
 0x3ed   :  { %1833 = vmatpush.bf16.msra.mxu1 %v5027_v10  ;;  %1859 = vmatpush.bf16.msra.mxu3 %v5028_v17 }
 0x3ee   :  { %1749 = vmatmul.bf16.vlgmr.msrb.gmra.mxu0 %v1610_v36  ;;  %1775 = vmatmul.bf16.vlgmr.msrb.gmra.mxu2 %v1610_v36  ;;  %v5047_v36 = vld [vmem:[#allocation70_spill] sm:$0xff] }
 0x3ef   :  { %1817 = vmatpush.bf16.msra.mxu0 %v5025_v45  ;;  %1843 = vmatpush.bf16.msra.mxu2 %v5026_v25  ;;  %v1738_v25 = vld [vmem:[#allocation4 + $0xa8] sm:$0xff] }
 0x3f1   :  { %1834 = vmatpush.bf16.msra.mxu1 %v5031_v62  ;;  %1860 = vmatpush.bf16.msra.mxu3 %v5032_v22 }
 0x3f3   :  { %1818 = vmatpush.bf16.msra.mxu0 %v5029_v50  ;;  %1844 = vmatpush.bf16.msra.mxu2 %v5030_v42 }
 0x3f5   :  { %1835 = vmatpush.bf16.msra.mxu1 %v5035_v6  ;;  %1861 = vmatpush.bf16.msra.mxu3 %v5036_v56 }
 0x3f7   :  { %1819 = vmatpush.bf16.msra.mxu0 %v5033_v4  ;;  %1845 = vmatpush.bf16.msra.mxu2 %v5034_v19 }
 0x3f9   :  { %1836 = vmatpush.bf16.msra.mxu1 %v5039_v51  ;;  %1862 = vmatpush.bf16.msra.mxu3 %v5040_v11  ;;  %v5050_v51 = vld [vmem:[#allocation80_spill] sm:$0xff]  ;;  %v5051_v11 = vld [vmem:[#allocation74_spill] sm:$0xff] }
 0x3fb   :  { %1820 = vmatpush.bf16.msra.mxu0 %v5037_v41  ;;  %1846 = vmatpush.bf16.msra.mxu2 %v5038_v59  ;;  %v5048_v41 = vld [vmem:[#allocation72_spill] sm:$0xff]  ;;  %v5049_v59 = vld [vmem:[#allocation79_spill] sm:$0xff] }
 0x3fd   :  { %1837 = vmatpush.bf16.msra.mxu1 %v5043_v27  ;;  %1863 = vmatpush.bf16.msra.mxu3 %v5044_v15  ;;  %v5054_v27 = vld [vmem:[#allocation82_spill] sm:$0xff]  ;;  %v5055_v15 = vld [vmem:[#allocation93_spill] sm:$0xff] }
 0x3ff   :  { %1821 = vmatpush.bf16.msra.mxu0 %v5041_v18  ;;  %1847 = vmatpush.bf16.msra.mxu2 %v5042_v32  ;;  %v5052_v18 = vld [vmem:[#allocation78_spill] sm:$0xff]  ;;  %v5053_v32 = vld [vmem:[#allocation81_spill] sm:$0xff] }
 0x401   :  { %1882 = vmatpush.bf16.msrb.mxu1 %v5045_v43  ;;  %1908 = vmatpush.bf16.msrb.mxu3 %v5046_v57  ;;  %v5056_v43 = vld [vmem:[#allocation94_spill] sm:$0xff]  ;;  %v5057_v57 = vld [vmem:[#allocation95_spill] sm:$0xff] }
 0x403   :  { %1822 = vmatpush.bf16.msra.mxu0 %v5047_v36  ;;  %1848 = vmatpush.bf16.msra.mxu2 %v5048_v41  ;;  %v5058_v36 = vld [vmem:[#allocation96_spill] sm:$0xff]  ;;  %v5059_v41 = vld [vmem:[#allocation83_spill] sm:$0xff] }
 0x405   :  { %1883 = vmatpush.bf16.msrb.mxu1 %v5049_v59  ;;  %1909 = vmatpush.bf16.msrb.mxu3 %v5050_v51  ;;  %v5060_v59 = vld [vmem:[#allocation84_spill] sm:$0xff]  ;;  %v5061_v51 = vld [vmem:[#allocation97_spill] sm:$0xff] }
 0x407   :  { %1823 = vmatpush.bf16.msra.mxu0 %v5051_v11  ;;  %1849 = vmatpush.bf16.msra.mxu2 %v5052_v18  ;;  %v5062_v11 = vld [vmem:[#allocation98_spill] sm:$0xff]  ;;  %v5063_v18 = vld [vmem:[#allocation85_spill] sm:$0xff] }
 0x409   :  { %1884 = vmatpush.bf16.msrb.mxu1 %v5053_v32  ;;  %1910 = vmatpush.bf16.msrb.mxu3 %v5054_v27  ;;  %v5064_v32 = vld [vmem:[#allocation86_spill] sm:$0xff]  ;;  %v5065_v27 = vld [vmem:[#allocation99_spill] sm:$0xff] }
 0x40b   :  { %1824 = vmatpush.bf16.msra.mxu0 %v5055_v15  ;;  %1850 = vmatpush.bf16.msra.mxu2 %v5056_v43  ;;  %v5066_v15 = vld [vmem:[#allocation100_spill] sm:$0xff]  ;;  %v5067_v43 = vld [vmem:[#allocation87_spill] sm:$0xff] }
 0x40d   :  { %1885 = vmatpush.bf16.msrb.mxu1 %v5059_v41  ;;  %1911 = vmatpush.bf16.msrb.mxu3 %v5060_v59  ;;  %v5070_v41 = vld [vmem:[#allocation102_spill] sm:$0xff]  ;;  %v5071_v59 = vld [vmem:[#allocation89_spill] sm:$0xff] }
 0x40f   :  { %1869 = vmatpush.bf16.msrb.mxu0 %v5057_v57  ;;  %1895 = vmatpush.bf16.msrb.mxu2 %v5058_v36  ;;  %v5068_v57 = vld [vmem:[#allocation88_spill] sm:$0xff]  ;;  %v5069_v36 = vld [vmem:[#allocation101_spill] sm:$0xff] }
 0x411   :  { %1886 = vmatpush.bf16.msrb.mxu1 %v5063_v18  ;;  %1912 = vmatpush.bf16.msrb.mxu3 %v5064_v32  ;;  %v5074_v18 = vld [vmem:[#allocation104_spill] sm:$0xff]  ;;  %v5075_v32 = vld [vmem:[#allocation91_spill] sm:$0xff] }
 0x413   :  { %1870 = vmatpush.bf16.msrb.mxu0 %v5061_v51  ;;  %1896 = vmatpush.bf16.msrb.mxu2 %v5062_v11  ;;  %v5072_v51 = vld [vmem:[#allocation90_spill] sm:$0xff]  ;;  %v5073_v11 = vld [vmem:[#allocation103_spill] sm:$0xff] }
 0x415   :  { %1887 = vmatpush.bf16.msrb.mxu1 %v5067_v43  ;;  %1913 = vmatpush.bf16.msrb.mxu3 %v5068_v57  ;;  %v5078_v43 = vld [vmem:[#allocation106_spill] sm:$0xff]  ;;  %v5079_v57 = vld [vmem:[#allocation107_spill] sm:$0xff] }
 0x417   :  { %1871 = vmatpush.bf16.msrb.mxu0 %v5065_v27  ;;  %1897 = vmatpush.bf16.msrb.mxu2 %v5066_v15  ;;  %v5076_v27 = vld [vmem:[#allocation92_spill] sm:$0xff]  ;;  %v5077_v15 = vld [vmem:[#allocation105_spill] sm:$0xff] }
 0x419   :  { %1888 = vmatpush.bf16.msrb.mxu1 %v5071_v59  ;;  %1914 = vmatpush.bf16.msrb.mxu3 %v5072_v51  ;;  %v5082_v59 = vld [vmem:[#allocation110_spill] sm:$0xff] }
 0x41b   :  { %1872 = vmatpush.bf16.msrb.mxu0 %v5069_v36  ;;  %1898 = vmatpush.bf16.msrb.mxu2 %v5070_v41  ;;  %v5080_v36 = vld [vmem:[#allocation108_spill] sm:$0xff]  ;;  %v5081_v41 = vld [vmem:[#allocation109_spill] sm:$0xff] }
 0x41d   :  { %1889 = vmatpush.bf16.msrb.mxu1 %v5075_v32  ;;  %1915 = vmatpush.bf16.msrb.mxu3 %v5076_v27  ;;  %v5083_v27 = vld [vmem:[#allocation31_spill] sm:$0xff] }
 0x41f   :  { %1873 = vmatpush.bf16.msrb.mxu0 %v5073_v11  ;;  %1899 = vmatpush.bf16.msrb.mxu2 %v5074_v18 }
 0x423   :  { %1874 = vmatpush.bf16.msrb.mxu0 %v5077_v15  ;;  %1900 = vmatpush.bf16.msrb.mxu2 %v5078_v43  ;;  %v5084_v15 = vld [vmem:[#allocation33_spill] sm:$0xff] }
 0x427   :  { %1875 = vmatpush.bf16.msrb.mxu0 %v5079_v57  ;;  %1901 = vmatpush.bf16.msrb.mxu2 %v5080_v36 }
 0x42b   :  { %1876 = vmatpush.bf16.msrb.mxu0 %v5081_v41  ;;  %1902 = vmatpush.bf16.msrb.mxu2 %v5082_v59 }
 0x43d   :  { %v1634_v51 = vpop.f32.mrf.mxu1 }
 0x443   :  { %v1660_v11 = vpop.f32.mrf.mxu3 }
 0x445   :  { %v1636_v56 = vpop.f32.mrf.mxu1 }
 0x44b   :  { %v1621_v18 = vpop.f32.mrf.mxu0  ;;  %v1662_v6 = vpop.f32.mrf.mxu3 }
 0x44c   :  { %v1622_v4 = vadd.f32 %v1621_v18, %v5083_v27 }
 0x44d   :  { %v1686_v32 = vpop.f32.mrf.mxu1 }
 0x44e   :  { %v1635_v36 = vadd.f32 %v1634_v51, %v1622_v4 }
 0x450   :  { %v1716_v17 = vmul.f32 0.5, %v1635_v36  ;;  %v1737_v36 = vld [vmem:[#allocation4 + $0xa0] sm:$0xff] }
 0x451   :  { %v1647_v19 = vpop.f32.mrf.mxu2 }
 0x452   :  { %v1648_v22 = vadd.f32 %v1647_v19, %v5084_v15 }
 0x453   :  { %v1623_v43 = vpop.f32.mrf.mxu0  ;;  %v1712_v62 = vpop.f32.mrf.mxu3 }
 0x454   :  { %v1661_v57 = vadd.f32 %v1660_v11, %v1648_v22  ;;  %v5085_v43 = vld [vmem:[#allocation37_spill] sm:$0xff] }
 0x455   :  { %v1688_v42 = vpop.f32.mrf.mxu1 }
 0x456   :  { %v1717_v50 = vmul.f32 0.5, %v1661_v57 }
 0x458   :  { %3038 = vtanh.f32 %v1717_v50 }
 0x459   :  { %v1649_v41 = vpop.f32.mrf.mxu2  ;;  %3040 = vtanh.f32 %v1716_v17 }
 0x45b   :  { %v1673_v59 = vpop.f32.mrf.mxu0  ;;  %v1714_v10 = vpop.f32.mrf.mxu3 }
 0x45c   :  { %v1674_v56 = vadd.f32 %v1673_v59, %v4901_v33 }
 0x45d   :  { %v1763_v6 = vpop.f32.mrf.mxu1 }
 0x45e   :  { %v1687_v45 = vadd.f32 %v1686_v32, %v1674_v56  ;;  %v3039_v27 = vpop.eup %3038  ;;  %v1794_v19 = vadd.f32 %v1763_v6, %v1738_v25 }
 0x45f   :  { %v3041_v4 = vpop.eup %3040  ;;  %v1723_v41 = vmul.f32 0.5, %v3039_v27 }
 0x460   :  { %v1718_v11 = vmul.f32 0.5, %v1687_v45  ;;  %v1798_v10 = vmul.f32 0.5, %v1794_v19  ;;  %v1722_v50 = vmul.f32 0.5, %v3041_v4  ;;  %v1739_v19 = vld [vmem:[#allocation4 + $0xb0] sm:$0xff] }
 0x461   :  { %v1699_v18 = vpop.f32.mrf.mxu2  ;;  %v1726_v59 = vadd.f32 0.5, %v1723_v41 }
 0x462   :  { %v1700_v15 = vadd.f32 %v1699_v18, %v5085_v43  ;;  %v1725_v32 = vadd.f32 0.5, %v1722_v50 }
 0x463   :  { %v1675_v22 = vpop.f32.mrf.mxu0  ;;  %v1789_v42 = vpop.f32.mrf.mxu3 }
 0x464   :  { %v1713_v51 = vadd.f32 %v1712_v62, %v1700_v15  ;;  %v1729_v22 = vmul.f32 %v1726_v59, %v4166_v63  ;;  %v1740_v62 = vld [vmem:[#allocation4 + $0xb8] sm:$0xff] }
 0x465   :  { %v1765_v57 = vpop.f32.mrf.mxu1 }
 0x466   :  { %3042 = vtanh.f32 %v1713_v51  ;;  %v1796_v51 = vadd.f32 %v1789_v42, %v1740_v62 }
 0x467   :  { %3044 = vtanh.f32 %v1718_v11 }
 0x468   :  { %3046 = vtanh.f32 %v1798_v10 }
 0x469   :  { %v1701_v17 = vpop.f32.mrf.mxu2 }
 0x46b   :  { %v1750_v56 = vpop.f32.mrf.mxu0  ;;  %v1791_v25 = vpop.f32.mrf.mxu3 }
 0x46c   :  { %v3043_v6 = vpop.eup %3042  ;;  %v1793_v18 = vadd.f32 %v1750_v56, %v1737_v36 }
 0x46d   :  { %v1730_v43 = vmul.f32 %v3043_v6, %v1725_v32  ;;  %v3045_v45 = vpop.eup %3044 }
 0x46e   :  { %v1797_v27 = vmul.f32 0.5, %v1793_v18  ;;  %v3047_v4 = vpop.eup %3046  ;;  %v1724_v11 = vmul.f32 0.5, %v3045_v45 }
 0x46f   :  { %v4274_v15 = vadd.f32 %v1730_v43, %v1729_v22  ;;  %v1804_v10 = vmul.f32 0.5, %v3047_v4 }
 0x470   :  { %3048 = vtanh.f32 %v1797_v27  ;;  %v1727_v59 = vadd.f32 0.5, %v1724_v11  ;;  %v5086_v11 = vld [vmem:[#allocation51_spill] sm:$0xff] }
 0x471   :  { %3050 = vtanh.f32 %v4274_v15  ;;  %v1776_v41 = vpop.f32.mrf.mxu2  ;;  %v1807_v32 = vadd.f32 0.5, %v1804_v10  ;;  %v5088_v10 = vld [vmem:[#allocation57_spill] sm:$0xff] }
 0x472   :  { %v1795_v57 = vadd.f32 %v1776_v41, %v1739_v19  ;;  %3052 = vtanh.f32 %v1796_v51 }
 0x473   :  { %v1752_v50 = vpop.f32.mrf.mxu0  ;;  %v1810_v22 = vmul.f32 %v1807_v32, %v4170_v54  ;;  %v5094_v32 = vld [vmem:[#allocation58_spill] sm:$0xff] }
 0x474   :  { %v1799_v17 = vmul.f32 0.5, %v1795_v57  ;;  %v5087_v57 = vld [vmem:[#allocation52_spill] sm:$0xff]  ;;  %v5089_v50 = vld [vmem:[#allocation59_spill] sm:$0xff] }
 0x476   :  { %v3049_v63 = vpop.eup %3048  ;;  %3054 = vtanh.f32 %v1799_v17  ;;  %v5090_v17 = vld [vmem:[#allocation54_spill] sm:$0xff] }
 0x477   :  { %v3051_v36 = vpop.eup %3050  ;;  %v1803_v56 = vmul.f32 0.5, %v3049_v63  ;;  %v5091_v63 = vld [vmem:[#allocation56_spill] sm:$0xff] }
 0x478   :  { %v1733_v43 = vmul.f32 %v3051_v36, %v1727_v59  ;;  %v3053_v42 = vpop.eup %3052  ;;  %v5092_v59 = vld [vmem:[#allocation61_spill] sm:$0xff]  ;;  %v5093_v36 = vld [vmem:[#allocation63_spill] sm:$0xff] }
 0x479   :  { %v1806_v25 = vadd.f32 0.5, %v1803_v56  ;;  %v1778_v6 = vpop.f32.mrf.mxu2  ;;  %v5095_v56 = vld [vmem:[#allocation60_spill] sm:$0xff] }
 0x47a   :  { %1735 = vst [vmem:[#allocation13 + $0x20] sm:$0xff] %v1733_v43  ;;  %v1816_v18 = vpack.c.bf16 %v1733_v43, %v1733_v43  ;;  %v5096_v43 = vld [vmem:[#allocation65_spill] sm:$0xff]  ;;  %v5098_v6 = vld [vmem:[#allocation62_spill] sm:$0xff] }
 0x47b   :  { %v1811_v62 = vmul.f32 %v3053_v42, %v1806_v25  ;;  %v5097_v25 = vld [vmem:[#allocation67_spill] sm:$0xff]  ;;  %v5099_v42 = vld [vmem:[#allocation64_spill] sm:$0xff] }
 0x47c   :  { %1838 = vmatmul.bf16.vlgmr.msra.gmra.mxu1 %v1816_v18  ;;  %1864 = vmatmul.bf16.vlgmr.msra.gmra.mxu3 %v1816_v18  ;;  %v3055_v27 = vpop.eup %3054 }
 0x47d   :  { %v4278_v45 = vadd.f32 %v1811_v62, %v1810_v22  ;;  %1959 = vmatpush.bf16.msra.mxu1 %v3424_v7  ;;  %1985 = vmatpush.bf16.msra.mxu3 %v3429_v12  ;;  %v1805_v19 = vmul.f32 0.5, %v3055_v27  ;;  %v5101_v22 = vld [vmem:[#allocation71_spill] sm:$0xff]  ;;  %v5102_v62 = vld [vmem:[#allocation66_spill] sm:$0xff]  ;;  %v5103_v27 = vld [vmem:[#allocation68_spill] sm:$0xff] }
 0x47f   :  { %3056 = vtanh.f32 %v4278_v45  ;;  %v1808_v4 = vadd.f32 0.5, %v1805_v19  ;;  %v5104_v19 = vld [vmem:[#allocation73_spill] sm:$0xff] }
 0x481   :  { %1960 = vmatpush.bf16.msra.mxu1 %v4842_v26  ;;  %1986 = vmatpush.bf16.msra.mxu3 %v4843_v30 }
 0x485   :  { %v3057_v51 = vpop.eup %3056  ;;  %1961 = vmatpush.bf16.msra.mxu1 %v4844_v49  ;;  %1987 = vmatpush.bf16.msra.mxu3 %v4845_v61 }
 0x486   :  { %v1814_v54 = vmul.f32 %v3057_v51, %v1808_v4  ;;  %v5105_v4 = vld [vmem:[#allocation75_spill] sm:$0xff]  ;;  %v5106_v51 = vld [vmem:[#allocation76_spill] sm:$0xff] }
 0x488   :  { %v1815_v41 = vpack.c.bf16 %v1814_v54, %v1814_v54  ;;  %v5107_v54 = vld [vmem:[#allocation77_spill] sm:$0xff] }
 0x489   :  { %1962 = vmatpush.bf16.msra.mxu1 %v4846_v9  ;;  %1988 = vmatpush.bf16.msra.mxu3 %v4847_v0 }
 0x48a   :  { %1825 = vmatmul.bf16.vlgmr.msra.gmra.mxu0 %v1815_v41  ;;  %1851 = vmatmul.bf16.vlgmr.msra.gmra.mxu2 %v1815_v41 }
 0x48b   :  { %1946 = vmatpush.bf16.msra.mxu0 %v3422_v3  ;;  %1972 = vmatpush.bf16.msra.mxu2 %v3426_v8 }
 0x48c   :  { %1890 = vmatmul.bf16.vlgmr.msrb.gmra.mxu1 %v1816_v18  ;;  %1916 = vmatmul.bf16.vlgmr.msrb.gmra.mxu3 %v1816_v18  ;;  %v5100_v18 = vld [vmem:[#allocation69_spill] sm:$0xff] }
 0x48d   :  { %1963 = vmatpush.bf16.msra.mxu1 %v4848_v5  ;;  %1989 = vmatpush.bf16.msra.mxu3 %v4849_v39 }
 0x48f   :  { %1947 = vmatpush.bf16.msra.mxu0 %v3433_v16  ;;  %1973 = vmatpush.bf16.msra.mxu2 %v3438_v21 }
 0x491   :  { %1964 = vmatpush.bf16.msra.mxu1 %v4850_v24  ;;  %1990 = vmatpush.bf16.msra.mxu3 %v4851_v23 }
 0x493   :  { %1948 = vmatpush.bf16.msra.mxu0 %v3443_v29  ;;  %1974 = vmatpush.bf16.msra.mxu2 %v3449_v34 }
 0x495   :  { %1965 = vmatpush.bf16.msra.mxu1 %v4852_v60  ;;  %1991 = vmatpush.bf16.msra.mxu3 %v4853_v55 }
 0x497   :  { %1949 = vmatpush.bf16.msra.mxu0 %v3455_v44  ;;  %1975 = vmatpush.bf16.msra.mxu2 %v3461_v46 }
 0x499   :  { %1966 = vmatpush.bf16.msra.mxu1 %v4854_v14  ;;  %1992 = vmatpush.bf16.msra.mxu3 %v4855_v35 }
 0x49a   :  { %1877 = vmatmul.bf16.vlgmr.msrb.gmra.mxu0 %v1815_v41  ;;  %1903 = vmatmul.bf16.vlgmr.msrb.gmra.mxu2 %v1815_v41 }
 0x49b   :  { %1950 = vmatpush.bf16.msra.mxu0 %v4815_v38  ;;  %1976 = vmatpush.bf16.msra.mxu2 %v4816_v31 }
 0x49c   :  { %1967 = vmatmul.bf16.vlgmr.msra.gmra.mxu1 %v1815_v41  ;;  %1993 = vmatmul.bf16.vlgmr.msra.gmra.mxu3 %v1815_v41 }
 0x49d   :  { %2035 = vmatpush.bf16.msrb.mxu1 %v4856_v53  ;;  %2061 = vmatpush.bf16.msrb.mxu3 %v4857_v28 }
 0x49f   :  { %1951 = vmatpush.bf16.msra.mxu0 %v4818_v52  ;;  %1977 = vmatpush.bf16.msra.mxu2 %v4819_v58 }
 0x4a1   :  { %2036 = vmatpush.bf16.msrb.mxu1 %v4858_v1  ;;  %2062 = vmatpush.bf16.msrb.mxu3 %v4859_v37 }
 0x4a3   :  { %1952 = vmatpush.bf16.msra.mxu0 %v4820_v20  ;;  %1978 = vmatpush.bf16.msra.mxu2 %v4821_v40 }
 0x4a5   :  { %2037 = vmatpush.bf16.msrb.mxu1 %v4903_v2  ;;  %2063 = vmatpush.bf16.msrb.mxu3 %v4904_v13 }
 0x4a7   :  { %1953 = vmatpush.bf16.msra.mxu0 %v4822_v48  ;;  %1979 = vmatpush.bf16.msra.mxu2 %v4823_v47 }
 0x4a9   :  { %2038 = vmatpush.bf16.msrb.mxu1 %v5088_v10  ;;  %2064 = vmatpush.bf16.msrb.mxu3 %v5089_v50 }
 0x4aa   :  { %1954 = vmatmul.bf16.vlgmr.msra.gmra.mxu0 %v1815_v41  ;;  %1980 = vmatmul.bf16.vlgmr.msra.gmra.mxu2 %v1815_v41  ;;  %v5108_v41 = vld [vmem:[#allocation70_spill] sm:$0xff] }
 0x4ab   :  { %2022 = vmatpush.bf16.msrb.mxu0 %v5086_v11  ;;  %2048 = vmatpush.bf16.msrb.mxu2 %v5087_v57  ;;  %v1943_v57 = vld [vmem:[#allocation4 + $0xc8] sm:$0xff] }
 0x4ad   :  { %2039 = vmatpush.bf16.msrb.mxu1 %v5092_v59  ;;  %2065 = vmatpush.bf16.msrb.mxu3 %v5093_v36 }
 0x4af   :  { %2023 = vmatpush.bf16.msrb.mxu0 %v5090_v17  ;;  %2049 = vmatpush.bf16.msrb.mxu2 %v5091_v63 }
 0x4b1   :  { %2040 = vmatpush.bf16.msrb.mxu1 %v5096_v43  ;;  %2066 = vmatpush.bf16.msrb.mxu3 %v5097_v25 }
 0x4b3   :  { %2024 = vmatpush.bf16.msrb.mxu0 %v5094_v32  ;;  %2050 = vmatpush.bf16.msrb.mxu2 %v5095_v56 }
 0x4b5   :  { %2041 = vmatpush.bf16.msrb.mxu1 %v5100_v18  ;;  %2067 = vmatpush.bf16.msrb.mxu3 %v5101_v22  ;;  %v5111_v18 = vld [vmem:[#allocation80_spill] sm:$0xff]  ;;  %v5112_v22 = vld [vmem:[#allocation74_spill] sm:$0xff] }
 0x4b7   :  { %2025 = vmatpush.bf16.msrb.mxu0 %v5098_v6  ;;  %2051 = vmatpush.bf16.msrb.mxu2 %v5099_v42  ;;  %v5109_v6 = vld [vmem:[#allocation72_spill] sm:$0xff]  ;;  %v5110_v42 = vld [vmem:[#allocation79_spill] sm:$0xff] }
 0x4b9   :  { %2042 = vmatpush.bf16.msrb.mxu1 %v5104_v19  ;;  %2068 = vmatpush.bf16.msrb.mxu3 %v5105_v4  ;;  %v5115_v19 = vld [vmem:[#allocation82_spill] sm:$0xff]  ;;  %v5116_v4 = vld [vmem:[#allocation93_spill] sm:$0xff] }
 0x4bb   :  { %2026 = vmatpush.bf16.msrb.mxu0 %v5102_v62  ;;  %2052 = vmatpush.bf16.msrb.mxu2 %v5103_v27  ;;  %v5113_v62 = vld [vmem:[#allocation78_spill] sm:$0xff]  ;;  %v5114_v27 = vld [vmem:[#allocation81_spill] sm:$0xff] }
 0x4bd   :  { %2087 = vmatpush.bf16.msra.mxu1 %v5106_v51  ;;  %2113 = vmatpush.bf16.msra.mxu3 %v5107_v54  ;;  %v5117_v51 = vld [vmem:[#allocation94_spill] sm:$0xff]  ;;  %v5118_v54 = vld [vmem:[#allocation95_spill] sm:$0xff] }
 0x4bf   :  { %2027 = vmatpush.bf16.msrb.mxu0 %v5108_v41  ;;  %2053 = vmatpush.bf16.msrb.mxu2 %v5109_v6  ;;  %v5119_v41 = vld [vmem:[#allocation96_spill] sm:$0xff]  ;;  %v5120_v6 = vld [vmem:[#allocation83_spill] sm:$0xff] }
 0x4c1   :  { %2088 = vmatpush.bf16.msra.mxu1 %v5110_v42  ;;  %2114 = vmatpush.bf16.msra.mxu3 %v5111_v18  ;;  %v5121_v42 = vld [vmem:[#allocation84_spill] sm:$0xff]  ;;  %v5122_v18 = vld [vmem:[#allocation97_spill] sm:$0xff] }
 0x4c3   :  { %2028 = vmatpush.bf16.msrb.mxu0 %v5112_v22  ;;  %2054 = vmatpush.bf16.msrb.mxu2 %v5113_v62  ;;  %v5123_v22 = vld [vmem:[#allocation98_spill] sm:$0xff]  ;;  %v5124_v62 = vld [vmem:[#allocation85_spill] sm:$0xff] }
 0x4c5   :  { %2089 = vmatpush.bf16.msra.mxu1 %v5114_v27  ;;  %2115 = vmatpush.bf16.msra.mxu3 %v5115_v19  ;;  %v5125_v27 = vld [vmem:[#allocation86_spill] sm:$0xff]  ;;  %v5126_v19 = vld [vmem:[#allocation99_spill] sm:$0xff] }
 0x4c7   :  { %2029 = vmatpush.bf16.msrb.mxu0 %v5116_v4  ;;  %2055 = vmatpush.bf16.msrb.mxu2 %v5117_v51  ;;  %v5127_v4 = vld [vmem:[#allocation100_spill] sm:$0xff]  ;;  %v5128_v51 = vld [vmem:[#allocation87_spill] sm:$0xff] }
 0x4c9   :  { %2090 = vmatpush.bf16.msra.mxu1 %v5120_v6  ;;  %2116 = vmatpush.bf16.msra.mxu3 %v5121_v42  ;;  %v5131_v6 = vld [vmem:[#allocation102_spill] sm:$0xff]  ;;  %v5132_v42 = vld [vmem:[#allocation89_spill] sm:$0xff] }
 0x4cb   :  { %2074 = vmatpush.bf16.msra.mxu0 %v5118_v54  ;;  %2100 = vmatpush.bf16.msra.mxu2 %v5119_v41  ;;  %v5129_v54 = vld [vmem:[#allocation88_spill] sm:$0xff]  ;;  %v5130_v41 = vld [vmem:[#allocation101_spill] sm:$0xff] }
 0x4cd   :  { %2091 = vmatpush.bf16.msra.mxu1 %v5124_v62  ;;  %2117 = vmatpush.bf16.msra.mxu3 %v5125_v27  ;;  %v5135_v62 = vld [vmem:[#allocation104_spill] sm:$0xff]  ;;  %v5136_v27 = vld [vmem:[#allocation91_spill] sm:$0xff] }
 0x4cf   :  { %2075 = vmatpush.bf16.msra.mxu0 %v5122_v18  ;;  %2101 = vmatpush.bf16.msra.mxu2 %v5123_v22  ;;  %v5133_v18 = vld [vmem:[#allocation90_spill] sm:$0xff]  ;;  %v5134_v22 = vld [vmem:[#allocation103_spill] sm:$0xff] }
 0x4d1   :  { %2092 = vmatpush.bf16.msra.mxu1 %v5128_v51  ;;  %2118 = vmatpush.bf16.msra.mxu3 %v5129_v54  ;;  %v5139_v51 = vld [vmem:[#allocation106_spill] sm:$0xff]  ;;  %v5140_v54 = vld [vmem:[#allocation107_spill] sm:$0xff] }
 0x4d3   :  { %2076 = vmatpush.bf16.msra.mxu0 %v5126_v19  ;;  %2102 = vmatpush.bf16.msra.mxu2 %v5127_v4  ;;  %v5137_v19 = vld [vmem:[#allocation92_spill] sm:$0xff]  ;;  %v5138_v4 = vld [vmem:[#allocation105_spill] sm:$0xff] }
 0x4d5   :  { %2093 = vmatpush.bf16.msra.mxu1 %v5132_v42  ;;  %2119 = vmatpush.bf16.msra.mxu3 %v5133_v18  ;;  %v5143_v42 = vld [vmem:[#allocation110_spill] sm:$0xff] }
 0x4d7   :  { %2077 = vmatpush.bf16.msra.mxu0 %v5130_v41  ;;  %2103 = vmatpush.bf16.msra.mxu2 %v5131_v6  ;;  %v5141_v41 = vld [vmem:[#allocation108_spill] sm:$0xff]  ;;  %v5142_v6 = vld [vmem:[#allocation109_spill] sm:$0xff] }
 0x4d9   :  { %2094 = vmatpush.bf16.msra.mxu1 %v5136_v27  ;;  %2120 = vmatpush.bf16.msra.mxu3 %v5137_v19  ;;  %v5144_v19 = vld [vmem:[#allocation31_spill] sm:$0xff] }
 0x4db   :  { %2078 = vmatpush.bf16.msra.mxu0 %v5134_v22  ;;  %2104 = vmatpush.bf16.msra.mxu2 %v5135_v62 }
 0x4df   :  { %2079 = vmatpush.bf16.msra.mxu0 %v5138_v4  ;;  %2105 = vmatpush.bf16.msra.mxu2 %v5139_v51  ;;  %v5145_v4 = vld [vmem:[#allocation33_spill] sm:$0xff] }
 0x4e3   :  { %2080 = vmatpush.bf16.msra.mxu0 %v5140_v54  ;;  %2106 = vmatpush.bf16.msra.mxu2 %v5141_v41 }
 0x4e7   :  { %2081 = vmatpush.bf16.msra.mxu0 %v5142_v6  ;;  %2107 = vmatpush.bf16.msra.mxu2 %v5143_v42 }
 0x4f9   :  { %v1839_v18 = vpop.f32.mrf.mxu1 }
 0x4ff   :  { %v1865_v22 = vpop.f32.mrf.mxu3 }
 0x501   :  { %v1841_v25 = vpop.f32.mrf.mxu1 }
 0x507   :  { %v1826_v62 = vpop.f32.mrf.mxu0  ;;  %v1867_v43 = vpop.f32.mrf.mxu3 }
 0x508   :  { %v1827_v32 = vadd.f32 %v1826_v62, %v5144_v19 }
 0x509   :  { %v1891_v27 = vpop.f32.mrf.mxu1 }
 0x50a   :  { %v1840_v41 = vadd.f32 %v1839_v18, %v1827_v32 }
 0x50c   :  { %v1921_v50 = vmul.f32 0.5, %v1840_v41  ;;  %v1942_v41 = vld [vmem:[#allocation4 + $0xc0] sm:$0xff] }
 0x50d   :  { %v1852_v56 = vpop.f32.mrf.mxu2 }
 0x50e   :  { %v1853_v36 = vadd.f32 %v1852_v56, %v5145_v4 }
 0x50f   :  { %v1828_v51 = vpop.f32.mrf.mxu0  ;;  %v1917_v59 = vpop.f32.mrf.mxu3 }
 0x510   :  { %v1866_v54 = vadd.f32 %v1865_v22, %v1853_v36  ;;  %v5146_v51 = vld [vmem:[#allocation37_spill] sm:$0xff] }
 0x511   :  { %v1893_v63 = vpop.f32.mrf.mxu1 }
 0x512   :  { %v1922_v17 = vmul.f32 0.5, %v1866_v54 }
 0x514   :  { %3058 = vtanh.f32 %v1922_v17 }
 0x515   :  { %v1854_v6 = vpop.f32.mrf.mxu2  ;;  %3060 = vtanh.f32 %v1921_v50 }
 0x517   :  { %v1878_v42 = vpop.f32.mrf.mxu0  ;;  %v1919_v10 = vpop.f32.mrf.mxu3 }
 0x518   :  { %v1879_v25 = vadd.f32 %v1878_v42, %v4901_v33 }
 0x519   :  { %v1968_v43 = vpop.f32.mrf.mxu1 }
 0x51a   :  { %v1892_v11 = vadd.f32 %v1891_v27, %v1879_v25  ;;  %v3059_v19 = vpop.eup %3058  ;;  %v1999_v56 = vadd.f32 %v1968_v43, %v1943_v57 }
 0x51b   :  { %v3061_v32 = vpop.eup %3060  ;;  %v1928_v6 = vmul.f32 0.5, %v3059_v19 }
 0x51c   :  { %v1923_v22 = vmul.f32 0.5, %v1892_v11  ;;  %v2003_v10 = vmul.f32 0.5, %v1999_v56  ;;  %v1927_v17 = vmul.f32 0.5, %v3061_v32  ;;  %v1944_v56 = vld [vmem:[#allocation4 + $0xd0] sm:$0xff] }
 0x51d   :  { %v1904_v62 = vpop.f32.mrf.mxu2  ;;  %v1931_v42 = vadd.f32 0.5, %v1928_v6 }
 0x51e   :  { %v1905_v4 = vadd.f32 %v1904_v62, %v5146_v51  ;;  %v1930_v27 = vadd.f32 0.5, %v1927_v17 }
 0x51f   :  { %v1880_v36 = vpop.f32.mrf.mxu0  ;;  %v1994_v63 = vpop.f32.mrf.mxu3 }
 0x520   :  { %v1918_v18 = vadd.f32 %v1917_v59, %v1905_v4  ;;  %v1934_v36 = vmul.f32 %v1931_v42, %v4274_v15  ;;  %v1945_v59 = vld [vmem:[#allocation4 + $0xd8] sm:$0xff] }
 0x521   :  { %v1970_v54 = vpop.f32.mrf.mxu1 }
 0x522   :  { %3062 = vtanh.f32 %v1918_v18  ;;  %v2001_v18 = vadd.f32 %v1994_v63, %v1945_v59 }
 0x523   :  { %3064 = vtanh.f32 %v1923_v22 }
 0x524   :  { %3066 = vtanh.f32 %v2003_v10 }
 0x525   :  { %v1906_v50 = vpop.f32.mrf.mxu2 }
 0x527   :  { %v1955_v25 = vpop.f32.mrf.mxu0  ;;  %v1996_v57 = vpop.f32.mrf.mxu3 }
 0x528   :  { %v3063_v43 = vpop.eup %3062  ;;  %v1998_v62 = vadd.f32 %v1955_v25, %v1942_v41 }
 0x529   :  { %v1935_v51 = vmul.f32 %v3063_v43, %v1930_v27  ;;  %v3065_v11 = vpop.eup %3064 }
 0x52a   :  { %v2002_v19 = vmul.f32 0.5, %v1998_v62  ;;  %v3067_v32 = vpop.eup %3066  ;;  %v1929_v22 = vmul.f32 0.5, %v3065_v11 }
 0x52b   :  { %v4382_v4 = vadd.f32 %v1935_v51, %v1934_v36  ;;  %v2009_v10 = vmul.f32 0.5, %v3067_v32 }
 0x52c   :  { %3068 = vtanh.f32 %v2002_v19  ;;  %v1932_v42 = vadd.f32 0.5, %v1929_v22  ;;  %v5185_v22 = vld [vmem:[#allocation85_spill] sm:$0xff] }
 0x52d   :  { %3070 = vtanh.f32 %v4382_v4  ;;  %v1981_v6 = vpop.f32.mrf.mxu2  ;;  %v2012_v27 = vadd.f32 0.5, %v2009_v10  ;;  %v5187_v10 = vld [vmem:[#allocation99_spill] sm:$0xff] }
 0x52e   :  { %v2000_v54 = vadd.f32 %v1981_v6, %v1944_v56  ;;  %3072 = vtanh.f32 %v2001_v18 }
 0x52f   :  { %v1957_v17 = vpop.f32.mrf.mxu0  ;;  %v2015_v36 = vmul.f32 %v2012_v27, %v4278_v45  ;;  %v5193_v27 = vld [vmem:[#allocation89_spill] sm:$0xff] }
 0x530   :  { %v2004_v50 = vmul.f32 0.5, %v2000_v54  ;;  %v5186_v54 = vld [vmem:[#allocation86_spill] sm:$0xff]  ;;  %v5188_v17 = vld [vmem:[#allocation100_spill] sm:$0xff] }
 0x532   :  { %v3069_v15 = vpop.eup %3068  ;;  %3074 = vtanh.f32 %v2004_v50  ;;  %v5189_v50 = vld [vmem:[#allocation87_spill] sm:$0xff] }
 0x533   :  { %v3071_v41 = vpop.eup %3070  ;;  %v2008_v25 = vmul.f32 0.5, %v3069_v15  ;;  %v5190_v15 = vld [vmem:[#allocation88_spill] sm:$0xff] }
 0x534   :  { %v1938_v51 = vmul.f32 %v3071_v41, %v1932_v42  ;;  %v3073_v63 = vpop.eup %3072  ;;  %v5191_v42 = vld [vmem:[#allocation101_spill] sm:$0xff]  ;;  %v5192_v41 = vld [vmem:[#allocation102_spill] sm:$0xff] }
 0x535   :  { %v2011_v57 = vadd.f32 0.5, %v2008_v25  ;;  %v1983_v43 = vpop.f32.mrf.mxu2  ;;  %v5194_v25 = vld [vmem:[#allocation90_spill] sm:$0xff] }
 0x536   :  { %1940 = vst [vmem:[#allocation13 + $0x28] sm:$0xff] %v1938_v51  ;;  %v2021_v62 = vpack.c.bf16 %v1938_v51, %v1938_v51  ;;  %v5195_v51 = vld [vmem:[#allocation103_spill] sm:$0xff] }
 0x537   :  { %v2016_v59 = vmul.f32 %v3073_v63, %v2011_v57  ;;  %v5196_v57 = vld [vmem:[#allocation104_spill] sm:$0xff]  ;;  %v5197_v43 = vld [vmem:[#allocation91_spill] sm:$0xff] }
 0x538   :  { %2043 = vmatmul.bf16.vlgmr.msrb.gmra.mxu1 %v2021_v62  ;;  %2069 = vmatmul.bf16.vlgmr.msrb.gmra.mxu3 %v2021_v62  ;;  %v3075_v19 = vpop.eup %3074  ;;  %v5198_v63 = vld [vmem:[#allocation92_spill] sm:$0xff] }
 0x539   :  { %v4386_v11 = vadd.f32 %v2016_v59, %v2015_v36  ;;  %2164 = vmatpush.bf16.msrb.mxu1 %v3424_v7  ;;  %2190 = vmatpush.bf16.msrb.mxu3 %v3429_v12  ;;  %v2010_v56 = vmul.f32 0.5, %v3075_v19  ;;  %v5148_v7 = vld [vmem:[#allocation52_spill] sm:$0xff]  ;;  %v5150_v12 = vld [vmem:[#allocation59_spill] sm:$0xff]  ;;  %v5200_v36 = vld [vmem:[#allocation106_spill] sm:$0xff] }
 0x53a   :  { %v5201_v59 = vld [vmem:[#allocation107_spill] sm:$0xff]  ;;  %v5202_v19 = vld [vmem:[#allocation108_spill] sm:$0xff] }
 0x53b   :  { %3076 = vtanh.f32 %v4386_v11  ;;  %v2013_v32 = vadd.f32 0.5, %v2010_v56  ;;  %v5203_v56 = vld [vmem:[#allocation109_spill] sm:$0xff] }
 0x53d   :  { %2165 = vmatpush.bf16.msrb.mxu1 %v4842_v26  ;;  %2191 = vmatpush.bf16.msrb.mxu3 %v4843_v30  ;;  %v5165_v26 = vld [vmem:[#allocation73_spill] sm:$0xff]  ;;  %v5166_v30 = vld [vmem:[#allocation75_spill] sm:$0xff] }
 0x541   :  { %v3077_v18 = vpop.eup %3076  ;;  %2166 = vmatpush.bf16.msrb.mxu1 %v4844_v49  ;;  %2192 = vmatpush.bf16.msrb.mxu3 %v4845_v61  ;;  %v5167_v49 = vld [vmem:[#allocation76_spill] sm:$0xff]  ;;  %v5168_v61 = vld [vmem:[#allocation77_spill] sm:$0xff] }
 0x542   :  { %v2019_v45 = vmul.f32 %v3077_v18, %v2013_v32  ;;  %v5204_v32 = vld [vmem:[#allocation110_spill] sm:$0xff] }
 0x544   :  { %v2020_v6 = vpack.c.bf16 %v2019_v45, %v2019_v45 }
 0x545   :  { %2167 = vmatpush.bf16.msrb.mxu1 %v4846_v9  ;;  %2193 = vmatpush.bf16.msrb.mxu3 %v4847_v0  ;;  %v5169_v9 = vld [vmem:[#allocation70_spill] sm:$0xff]  ;;  %v5170_v0 = vld [vmem:[#allocation72_spill] sm:$0xff] }
 0x546   :  { %2030 = vmatmul.bf16.vlgmr.msrb.gmra.mxu0 %v2020_v6  ;;  %2056 = vmatmul.bf16.vlgmr.msrb.gmra.mxu2 %v2020_v6 }
 0x547   :  { %2151 = vmatpush.bf16.msrb.mxu0 %v3422_v3  ;;  %2177 = vmatpush.bf16.msrb.mxu2 %v3426_v8  ;;  %v5147_v3 = vld [vmem:[#allocation51_spill] sm:$0xff]  ;;  %v5149_v8 = vld [vmem:[#allocation57_spill] sm:$0xff] }
 0x548   :  { %2095 = vmatmul.bf16.vlgmr.msra.gmra.mxu1 %v2021_v62  ;;  %2121 = vmatmul.bf16.vlgmr.msra.gmra.mxu3 %v2021_v62  ;;  %v5199_v62 = vld [vmem:[#allocation105_spill] sm:$0xff] }
 0x549   :  { %2168 = vmatpush.bf16.msrb.mxu1 %v4848_v5  ;;  %2194 = vmatpush.bf16.msrb.mxu3 %v4849_v39  ;;  %v5171_v5 = vld [vmem:[#allocation79_spill] sm:$0xff]  ;;  %v5172_v39 = vld [vmem:[#allocation80_spill] sm:$0xff] }
 0x54b   :  { %2152 = vmatpush.bf16.msrb.mxu0 %v3433_v16  ;;  %2178 = vmatpush.bf16.msrb.mxu2 %v3438_v21  ;;  %v5151_v16 = vld [vmem:[#allocation54_spill] sm:$0xff]  ;;  %v5152_v21 = vld [vmem:[#allocation56_spill] sm:$0xff] }
 0x54d   :  { %2169 = vmatpush.bf16.msrb.mxu1 %v4850_v24  ;;  %2195 = vmatpush.bf16.msrb.mxu3 %v4851_v23  ;;  %v5173_v24 = vld [vmem:[#allocation74_spill] sm:$0xff] }
 0x54e   :  { %v5174_v23 = vld [vmem:[#allocation78_spill] sm:$0xff] }
 0x54f   :  { %2153 = vmatpush.bf16.msrb.mxu0 %v3443_v29  ;;  %2179 = vmatpush.bf16.msrb.mxu2 %v3449_v34  ;;  %v5153_v29 = vld [vmem:[#allocation61_spill] sm:$0xff]  ;;  %v5154_v34 = vld [vmem:[#allocation63_spill] sm:$0xff] }
 0x551   :  { %2170 = vmatpush.bf16.msrb.mxu1 %v4852_v60  ;;  %2196 = vmatpush.bf16.msrb.mxu3 %v4853_v55  ;;  %v5175_v60 = vld [vmem:[#allocation81_spill] sm:$0xff]  ;;  %v5176_v55 = vld [vmem:[#allocation82_spill] sm:$0xff] }
 0x553   :  { %2154 = vmatpush.bf16.msrb.mxu0 %v3455_v44  ;;  %2180 = vmatpush.bf16.msrb.mxu2 %v3461_v46  ;;  %v5155_v44 = vld [vmem:[#allocation58_spill] sm:$0xff]  ;;  %v5156_v46 = vld [vmem:[#allocation60_spill] sm:$0xff] }
 0x555   :  { %2171 = vmatpush.bf16.msrb.mxu1 %v4854_v14  ;;  %2197 = vmatpush.bf16.msrb.mxu3 %v4855_v35  ;;  %v5177_v14 = vld [vmem:[#allocation93_spill] sm:$0xff]  ;;  %v5178_v35 = vld [vmem:[#allocation94_spill] sm:$0xff] }
 0x556   :  { %2082 = vmatmul.bf16.vlgmr.msra.gmra.mxu0 %v2020_v6  ;;  %2108 = vmatmul.bf16.vlgmr.msra.gmra.mxu2 %v2020_v6 }
 0x557   :  { %2155 = vmatpush.bf16.msrb.mxu0 %v4815_v38  ;;  %2181 = vmatpush.bf16.msrb.mxu2 %v4816_v31  ;;  %v5157_v38 = vld [vmem:[#allocation65_spill] sm:$0xff]  ;;  %v5158_v31 = vld [vmem:[#allocation67_spill] sm:$0xff] }
 0x558   :  { %2172 = vmatmul.bf16.vlgmr.msrb.gmra.mxu1 %v2020_v6  ;;  %2198 = vmatmul.bf16.vlgmr.msrb.gmra.mxu3 %v2020_v6 }
 0x559   :  { %2240 = vmatpush.bf16.msra.mxu1 %v4856_v53  ;;  %2266 = vmatpush.bf16.msra.mxu3 %v4857_v28  ;;  %v5179_v53 = vld [vmem:[#allocation95_spill] sm:$0xff]  ;;  %v5180_v28 = vld [vmem:[#allocation96_spill] sm:$0xff] }
 0x55b   :  { %2156 = vmatpush.bf16.msrb.mxu0 %v4818_v52  ;;  %2182 = vmatpush.bf16.msrb.mxu2 %v4819_v58  ;;  %v5159_v52 = vld [vmem:[#allocation62_spill] sm:$0xff]  ;;  %v5160_v58 = vld [vmem:[#allocation64_spill] sm:$0xff] }
 0x55d   :  { %2241 = vmatpush.bf16.msra.mxu1 %v4858_v1  ;;  %2267 = vmatpush.bf16.msra.mxu3 %v4859_v37  ;;  %v5181_v1 = vld [vmem:[#allocation83_spill] sm:$0xff]  ;;  %v5182_v37 = vld [vmem:[#allocation84_spill] sm:$0xff] }
 0x55f   :  { %2157 = vmatpush.bf16.msrb.mxu0 %v4820_v20  ;;  %2183 = vmatpush.bf16.msrb.mxu2 %v4821_v40  ;;  %v5161_v20 = vld [vmem:[#allocation69_spill] sm:$0xff]  ;;  %v5162_v40 = vld [vmem:[#allocation71_spill] sm:$0xff] }
 0x561   :  { %2242 = vmatpush.bf16.msra.mxu1 %v4903_v2  ;;  %2268 = vmatpush.bf16.msra.mxu3 %v4904_v13  ;;  %v5183_v2 = vld [vmem:[#allocation97_spill] sm:$0xff]  ;;  %v5184_v13 = vld [vmem:[#allocation98_spill] sm:$0xff] }
 0x563   :  { %2158 = vmatpush.bf16.msrb.mxu0 %v4822_v48  ;;  %2184 = vmatpush.bf16.msrb.mxu2 %v4823_v47  ;;  %v5163_v48 = vld [vmem:[#allocation66_spill] sm:$0xff]  ;;  %v5164_v47 = vld [vmem:[#allocation68_spill] sm:$0xff] }
 0x565   :  { %2243 = vmatpush.bf16.msra.mxu1 %v5149_v8  ;;  %2269 = vmatpush.bf16.msra.mxu3 %v5150_v12 }
 0x566   :  { %2159 = vmatmul.bf16.vlgmr.msrb.gmra.mxu0 %v2020_v6  ;;  %2185 = vmatmul.bf16.vlgmr.msrb.gmra.mxu2 %v2020_v6 }
 0x567   :  { %2227 = vmatpush.bf16.msra.mxu0 %v5147_v3  ;;  %2253 = vmatpush.bf16.msra.mxu2 %v5148_v7 }
 0x569   :  { %2244 = vmatpush.bf16.msra.mxu1 %v5153_v29  ;;  %2270 = vmatpush.bf16.msra.mxu3 %v5154_v34  ;;  %v5206_v29 = vld [vmem:[#allocation33_spill] sm:$0xff] }
 0x56b   :  { %2228 = vmatpush.bf16.msra.mxu0 %v5151_v16  ;;  %2254 = vmatpush.bf16.msra.mxu2 %v5152_v21  ;;  %v5205_v16 = vld [vmem:[#allocation31_spill] sm:$0xff] }
 0x56d   :  { %2245 = vmatpush.bf16.msra.mxu1 %v5157_v38  ;;  %2271 = vmatpush.bf16.msra.mxu3 %v5158_v31 }
 0x56f   :  { %2229 = vmatpush.bf16.msra.mxu0 %v5155_v44  ;;  %2255 = vmatpush.bf16.msra.mxu2 %v5156_v46 }
 0x571   :  { %2246 = vmatpush.bf16.msra.mxu1 %v5161_v20  ;;  %2272 = vmatpush.bf16.msra.mxu3 %v5162_v40 }
 0x573   :  { %2230 = vmatpush.bf16.msra.mxu0 %v5159_v52  ;;  %2256 = vmatpush.bf16.msra.mxu2 %v5160_v58 }
 0x575   :  { %2247 = vmatpush.bf16.msra.mxu1 %v5165_v26  ;;  %2273 = vmatpush.bf16.msra.mxu3 %v5166_v30  ;;  %v2148_v26 = vld [vmem:[#allocation4 + $0xe8] sm:$0xff] }
 0x577   :  { %2231 = vmatpush.bf16.msra.mxu0 %v5163_v48  ;;  %2257 = vmatpush.bf16.msra.mxu2 %v5164_v47 }
 0x579   :  { %2292 = vmatpush.bf16.msrb.mxu1 %v5167_v49  ;;  %2318 = vmatpush.bf16.msrb.mxu3 %v5168_v61 }
 0x57b   :  { %2232 = vmatpush.bf16.msra.mxu0 %v5169_v9  ;;  %2258 = vmatpush.bf16.msra.mxu2 %v5170_v0 }
 0x57d   :  { %2293 = vmatpush.bf16.msrb.mxu1 %v5171_v5  ;;  %2319 = vmatpush.bf16.msrb.mxu3 %v5172_v39  ;;  %v2150_v39 = vld [vmem:[#allocation4 + $0xf8] sm:$0xff] }
 0x57f   :  { %2233 = vmatpush.bf16.msra.mxu0 %v5173_v24  ;;  %2259 = vmatpush.bf16.msra.mxu2 %v5174_v23  ;;  %v5207_v23 = vld [vmem:[#allocation37_spill] sm:$0xff] }
 0x581   :  { %2294 = vmatpush.bf16.msrb.mxu1 %v5175_v60  ;;  %2320 = vmatpush.bf16.msrb.mxu3 %v5176_v55 }
 0x583   :  { %2234 = vmatpush.bf16.msra.mxu0 %v5177_v14  ;;  %2260 = vmatpush.bf16.msra.mxu2 %v5178_v35 }
 0x585   :  { %2295 = vmatpush.bf16.msrb.mxu1 %v5181_v1  ;;  %2321 = vmatpush.bf16.msrb.mxu3 %v5182_v37 }
 0x587   :  { %2279 = vmatpush.bf16.msrb.mxu0 %v5179_v53  ;;  %2305 = vmatpush.bf16.msrb.mxu2 %v5180_v28 }
 0x589   :  { %2296 = vmatpush.bf16.msrb.mxu1 %v5185_v22  ;;  %2322 = vmatpush.bf16.msrb.mxu3 %v5186_v54 }
 0x58b   :  { %2280 = vmatpush.bf16.msrb.mxu0 %v5183_v2  ;;  %2306 = vmatpush.bf16.msrb.mxu2 %v5184_v13 }
 0x58d   :  { %2297 = vmatpush.bf16.msrb.mxu1 %v5189_v50  ;;  %2323 = vmatpush.bf16.msrb.mxu3 %v5190_v15 }
 0x58f   :  { %2281 = vmatpush.bf16.msrb.mxu0 %v5187_v10  ;;  %2307 = vmatpush.bf16.msrb.mxu2 %v5188_v17  ;;  %v2147_v17 = vld [vmem:[#allocation4 + $0xe0] sm:$0xff] }
 0x591   :  { %2298 = vmatpush.bf16.msrb.mxu1 %v5193_v27  ;;  %2324 = vmatpush.bf16.msrb.mxu3 %v5194_v25 }
 0x593   :  { %2282 = vmatpush.bf16.msrb.mxu0 %v5191_v42  ;;  %2308 = vmatpush.bf16.msrb.mxu2 %v5192_v41 }
 0x595   :  { %2299 = vmatpush.bf16.msrb.mxu1 %v5197_v43  ;;  %2325 = vmatpush.bf16.msrb.mxu3 %v5198_v63 }
 0x597   :  { %2283 = vmatpush.bf16.msrb.mxu0 %v5195_v51  ;;  %2309 = vmatpush.bf16.msrb.mxu2 %v5196_v57 }
 0x59b   :  { %2284 = vmatpush.bf16.msrb.mxu0 %v5199_v62  ;;  %2310 = vmatpush.bf16.msrb.mxu2 %v5200_v36 }
 0x59f   :  { %2285 = vmatpush.bf16.msrb.mxu0 %v5201_v59  ;;  %2311 = vmatpush.bf16.msrb.mxu2 %v5202_v19  ;;  %v2149_v19 = vld [vmem:[#allocation4 + $0xf0] sm:$0xff] }
 0x5a3   :  { %2286 = vmatpush.bf16.msrb.mxu0 %v5203_v56  ;;  %2312 = vmatpush.bf16.msrb.mxu2 %v5204_v32 }
 0x5b5   :  { %v2044_v18 = vpop.f32.mrf.mxu1 }
 0x5bb   :  { %v2070_v45 = vpop.f32.mrf.mxu3 }
 0x5bd   :  { %v2046_v6 = vpop.f32.mrf.mxu1 }
 0x5c3   :  { %v2031_v3 = vpop.f32.mrf.mxu0  ;;  %v2072_v7 = vpop.f32.mrf.mxu3 }
 0x5c4   :  { %v2032_v21 = vadd.f32 %v2031_v3, %v5205_v16 }
 0x5c5   :  { %v2096_v8 = vpop.f32.mrf.mxu1 }
 0x5c6   :  { %v2045_v52 = vadd.f32 %v2044_v18, %v2032_v21 }
 0x5c8   :  { %v2126_v40 = vmul.f32 0.5, %v2045_v52 }
 0x5c9   :  { %v2057_v12 = vpop.f32.mrf.mxu2 }
 0x5ca   :  { %v2058_v34 = vadd.f32 %v2057_v12, %v5206_v29 }
 0x5cb   :  { %v2033_v44 = vpop.f32.mrf.mxu0  ;;  %v2122_v46 = vpop.f32.mrf.mxu3 }
 0x5cc   :  { %v2071_v38 = vadd.f32 %v2070_v45, %v2058_v34 }
 0x5cd   :  { %v2098_v31 = vpop.f32.mrf.mxu1 }
 0x5ce   :  { %v2127_v58 = vmul.f32 0.5, %v2071_v38 }
 0x5d0   :  { %3078 = vtanh.f32 %v2127_v58 }
 0x5d1   :  { %v2059_v20 = vpop.f32.mrf.mxu2  ;;  %3080 = vtanh.f32 %v2126_v40 }
 0x5d3   :  { %v2083_v48 = vpop.f32.mrf.mxu0  ;;  %v2124_v47 = vpop.f32.mrf.mxu3 }
 0x5d4   :  { %v2084_v30 = vadd.f32 %v2083_v48, %v4901_v33 }
 0x5d5   :  { %v2173_v49 = vpop.f32.mrf.mxu1 }
 0x5d6   :  { %v2204_v61 = vadd.f32 %v2173_v49, %v2148_v26  ;;  %v2097_v0 = vadd.f32 %v2096_v8, %v2084_v30  ;;  %v3079_v24 = vpop.eup %3078 }
 0x5d7   :  { %v3081_v35 = vpop.eup %3080  ;;  %v2133_v1 = vmul.f32 0.5, %v3079_v24 }
 0x5d8   :  { %v2208_v9 = vmul.f32 0.5, %v2204_v61  ;;  %v2128_v37 = vmul.f32 0.5, %v2097_v0  ;;  %v2132_v13 = vmul.f32 0.5, %v3081_v35 }
 0x5d9   :  { %v2109_v5 = vpop.f32.mrf.mxu2  ;;  %v2136_v54 = vadd.f32 0.5, %v2133_v1 }
 0x5da   :  { %v2110_v60 = vadd.f32 %v2109_v5, %v5207_v23  ;;  %3082 = vtanh.f32 %v2208_v9  ;;  %v2135_v15 = vadd.f32 0.5, %v2132_v13 }
 0x5db   :  { %v2085_v55 = vpop.f32.mrf.mxu0  ;;  %v2199_v14 = vpop.f32.mrf.mxu3  ;;  %v2139_v43 = vmul.f32 %v2136_v54, %v4382_v4 }
 0x5dc   :  { %v2123_v53 = vadd.f32 %v2122_v46, %v2110_v60  ;;  %v2206_v28 = vadd.f32 %v2199_v14, %v2150_v39 }
 0x5dd   :  { %v2175_v2 = vpop.f32.mrf.mxu1 }
 0x5de   :  { %3084 = vtanh.f32 %v2123_v53 }
 0x5df   :  { %3086 = vtanh.f32 %v2206_v28 }
 0x5e0   :  { %v3083_v22 = vpop.eup %3082  ;;  %3088 = vtanh.f32 %v2128_v37 }
 0x5e1   :  { %v2111_v10 = vpop.f32.mrf.mxu2  ;;  %v2214_v50 = vmul.f32 0.5, %v3083_v22 }
 0x5e3   :  { %v2160_v42 = vpop.f32.mrf.mxu0  ;;  %v2201_v41 = vpop.f32.mrf.mxu3  ;;  %v2217_v25 = vadd.f32 0.5, %v2214_v50 }
 0x5e4   :  { %v3085_v27 = vpop.eup %3084  ;;  %v2203_v51 = vadd.f32 %v2160_v42, %v2147_v17 }
 0x5e5   :  { %v3087_v57 = vpop.eup %3086  ;;  %v2140_v63 = vmul.f32 %v3085_v27, %v2135_v15  ;;  %2362 = vst [vmem:[#allocation17 + $0x10] sm:$0xff] %v2217_v25  ;;  %v2220_v46 = vmul.f32 %v2217_v25, %v4386_v11 }
 0x5e6   :  { %v2207_v62 = vmul.f32 0.5, %v2203_v51  ;;  %v3089_v36 = vpop.eup %3088  ;;  %2364 = vst [vmem:[#allocation17 + $0x20] sm:$0xff] %v3087_v57 }
 0x5e7   :  { %v4490_v59 = vadd.f32 %v2140_v63, %v2139_v43  ;;  %v2134_v32 = vmul.f32 0.5, %v3089_v36 }
 0x5e8   :  { %3090 = vtanh.f32 %v2207_v62 }
 0x5e9   :  { %3092 = vtanh.f32 %v4490_v59  ;;  %v2186_v56 = vpop.f32.mrf.mxu2  ;;  %v2137_v7 = vadd.f32 0.5, %v2134_v32 }
 0x5ea   :  { %v2205_v18 = vadd.f32 %v2186_v56, %v2149_v19 }
 0x5eb   :  { %v2162_v45 = vpop.f32.mrf.mxu0 }
 0x5ec   :  { %v2209_v6 = vmul.f32 0.5, %v2205_v18 }
 0x5ee   :  { %v3091_v3 = vpop.eup %3090  ;;  %3094 = vtanh.f32 %v2209_v6 }
 0x5ef   :  { %v3093_v4 = vpop.eup %3092  ;;  %v2213_v8 = vmul.f32 0.5, %v3091_v3 }
 0x5f0   :  { %v2143_v12 = vmul.f32 %v3093_v4, %v2137_v7 }
 0x5f1   :  { %v2216_v21 = vadd.f32 0.5, %v2213_v8  ;;  %v2188_v34 = vpop.f32.mrf.mxu2 }
 0x5f2   :  { %2145 = vst [vmem:[#allocation13 + $0x30] sm:$0xff] %v2143_v12  ;;  %v2226_v44 = vpack.c.bf16 %v2143_v12, %v2143_v12 }
 0x5f3   :  { %v2221_v38 = vmul.f32 %v3087_v57, %v2216_v21  ;;  %2360 = vst [vmem:[#allocation17] sm:$0xff] %v2216_v21 }
 0x5f4   :  { %v3095_v31 = vpop.eup %3094  ;;  %2248 = vmatmul.bf16.vlgmr.msra.gmra.mxu1 %v2226_v44  ;;  %2274 = vmatmul.bf16.vlgmr.msra.gmra.mxu3 %v2226_v44 }
 0x5f5   :  { %v2222_v52 = vadd.f32 %v2221_v38, %v2220_v46  ;;  %v2215_v58 = vmul.f32 0.5, %v3095_v31 }
 0x5f7   :  { %3096 = vtanh.f32 %v2222_v52  ;;  %2359 = vst [vmem:[#allocation16] sm:$0xff] %v2222_v52  ;;  %v2218_v20 = vadd.f32 0.5, %v2215_v58 }
 0x5f9   :  { %2366 = vst [vmem:[#allocation17 + $0x30] sm:$0xff] %v2218_v20 }
 0x5fd   :  { %v3097_v40 = vpop.eup %3096 }
 0x5fe   :  { %v2224_v48 = vmul.f32 %v3097_v40, %v2218_v20 }
 0x600   :  { %v2225_v47 = vpack.c.bf16 %v2224_v48, %v2224_v48  ;;  %2358 = vst [vmem:[#allocation14] sm:$0xff] %v2224_v48 }
 0x602   :  { %2235 = vmatmul.bf16.vlgmr.msra.gmra.mxu0 %v2225_v47  ;;  %2261 = vmatmul.bf16.vlgmr.msra.gmra.mxu2 %v2225_v47 }
 0x604   :  { %2300 = vmatmul.bf16.vlgmr.msrb.gmra.mxu1 %v2226_v44  ;;  %2326 = vmatmul.bf16.vlgmr.msrb.gmra.mxu3 %v2226_v44 }
 0x612   :  { %2287 = vmatmul.bf16.vlgmr.msrb.gmra.mxu0 %v2225_v47  ;;  %2313 = vmatmul.bf16.vlgmr.msrb.gmra.mxu2 %v2225_v47 }
 0x671   :  { %v2249_v11 = vpop.f32.mrf.mxu1 }
 0x677   :  { %v2275_v26 = vpop.f32.mrf.mxu3 }
 0x679   :  { %v2251_v30 = vpop.f32.mrf.mxu1 }
 0x67f   :  { %v2236_v49 = vpop.f32.mrf.mxu0  ;;  %v2277_v61 = vpop.f32.mrf.mxu3 }
 0x680   :  { %v2237_v9 = vadd.f32 %v2236_v49, %v5205_v16 }
 0x681   :  { %v2301_v0 = vpop.f32.mrf.mxu1 }
 0x682   :  { %v2250_v5 = vadd.f32 %v2249_v11, %v2237_v9 }
 0x684   :  { %v2331_v39 = vmul.f32 0.5, %v2250_v5 }
 0x685   :  { %v2262_v24 = vpop.f32.mrf.mxu2 }
 0x686   :  { %3098 = vtanh.f32 %v2331_v39  ;;  %v2263_v60 = vadd.f32 %v2262_v24, %v5206_v29 }
 0x687   :  { %v2238_v55 = vpop.f32.mrf.mxu0  ;;  %v2327_v14 = vpop.f32.mrf.mxu3 }
 0x688   :  { %v2276_v35 = vadd.f32 %v2275_v26, %v2263_v60 }
 0x689   :  { %v2303_v53 = vpop.f32.mrf.mxu1 }
 0x68a   :  { %v2332_v28 = vmul.f32 0.5, %v2276_v35 }
 0x68c   :  { %v3099_v1 = vpop.eup %3098  ;;  %3100 = vtanh.f32 %v2332_v28 }
 0x68d   :  { %v2337_v37 = vmul.f32 0.5, %v3099_v1  ;;  %v2264_v2 = vpop.f32.mrf.mxu2 }
 0x68f   :  { %v2340_v13 = vadd.f32 0.5, %v2337_v37  ;;  %v2288_v22 = vpop.f32.mrf.mxu0  ;;  %v2329_v54 = vpop.f32.mrf.mxu3 }
 0x690   :  { %v2289_v16 = vadd.f32 %v2288_v22, %v4901_v33 }
 0x691   :  { %2372 = vst [vmem:[#allocation17 + $0x8] sm:$0xff] %v2340_v13 }
 0x692   :  { %v3101_v10 = vpop.eup %3100  ;;  %v2302_v17 = vadd.f32 %v2301_v0, %v2289_v16 }
 0x693   :  { %v2338_v50 = vmul.f32 0.5, %v3101_v10 }
 0x694   :  { %v2333_v15 = vmul.f32 0.5, %v2302_v17 }
 0x695   :  { %v2341_v29 = vadd.f32 0.5, %v2338_v50  ;;  %v2314_v42 = vpop.f32.mrf.mxu2 }
 0x696   :  { %3102 = vtanh.f32 %v2333_v15  ;;  %v2315_v41 = vadd.f32 %v2314_v42, %v5207_v23 }
 0x697   :  { %2374 = vst [vmem:[#allocation17 + $0x18] sm:$0xff] %v2341_v29  ;;  %v2290_v27 = vpop.f32.mrf.mxu0  ;;  %v2344_v62 = vmul.f32 %v2341_v29, %v4490_v59 }
 0x698   :  { %v2328_v25 = vadd.f32 %v2327_v14, %v2315_v41 }
 0x69a   :  { %3104 = vtanh.f32 %v2328_v25 }
 0x69c   :  { %v3103_v51 = vpop.eup %3102 }
 0x69d   :  { %v2339_v57 = vmul.f32 0.5, %v3103_v51  ;;  %v2316_v43 = vpop.f32.mrf.mxu2 }
 0x69f   :  { %v2342_v33 = vadd.f32 0.5, %v2339_v57 }
 0x6a0   :  { %v3105_v63 = vpop.eup %3104 }
 0x6a1   :  { %2378 = vst [vmem:[#allocation17 + $0x38] sm:$0xff] %v2342_v33  ;;  %v2345_v23 = vmul.f32 %v3105_v63, %v2340_v13 }
 0x6a2   :  { %2376 = vst [vmem:[#allocation17 + $0x28] sm:$0xff] %v3105_v63 }
 0x6a3   :  { %v2346_v36 = vadd.f32 %v2345_v23, %v2344_v62  ;;  %2430 = dma.vmem_to_hbm [thread:$0]  %s2423_s16, 1024, %s2425_s1, [#allocation18], %s3337_s17, %s3337_s17, %s3338_s18  }
 0x6a5   :  { %3106 = vtanh.f32 %v2346_v36  ;;  %2370 = vst [vmem:[#allocation16 + $0x8] sm:$0xff] %v2346_v36 }
 0x6ab   :  { %v3107_v59 = vpop.eup %3106 }
 0x6ac   :  { %v2348_v19 = vmul.f32 %v3107_v59, %v2342_v33 }
 0x6ae   :  { %2350 = vst [vmem:[#allocation13 + $0x38] sm:$0xff] %v2348_v19 }
 0x6af   :  { %2368 = vst [vmem:[#allocation14 + $0x8] sm:$0xff] %v2348_v19  ;;  %2391 = dma.vmem_to_hbm [thread:$0]  %s2384_s22, 1024, %s2386_s24, [#allocation6], %s3337_s17, %s3337_s17, %s3338_s18  }
 0x6b0   :  { %2404 = dma.vmem_to_hbm [thread:$0]  %s2397_s3, 256, %s2399_s28, [#allocation15], %s3337_s17, %s3337_s17, %s3338_s18  }
 0x6b1   :  { %2417 = dma.vmem_to_hbm [thread:$0]  %s2410_s30, 256, %s2412_s12, [#allocation15], %s3337_s17, %s3337_s17, %s3338_s18  }
 0x6b2   :  { %3330 = dma.done.wait [#allocation6], 1024  }
 0x6b3   :  { %3331 = vsyncadd [#allocation6], 4294966272 }
 0x6b4   :  { %3332 = dma.done.wait [#allocation15], 512  }
 0x6b5   :  { %3333 = vsyncadd [#allocation15], 4294966784 }
 0x6b6   :  { %3334 = dma.done.wait [#allocation18], 1024  }
 0x6b7   :  { %3335 = vsyncadd [#allocation18], 4294966272 }
 0x6b8   :  { %2447 = vsyncpa [#allocation5], 1 }
 0x6b9   :  { %2448 = vsyncpa [#allocation8], 1 }
 0x6ba   :  { %2449 = vsyncpa [#allocation11], 1 }
 0x6bb   :  { %2450 = vsyncpa [#allocation6], 1 }
 0x6bc   :  { %2451 = vsyncpa [#allocation15], 1 }
 0x6bd   :  { %2452 = vsyncpa [#allocation18], 1 }

</bundles_post_ra>
